<compile_context>
chip_gen: v5e
topology: v5e:2x2
jax: 0.10.0
libtpu: 0.0.40
codegen_flags: <defaults>
</compile_context>

<pallas_src>
import jax
import jax.numpy as jnp
from jax.experimental import pallas as pl
from jax.experimental.pallas import tpu as pltpu

HIDDEN = 512
PAD_N = 128          # lane-dense padded width for the (B, 1) output
BN_EPS = 1e-5
N_BLOCKS = 4


def _linear_bn_relu(x, w_ref, gamma, beta):
    """Linear (bias-free; it cancels against BN) -> BatchNorm1d -> ReLU."""
    # bf16 x bf16 MXU matmul, f32 accumulation.
    z = jnp.dot(x.astype(jnp.bfloat16), w_ref[...],
                preferred_element_type=jnp.float32)            # (B, 512) f32
    mean = jnp.mean(z, axis=0, keepdims=True)                  # (1, 512)
    var = jnp.maximum(
        jnp.mean(z * z, axis=0, keepdims=True) - mean * mean, 0.0)
    scale = gamma * jax.lax.rsqrt(var + BN_EPS)                # (1, 512)
    shift = beta - mean * scale                                # (1, 512)
    return jnp.maximum(z * scale + shift, 0.0)                 # single VPU pass


def domain_classifier_kernel(h_ref, w1, w2, w3, w4, vec_ref, out_ref):
    # vec_ref rows: 0..3 = gamma1..4, 4..7 = beta1..4, 8 = w5, 9 = b5 (broadcast).
    x = h_ref[...].astype(jnp.float32)
    x = _linear_bn_relu(x, w1, vec_ref[0:1, :], vec_ref[4:5, :])
    x = _linear_bn_relu(x, w2, vec_ref[1:2, :], vec_ref[5:6, :])
    x = _linear_bn_relu(x, w3, vec_ref[2:3, :], vec_ref[6:7, :])
    x = _linear_bn_relu(x, w4, vec_ref[3:4, :], vec_ref[7:8, :])

    # Final Linear(512, 1): cross-lane reduce (XLU) instead of a zero-padded
    # MXU matmul.  b5 is pre-broadcast across lanes, so the add also produces
    # the lane-dense (B, 128) output (every column equals the real logit).
    w5 = vec_ref[8:9, :]                                       # (1, 512)
    b5_row = vec_ref[9:10, 0:PAD_N]                            # (1, 128) == b5
    y = jnp.sum(x * w5, axis=-1, keepdims=True)                # (B, 1)
    out_ref[...] = (y + b5_row).astype(out_ref.dtype)          # (B, 128)


def pack_kernel_params(params):
    """PyTorch-style params -> (4x bf16 weights, one packed (10,512) f32 array)."""
    ws = [w.astype(jnp.bfloat16) for (w, _, _, _) in params["blocks"]]
    rows = [g.reshape(HIDDEN) for (_, _, g, _) in params["blocks"]]
    rows += [be.reshape(HIDDEN) for (_, _, _, be) in params["blocks"]]
    rows.append(params["w5"])                                  # (512,)
    rows.append(jnp.full((HIDDEN,), params["b5"], jnp.float32))
    vecs = jnp.stack(rows, axis=0)                             # (10, 512) f32
    return ws, vecs


def domain_classifier(h, params):
    """h: (B, 512) float32.  Returns (B, 1) float32."""
    B = h.shape[0]
    ws, vecs = pack_kernel_params(params)

    flops = 2 * B * HIDDEN * HIDDEN * N_BLOCKS + 2 * B * HIDDEN
    bytes_accessed = (N_BLOCKS * HIDDEN * HIDDEN * 2   # bf16 weights
                      + vecs.size * 4                  # packed vectors
                      + B * HIDDEN * 4                 # h
                      + B * PAD_N * 4)                 # out
    cost = pl.CostEstimate(flops=flops,
                           transcendentals=N_BLOCKS * HIDDEN,  # rsqrt per feature
                           bytes_accessed=bytes_accessed)

    out = pl.pallas_call(
        domain_classifier_kernel,
        out_shape=jax.ShapeDtypeStruct((B, PAD_N), jnp.float32),
        in_specs=[pl.BlockSpec(memory_space=pltpu.MemorySpace.VMEM)] * 6,
        out_specs=pl.BlockSpec(memory_space=pltpu.MemorySpace.VMEM),
        compiler_params=pltpu.CompilerParams(
            vmem_limit_bytes=32 * 1024 * 1024),
        cost_estimate=cost,
    )(h, *ws, vecs)
    # TODO(synk): at real serving scale, hide the ~2 MiB weight read behind the
    # kernel that produces h (cross-pallas_call prefetch, pattern P10).
    return out[:, :1]


def make_params(key):
    """Deterministic synthetic parameters (PyTorch-style shapes/init)."""
    keys = jax.random.split(key, 32)
    ki = iter(range(32))
    bound = 1.0 / (HIDDEN ** 0.5)
    blocks = []
    for _ in range(N_BLOCKS):
        # nn.Linear(512, 512): weight (out, in), bias (out,) -> stored transposed.
        w = jax.random.uniform(keys[next(ki)], (HIDDEN, HIDDEN),
                               jnp.float32, -bound, bound).T
        b = jax.random.uniform(keys[next(ki)], (1, HIDDEN),
                               jnp.float32, -bound, bound)
        # nn.BatchNorm1d(512): gamma, beta (deterministic, non-trivial).
        g = 1.0 + 0.1 * jax.random.normal(keys[next(ki)], (1, HIDDEN), jnp.float32)
        be = 0.1 * jax.random.normal(keys[next(ki)], (1, HIDDEN), jnp.float32)
        blocks.append((w, b, g, be))
    # nn.Linear(512, 1)
    w5 = jax.random.uniform(keys[next(ki)], (1, HIDDEN),
                            jnp.float32, -bound, bound).reshape(HIDDEN)
    b5 = jax.random.uniform(keys[next(ki)], (1,), jnp.float32, -bound, bound)[0]
    return {"blocks": blocks, "w5": w5, "b5": b5}


def reference_forward(h, params):
    """Pure-JAX reference with full PyTorch semantics (incl. hidden Linear
    biases, two-pass variance).  Weights are taken at their bf16-stored values
    so the only kernel/reference difference is activation-precision inside the
    bf16 MXU dot."""
    x = h.astype(jnp.float32)
    for (w, b, g, be) in params["blocks"]:
        wq = w.astype(jnp.bfloat16).astype(jnp.float32)
        z = x @ wq + b
        mean = jnp.mean(z, axis=0, keepdims=True)
        var = jnp.mean((z - mean) ** 2, axis=0, keepdims=True)
        x = jnp.maximum((z - mean) / jnp.sqrt(var + BN_EPS) * g + be, 0.0)
    y = x @ params["w5"].reshape(HIDDEN, 1) + params["b5"]
    return y


if __name__ == "__main__":
    key = jax.random.PRNGKey(0)
    k_param, k_input = jax.random.split(key)

    B = 8  # batch size (>= 2 required for BatchNorm batch statistics)
    params = make_params(k_param)
    h = jax.random.normal(k_input, (B, HIDDEN), jnp.float32)

    y = domain_classifier(h, params)
    y = jax.block_until_ready(y)

    y_ref = reference_forward(h, params)
    assert y.shape == (B, 1), y.shape
    # bf16 activations inside the MXU dot => looser tolerance than pure f32.
    assert jnp.allclose(y, y_ref, atol=3e-2, rtol=3e-2), (
        f"max abs diff {jnp.max(jnp.abs(y - y_ref))}")

    print("KERNEL_OK")
</pallas_src>

<mosaic_0001>
module attributes {stable_mosaic.version = 11 : i64} {
  func.func @domain_classifier_kernel(%arg0: memref<8x512xf32, #tpu.memory_space<vmem>>, %arg1: memref<512x512xbf16, #tpu.memory_space<vmem>>, %arg2: memref<512x512xbf16, #tpu.memory_space<vmem>>, %arg3: memref<512x512xbf16, #tpu.memory_space<vmem>>, %arg4: memref<512x512xbf16, #tpu.memory_space<vmem>>, %arg5: memref<10x512xf32, #tpu.memory_space<vmem>>, %arg6: memref<8x128xf32, #tpu.memory_space<vmem>>) attributes {dimension_semantics = [], scalar_prefetch = 0 : i64, scratch_operands = 0 : i64, tpu.core_type = #tpu.core_type<tc>} {
    %c0 = arith.constant 0 : index
    %c0_0 = arith.constant 0 : index
    %0 = vector.load %arg0[%c0, %c0_0] : memref<8x512xf32, #tpu.memory_space<vmem>>, vector<8x512xf32>
    %c0_1 = arith.constant 0 : index
    %c0_2 = arith.constant 0 : index
    %1 = vector.load %arg5[%c0_1, %c0_2] : memref<10x512xf32, #tpu.memory_space<vmem>>, vector<1x512xf32>
    %c4 = arith.constant 4 : index
    %c0_3 = arith.constant 0 : index
    %2 = vector.load %arg5[%c4, %c0_3] : memref<10x512xf32, #tpu.memory_space<vmem>>, vector<1x512xf32>
    %3 = arith.truncf %0 : vector<8x512xf32> to vector<8x512xbf16>
    %c0_4 = arith.constant 0 : index
    %c0_5 = arith.constant 0 : index
    %4 = vector.load %arg1[%c0_4, %c0_5] : memref<512x512xbf16, #tpu.memory_space<vmem>>, vector<512x512xbf16>
    %cst = arith.constant dense<0.000000e+00> : vector<8x512xf32>
    %5 = tpu.matmul %3, %4, %cst {dimension_numbers = #tpu.dot_dimension_numbers<[1], [0], [0], [1], [0, 0, 1, 1], [], []>} : vector<8x512xbf16>, vector<512x512xbf16>, vector<8x512xf32> -> vector<8x512xf32>
    %cst_6 = arith.constant dense<0.000000e+00> : vector<512xf32>
    %6 = vector.multi_reduction <add>, %5, %cst_6 [0] : vector<8x512xf32> to vector<512xf32>
    %7 = vector.shape_cast %6 : vector<512xf32> to vector<1x512xf32>
    %cst_7 = arith.constant 8.000000e+00 : f32
    %8 = vector.broadcast %cst_7 : f32 to vector<1x512xf32>
    %9 = arith.divf %7, %8 : vector<1x512xf32>
    %10 = arith.mulf %5, %5 : vector<8x512xf32>
    %cst_8 = arith.constant dense<0.000000e+00> : vector<512xf32>
    %11 = vector.multi_reduction <add>, %10, %cst_8 [0] : vector<8x512xf32> to vector<512xf32>
    %12 = vector.shape_cast %11 : vector<512xf32> to vector<1x512xf32>
    %cst_9 = arith.constant 8.000000e+00 : f32
    %13 = vector.broadcast %cst_9 : f32 to vector<1x512xf32>
    %14 = arith.divf %12, %13 : vector<1x512xf32>
    %15 = arith.mulf %9, %9 : vector<1x512xf32>
    %16 = arith.subf %14, %15 : vector<1x512xf32>
    %cst_10 = arith.constant 0.000000e+00 : f32
    %17 = vector.broadcast %cst_10 : f32 to vector<1x512xf32>
    %18 = arith.maximumf %16, %17 : vector<1x512xf32>
    %cst_11 = arith.constant 9.99999974E-6 : f32
    %19 = vector.broadcast %cst_11 : f32 to vector<1x512xf32>
    %20 = arith.addf %18, %19 : vector<1x512xf32>
    %21 = math.rsqrt %20 : vector<1x512xf32>
    %22 = arith.mulf %1, %21 : vector<1x512xf32>
    %23 = arith.mulf %9, %22 : vector<1x512xf32>
    %24 = arith.subf %2, %23 : vector<1x512xf32>
    %25 = vector.broadcast %22 : vector<1x512xf32> to vector<8x512xf32>
    %26 = arith.mulf %5, %25 : vector<8x512xf32>
    %27 = vector.broadcast %24 : vector<1x512xf32> to vector<8x512xf32>
    %28 = arith.addf %26, %27 : vector<8x512xf32>
    %cst_12 = arith.constant 0.000000e+00 : f32
    %29 = vector.broadcast %cst_12 : f32 to vector<8x512xf32>
    %30 = arith.maximumf %28, %29 : vector<8x512xf32>
    %c1 = arith.constant 1 : index
    %c0_13 = arith.constant 0 : index
    %31 = vector.load %arg5[%c1, %c0_13] : memref<10x512xf32, #tpu.memory_space<vmem>>, vector<1x512xf32>
    %c5 = arith.constant 5 : index
    %c0_14 = arith.constant 0 : index
    %32 = vector.load %arg5[%c5, %c0_14] : memref<10x512xf32, #tpu.memory_space<vmem>>, vector<1x512xf32>
    %33 = arith.truncf %30 : vector<8x512xf32> to vector<8x512xbf16>
    %c0_15 = arith.constant 0 : index
    %c0_16 = arith.constant 0 : index
    %34 = vector.load %arg2[%c0_15, %c0_16] : memref<512x512xbf16, #tpu.memory_space<vmem>>, vector<512x512xbf16>
    %cst_17 = arith.constant dense<0.000000e+00> : vector<8x512xf32>
    %35 = tpu.matmul %33, %34, %cst_17 {dimension_numbers = #tpu.dot_dimension_numbers<[1], [0], [0], [1], [0, 0, 1, 1], [], []>} : vector<8x512xbf16>, vector<512x512xbf16>, vector<8x512xf32> -> vector<8x512xf32>
    %cst_18 = arith.constant dense<0.000000e+00> : vector<512xf32>
    %36 = vector.multi_reduction <add>, %35, %cst_18 [0] : vector<8x512xf32> to vector<512xf32>
    %37 = vector.shape_cast %36 : vector<512xf32> to vector<1x512xf32>
    %cst_19 = arith.constant 8.000000e+00 : f32
    %38 = vector.broadcast %cst_19 : f32 to vector<1x512xf32>
    %39 = arith.divf %37, %38 : vector<1x512xf32>
    %40 = arith.mulf %35, %35 : vector<8x512xf32>
    %cst_20 = arith.constant dense<0.000000e+00> : vector<512xf32>
    %41 = vector.multi_reduction <add>, %40, %cst_20 [0] : vector<8x512xf32> to vector<512xf32>
    %42 = vector.shape_cast %41 : vector<512xf32> to vector<1x512xf32>
    %cst_21 = arith.constant 8.000000e+00 : f32
    %43 = vector.broadcast %cst_21 : f32 to vector<1x512xf32>
    %44 = arith.divf %42, %43 : vector<1x512xf32>
    %45 = arith.mulf %39, %39 : vector<1x512xf32>
    %46 = arith.subf %44, %45 : vector<1x512xf32>
    %cst_22 = arith.constant 0.000000e+00 : f32
    %47 = vector.broadcast %cst_22 : f32 to vector<1x512xf32>
    %48 = arith.maximumf %46, %47 : vector<1x512xf32>
    %cst_23 = arith.constant 9.99999974E-6 : f32
    %49 = vector.broadcast %cst_23 : f32 to vector<1x512xf32>
    %50 = arith.addf %48, %49 : vector<1x512xf32>
    %51 = math.rsqrt %50 : vector<1x512xf32>
    %52 = arith.mulf %31, %51 : vector<1x512xf32>
    %53 = arith.mulf %39, %52 : vector<1x512xf32>
    %54 = arith.subf %32, %53 : vector<1x512xf32>
    %55 = vector.broadcast %52 : vector<1x512xf32> to vector<8x512xf32>
    %56 = arith.mulf %35, %55 : vector<8x512xf32>
    %57 = vector.broadcast %54 : vector<1x512xf32> to vector<8x512xf32>
    %58 = arith.addf %56, %57 : vector<8x512xf32>
    %cst_24 = arith.constant 0.000000e+00 : f32
    %59 = vector.broadcast %cst_24 : f32 to vector<8x512xf32>
    %60 = arith.maximumf %58, %59 : vector<8x512xf32>
    %c2 = arith.constant 2 : index
    %c0_25 = arith.constant 0 : index
    %61 = vector.load %arg5[%c2, %c0_25] : memref<10x512xf32, #tpu.memory_space<vmem>>, vector<1x512xf32>
    %c6 = arith.constant 6 : index
    %c0_26 = arith.constant 0 : index
    %62 = vector.load %arg5[%c6, %c0_26] : memref<10x512xf32, #tpu.memory_space<vmem>>, vector<1x512xf32>
    %63 = arith.truncf %60 : vector<8x512xf32> to vector<8x512xbf16>
    %c0_27 = arith.constant 0 : index
    %c0_28 = arith.constant 0 : index
    %64 = vector.load %arg3[%c0_27, %c0_28] : memref<512x512xbf16, #tpu.memory_space<vmem>>, vector<512x512xbf16>
    %cst_29 = arith.constant dense<0.000000e+00> : vector<8x512xf32>
    %65 = tpu.matmul %63, %64, %cst_29 {dimension_numbers = #tpu.dot_dimension_numbers<[1], [0], [0], [1], [0, 0, 1, 1], [], []>} : vector<8x512xbf16>, vector<512x512xbf16>, vector<8x512xf32> -> vector<8x512xf32>
    %cst_30 = arith.constant dense<0.000000e+00> : vector<512xf32>
    %66 = vector.multi_reduction <add>, %65, %cst_30 [0] : vector<8x512xf32> to vector<512xf32>
    %67 = vector.shape_cast %66 : vector<512xf32> to vector<1x512xf32>
    %cst_31 = arith.constant 8.000000e+00 : f32
    %68 = vector.broadcast %cst_31 : f32 to vector<1x512xf32>
    %69 = arith.divf %67, %68 : vector<1x512xf32>
    %70 = arith.mulf %65, %65 : vector<8x512xf32>
    %cst_32 = arith.constant dense<0.000000e+00> : vector<512xf32>
    %71 = vector.multi_reduction <add>, %70, %cst_32 [0] : vector<8x512xf32> to vector<512xf32>
    %72 = vector.shape_cast %71 : vector<512xf32> to vector<1x512xf32>
    %cst_33 = arith.constant 8.000000e+00 : f32
    %73 = vector.broadcast %cst_33 : f32 to vector<1x512xf32>
    %74 = arith.divf %72, %73 : vector<1x512xf32>
    %75 = arith.mulf %69, %69 : vector<1x512xf32>
    %76 = arith.subf %74, %75 : vector<1x512xf32>
    %cst_34 = arith.constant 0.000000e+00 : f32
    %77 = vector.broadcast %cst_34 : f32 to vector<1x512xf32>
    %78 = arith.maximumf %76, %77 : vector<1x512xf32>
    %cst_35 = arith.constant 9.99999974E-6 : f32
    %79 = vector.broadcast %cst_35 : f32 to vector<1x512xf32>
    %80 = arith.addf %78, %79 : vector<1x512xf32>
    %81 = math.rsqrt %80 : vector<1x512xf32>
    %82 = arith.mulf %61, %81 : vector<1x512xf32>
    %83 = arith.mulf %69, %82 : vector<1x512xf32>
    %84 = arith.subf %62, %83 : vector<1x512xf32>
    %85 = vector.broadcast %82 : vector<1x512xf32> to vector<8x512xf32>
    %86 = arith.mulf %65, %85 : vector<8x512xf32>
    %87 = vector.broadcast %84 : vector<1x512xf32> to vector<8x512xf32>
    %88 = arith.addf %86, %87 : vector<8x512xf32>
    %cst_36 = arith.constant 0.000000e+00 : f32
    %89 = vector.broadcast %cst_36 : f32 to vector<8x512xf32>
    %90 = arith.maximumf %88, %89 : vector<8x512xf32>
    %c3 = arith.constant 3 : index
    %c0_37 = arith.constant 0 : index
    %91 = vector.load %arg5[%c3, %c0_37] : memref<10x512xf32, #tpu.memory_space<vmem>>, vector<1x512xf32>
    %c7 = arith.constant 7 : index
    %c0_38 = arith.constant 0 : index
    %92 = vector.load %arg5[%c7, %c0_38] : memref<10x512xf32, #tpu.memory_space<vmem>>, vector<1x512xf32>
    %93 = arith.truncf %90 : vector<8x512xf32> to vector<8x512xbf16>
    %c0_39 = arith.constant 0 : index
    %c0_40 = arith.constant 0 : index
    %94 = vector.load %arg4[%c0_39, %c0_40] : memref<512x512xbf16, #tpu.memory_space<vmem>>, vector<512x512xbf16>
    %cst_41 = arith.constant dense<0.000000e+00> : vector<8x512xf32>
    %95 = tpu.matmul %93, %94, %cst_41 {dimension_numbers = #tpu.dot_dimension_numbers<[1], [0], [0], [1], [0, 0, 1, 1], [], []>} : vector<8x512xbf16>, vector<512x512xbf16>, vector<8x512xf32> -> vector<8x512xf32>
    %cst_42 = arith.constant dense<0.000000e+00> : vector<512xf32>
    %96 = vector.multi_reduction <add>, %95, %cst_42 [0] : vector<8x512xf32> to vector<512xf32>
    %97 = vector.shape_cast %96 : vector<512xf32> to vector<1x512xf32>
    %cst_43 = arith.constant 8.000000e+00 : f32
    %98 = vector.broadcast %cst_43 : f32 to vector<1x512xf32>
    %99 = arith.divf %97, %98 : vector<1x512xf32>
    %100 = arith.mulf %95, %95 : vector<8x512xf32>
    %cst_44 = arith.constant dense<0.000000e+00> : vector<512xf32>
    %101 = vector.multi_reduction <add>, %100, %cst_44 [0] : vector<8x512xf32> to vector<512xf32>
    %102 = vector.shape_cast %101 : vector<512xf32> to vector<1x512xf32>
    %cst_45 = arith.constant 8.000000e+00 : f32
    %103 = vector.broadcast %cst_45 : f32 to vector<1x512xf32>
    %104 = arith.divf %102, %103 : vector<1x512xf32>
    %105 = arith.mulf %99, %99 : vector<1x512xf32>
    %106 = arith.subf %104, %105 : vector<1x512xf32>
    %cst_46 = arith.constant 0.000000e+00 : f32
    %107 = vector.broadcast %cst_46 : f32 to vector<1x512xf32>
    %108 = arith.maximumf %106, %107 : vector<1x512xf32>
    %cst_47 = arith.constant 9.99999974E-6 : f32
    %109 = vector.broadcast %cst_47 : f32 to vector<1x512xf32>
    %110 = arith.addf %108, %109 : vector<1x512xf32>
    %111 = math.rsqrt %110 : vector<1x512xf32>
    %112 = arith.mulf %91, %111 : vector<1x512xf32>
    %113 = arith.mulf %99, %112 : vector<1x512xf32>
    %114 = arith.subf %92, %113 : vector<1x512xf32>
    %115 = vector.broadcast %112 : vector<1x512xf32> to vector<8x512xf32>
    %116 = arith.mulf %95, %115 : vector<8x512xf32>
    %117 = vector.broadcast %114 : vector<1x512xf32> to vector<8x512xf32>
    %118 = arith.addf %116, %117 : vector<8x512xf32>
    %cst_48 = arith.constant 0.000000e+00 : f32
    %119 = vector.broadcast %cst_48 : f32 to vector<8x512xf32>
    %120 = arith.maximumf %118, %119 : vector<8x512xf32>
    %c8 = arith.constant 8 : index
    %c0_49 = arith.constant 0 : index
    %121 = vector.load %arg5[%c8, %c0_49] : memref<10x512xf32, #tpu.memory_space<vmem>>, vector<1x512xf32>
    %c9 = arith.constant 9 : index
    %c0_50 = arith.constant 0 : index
    %122 = vector.load %arg5[%c9, %c0_50] : memref<10x512xf32, #tpu.memory_space<vmem>>, vector<1x128xf32>
    %123 = vector.broadcast %121 : vector<1x512xf32> to vector<8x512xf32>
    %124 = arith.mulf %120, %123 : vector<8x512xf32>
    %cst_51 = arith.constant dense<0.000000e+00> : vector<8xf32>
    %125 = vector.multi_reduction <add>, %124, %cst_51 [1] : vector<8x512xf32> to vector<8xf32>
    %126 = vector.shape_cast %125 : vector<8xf32> to vector<8x1xf32>
    %127 = vector.broadcast %126 : vector<8x1xf32> to vector<8x128xf32>
    %128 = vector.broadcast %122 : vector<1x128xf32> to vector<8x128xf32>
    %129 = arith.addf %127, %128 : vector<8x128xf32>
    %c0_52 = arith.constant 0 : index
    %c0_53 = arith.constant 0 : index
    %130 = vector.load %arg6[%c0_52, %c0_53] : memref<8x128xf32, #tpu.memory_space<vmem>>, vector<8x128xf32>
    tpu.vector_store %arg6[%c0_52, %c0_53], %129 {strides = array<i32>} : memref<8x128xf32, #tpu.memory_space<vmem>>, vector<8x128xf32>,
    return
  }
}

</mosaic_0001>

<bundles_post_ra>
// kernel: tpu_custom_call.1
= control target key start
LH: loop header
LB: loop body
LE: loop exit
PB: predicated region body
PF: predicated region fallthrough
CT: control target
= control target key end

     0   :  { %11 = vsyncpa [#allocation3], 0  ;;  %s8159_s0 = inlined_call_operand.hbm [shape: f32[8,512], index: 0, kind: input, shape index: {}]   ;;  %s8160_s1 = inlined_call_operand.hbm [shape: bf16[512,512], index: 1, kind: input, shape index: {}]   ;;  %s8161_s2 = inlined_call_operand.hbm [shape: bf16[512,512], index: 2, kind: input, shape index: {}]   ;;  %s8162_s3 = inlined_call_operand.hbm [shape: bf16[512,512], index: 3, kind: input, shape index: {}]   ;;  %s8163_s4 = inlined_call_operand.hbm [shape: bf16[512,512], index: 4, kind: input, shape index: {}]   ;;  %s8164_s5 = inlined_call_operand.hbm [shape: f32[10,512], index: 5, kind: input, shape index: {}]   ;;  %s8165_s6 = inlined_call_operand.hbm [shape: f32[8,128], index: 6, kind: output, shape index: {}]  }
   0x1   :  { %12 = vsyncpa [#allocation6], 0 }
   0x2   :  { %13 = vsyncpa [#allocation9], 0 }
   0x3   :  { %14 = vsyncpa [#allocation12], 0  ;;  %s31_s23 = sshll.u32 %s8160_s1, 4  ;;  %s32_s23 = int_to_ptr.hbm [resolvable:$true] %s31_s23 }
   0x4   :  { %15 = vsyncpa [#allocation4], 0  ;;  %s7588_s24 = smov [#allocation5]   ;;  %s57_s28 = sshll.u32 %s8162_s3, 4  ;;  %s58_s28 = int_to_ptr.hbm [resolvable:$true] %s57_s28 }
   0x5   :  { %s33_s25 = sshll.u32 %s7588_s24, 4  ;;  %s7589_s29 = smov 256   ;;  %s34_s25 = int_to_ptr.vmem [resolvable:$true] %s33_s25 }
   0x6   :  { %s7590_s30 = smov 16   ;;  %s7591_s7 = smov [#allocation8]  }
   0x7   :  { %39 = dma.hbm_to_vmem [thread:$0]  %s32_s23, 16384, %s34_s25, [#allocation6], %s7589_s29, %s7589_s29, %s7590_s30  }
   0x8   :  { %s59_s8 = sshll.u32 %s7591_s7, 4  ;;  %s21_s10 = sshll.u32 %s8159_s0, 4  ;;  %s60_s8 = int_to_ptr.vmem [resolvable:$true] %s59_s8  ;;  %s22_s10 = int_to_ptr.hbm [resolvable:$true] %s21_s10 }
   0x9   :  { %65 = dma.hbm_to_vmem [thread:$0]  %s58_s28, 16384, %s60_s8, [#allocation9], %s7589_s29, %s7589_s29, %s7590_s30  }
   0xa   :  { %s44_s12 = sshll.u32 %s8161_s2, 4  ;;  %s7592_s13 = smov [#allocation2]   ;;  %s45_s12 = int_to_ptr.hbm [resolvable:$true] %s44_s12 }
   0xb   :  { %s23_s14 = sshll.u32 %s7592_s13, 4  ;;  %s7593_s15 = smov [#allocation7]   ;;  %s24_s14 = int_to_ptr.vmem [resolvable:$true] %s23_s14 }
   0xc   :  { %26 = dma.hbm_to_vmem [thread:$0]  %s22_s10, 512, %s24_s14, [#allocation3]  }
   0xd   :  { %s46_s16 = sshll.u32 %s7593_s15, 4  ;;  %s70_s0 = sshll.u32 %s8163_s4, 4  ;;  %s47_s16 = int_to_ptr.vmem [resolvable:$true] %s46_s16  ;;  %s71_s0 = int_to_ptr.hbm [resolvable:$true] %s70_s0 }
   0xe   :  { %52 = dma.hbm_to_vmem [thread:$0]  %s45_s12, 16384, %s47_s16, [#allocation6], %s7589_s29, %s7589_s29, %s7590_s30  }
   0xf   :  { %s83_s2 = sshll.u32 %s8164_s5, 4  ;;  %s7594_s21 = smov [#allocation10]   ;;  %s84_s2 = int_to_ptr.hbm [resolvable:$true] %s83_s2 }
  0x10   :  { %s72_s22 = sshll.u32 %s7594_s21, 4  ;;  %s7595_s23 = smov [#allocation11]   ;;  %s73_s22 = int_to_ptr.vmem [resolvable:$true] %s72_s22 }
  0x11   :  { %78 = dma.hbm_to_vmem [thread:$0]  %s71_s0, 16384, %s73_s22, [#allocation9], %s7589_s29, %s7589_s29, %s7590_s30  }
  0x12   :  { %s85_s4 = sshll.u32 %s7595_s23, 4  ;;  %s7596_s24 = smov 512   ;;  %s86_s4 = int_to_ptr.vmem [resolvable:$true] %s85_s4 }
  0x13   :  { %s7597_s25 = smov 32  }
  0x14   :  { %91 = dma.hbm_to_vmem [thread:$0]  %s84_s2, 1024, %s86_s4, [#allocation12], %s7596_s24, %s7596_s24, %s7597_s25  }
  0x15   :  { %7578 = dma.done.wait [#allocation3], 512  }
  0x16   :  { %7579 = vsyncadd [#allocation3], 4294966784 }
  0x17   :  { %7580 = dma.done.wait [#allocation6], 32768  }
  0x18   :  { %7581 = vsyncadd [#allocation6], 4294934528 }
  0x19   :  { %7582 = dma.done.wait [#allocation9], 32768  }
  0x1a   :  { %7583 = vsyncadd [#allocation9], 4294934528 }
  0x1b   :  { %7584 = dma.done.wait [#allocation12], 1024  }
  0x1c   :  { %7585 = vsyncadd [#allocation12], 4294966272  ;;  %v4918_v0 = vld [vmem:[#allocation5 + $0xe0] sm:$0xf]  ;;  %v6882_v1 = vld [vmem:[#allocation5 + $0xec] sm:$0xf0] }
  0x1d   :  { %v5046_v2 = vld [vmem:[#allocation5 + $0x1e0] sm:$0xf]  ;;  %v4919_v3 = vor.u32 %v6882_v1, %v4918_v0  ;;  %v6914_v4 = vld [vmem:[#allocation5 + $0x1ec] sm:$0xf0]  ;;  %vm1233_vm7 = vcmask 1040384   ;;  %vm1235_vm14 = vcmask 1042434  }
  0x1e   :  { %v5174_v5 = vld [vmem:[#allocation5 + $0x2e0] sm:$0xf]  ;;  %v6946_v6 = vld [vmem:[#allocation5 + $0x2ec] sm:$0xf0]  ;;  %v5047_v7 = vor.u32 %v6914_v4, %v5046_v2  ;;  %vm1237_vm15 = vcmask 1041408   ;;  %s7599_s5 = smov [#allocation13]  }
  0x1f   :  { %v5175_v8 = vor.u32 %v6946_v6, %v5174_v5  ;;  %v5302_v9 = vld [vmem:[#allocation5 + $0x3e0] sm:$0xf]  ;;  %v6978_v10 = vld [vmem:[#allocation5 + $0x3ec] sm:$0xf0]  ;;  %895 = vmatpush.bf16.msra.mxu0 %v4919_v3  ;;  %s4789_s26 = sshll.u32 %s7599_s5, 4  ;;  %s4791_s29 = sshll.u32 %s8165_s6, 4  ;;  %s4790_s26 = int_to_ptr.vmem [resolvable:$true] %s4789_s26  ;;  %s4792_s29 = int_to_ptr.hbm [resolvable:$true] %s4791_s29 }
  0x20   :  { %v4902_v11 = vld [vmem:[#allocation5 + $0xc0] sm:$0xf]  ;;  %v5303_v12 = vor.u32 %v6978_v10, %v5302_v9  ;;  %v6878_v13 = vld [vmem:[#allocation5 + $0xcc] sm:$0xf0]  ;;  %908 = vmatpush.bf16.msra.mxu1 %v5047_v7 }
  0x21   :  { %v5030_v14 = vld [vmem:[#allocation5 + $0x1c0] sm:$0xf]  ;;  %v6910_v15 = vld [vmem:[#allocation5 + $0x1cc] sm:$0xf0]  ;;  %921 = vmatpush.bf16.msra.mxu2 %v5175_v8  ;;  %v4903_v16 = vor.u32 %v6878_v13, %v4902_v11 }
  0x22   :  { %v5031_v17 = vor.u32 %v6910_v15, %v5030_v14  ;;  %v5158_v18 = vld [vmem:[#allocation5 + $0x2c0] sm:$0xf]  ;;  %v6942_v19 = vld [vmem:[#allocation5 + $0x2cc] sm:$0xf0]  ;;  %934 = vmatpush.bf16.msra.mxu3 %v5303_v12 }
  0x23   :  { %v5286_v20 = vld [vmem:[#allocation5 + $0x3c0] sm:$0xf]  ;;  %v5159_v21 = vor.u32 %v6942_v19, %v5158_v18  ;;  %v6974_v22 = vld [vmem:[#allocation5 + $0x3cc] sm:$0xf0]  ;;  %896 = vmatpush.bf16.msra.mxu0 %v4903_v16 }
  0x24   :  { %v4886_v23 = vld [vmem:[#allocation5 + $0xa0] sm:$0xf]  ;;  %v6874_v24 = vld [vmem:[#allocation5 + $0xac] sm:$0xf0]  ;;  %v5287_v25 = vor.u32 %v6974_v22, %v5286_v20  ;;  %909 = vmatpush.bf16.msra.mxu1 %v5031_v17 }
  0x25   :  { %v5014_v26 = vld [vmem:[#allocation5 + $0x1a0] sm:$0xf]  ;;  %v6906_v27 = vld [vmem:[#allocation5 + $0x1ac] sm:$0xf0]  ;;  %v4887_v29 = vor.u32 %v6874_v24, %v4886_v23  ;;  %922 = vmatpush.bf16.msra.mxu2 %v5159_v21 }
  0x26   :  { %v5142_v28 = vld [vmem:[#allocation5 + $0x2a0] sm:$0xf]  ;;  %v6938_v30 = vld [vmem:[#allocation5 + $0x2ac] sm:$0xf0]  ;;  %v5015_v33 = vor.u32 %v6906_v27, %v5014_v26  ;;  %935 = vmatpush.bf16.msra.mxu3 %v5287_v25 }
  0x27   :  { %v5270_v31 = vld [vmem:[#allocation5 + $0x3a0] sm:$0xf]  ;;  %v6970_v32 = vld [vmem:[#allocation5 + $0x3ac] sm:$0xf0]  ;;  %v5143_v34 = vor.u32 %v6938_v30, %v5142_v28  ;;  %897 = vmatpush.bf16.msra.mxu0 %v4887_v29  ;;  %v6880_v28 = vld [vmem:[#allocation5 + $0xe4] sm:$0xf] }
  0x28   :  { %v4870_v35 = vld [vmem:[#allocation5 + $0x80] sm:$0xf]  ;;  %v6870_v36 = vld [vmem:[#allocation5 + $0x8c] sm:$0xf0]  ;;  %v5271_v38 = vor.u32 %v6970_v32, %v5270_v31  ;;  %910 = vmatpush.bf16.msra.mxu1 %v5015_v33  ;;  %v4920_v29 = vld [vmem:[#allocation5 + $0xf0] sm:$0xf0] }
  0x29   :  { %v4998_v37 = vld [vmem:[#allocation5 + $0x180] sm:$0xf]  ;;  %v6902_v39 = vld [vmem:[#allocation5 + $0x18c] sm:$0xf0]  ;;  %v4871_v44 = vor.u32 %v6870_v36, %v4870_v35  ;;  %923 = vmatpush.bf16.msra.mxu2 %v5143_v34  ;;  %v6912_v30 = vld [vmem:[#allocation5 + $0x1e4] sm:$0xf] }
  0x2a   :  { %v5126_v40 = vld [vmem:[#allocation5 + $0x280] sm:$0xf]  ;;  %v6934_v41 = vld [vmem:[#allocation5 + $0x28c] sm:$0xf0]  ;;  %v4999_v45 = vor.u32 %v6902_v39, %v4998_v37  ;;  %936 = vmatpush.bf16.msra.mxu3 %v5271_v38  ;;  %v5048_v32 = vld [vmem:[#allocation5 + $0x1f0] sm:$0xf0] }
  0x2b   :  { %v5254_v42 = vld [vmem:[#allocation5 + $0x380] sm:$0xf]  ;;  %v6966_v43 = vld [vmem:[#allocation5 + $0x38c] sm:$0xf0]  ;;  %v5127_v46 = vor.u32 %v6934_v41, %v5126_v40  ;;  %898 = vmatpush.bf16.msra.mxu0 %v4871_v44  ;;  %v6944_v33 = vld [vmem:[#allocation5 + $0x2e4] sm:$0xf]  ;;  %v4923_v41 = vor.u32 %v6880_v28, %v4920_v29 }
  0x2c   :  { %v4854_v47 = vld [vmem:[#allocation5 + $0x60] sm:$0xf]  ;;  %v6866_v48 = vld [vmem:[#allocation5 + $0x6c] sm:$0xf0]  ;;  %v5255_v50 = vor.u32 %v6966_v43, %v5254_v42  ;;  %911 = vmatpush.bf16.msra.mxu1 %v4999_v45  ;;  %v5176_v34 = vld [vmem:[#allocation5 + $0x2f0] sm:$0xf0]  ;;  %v5051_v45 = vor.u32 %v6912_v30, %v5048_v32 }
  0x2d   :  { %v4982_v49 = vld [vmem:[#allocation5 + $0x160] sm:$0xf]  ;;  %v6898_v51 = vld [vmem:[#allocation5 + $0x16c] sm:$0xf0]  ;;  %v4855_v56 = vor.u32 %v6866_v48, %v4854_v47  ;;  %924 = vmatpush.bf16.msra.mxu2 %v5127_v46  ;;  %v6976_v37 = vld [vmem:[#allocation5 + $0x3e4] sm:$0xf]  ;;  %v5179_v46 = vor.u32 %v6944_v33, %v5176_v34 }
  0x2e   :  { %v5110_v52 = vld [vmem:[#allocation5 + $0x260] sm:$0xf]  ;;  %v6930_v53 = vld [vmem:[#allocation5 + $0x26c] sm:$0xf0]  ;;  %v4983_v57 = vor.u32 %v6898_v51, %v4982_v49  ;;  %937 = vmatpush.bf16.msra.mxu3 %v5255_v50  ;;  %v5304_v38 = vld [vmem:[#allocation5 + $0x3f0] sm:$0xf0] }
  0x2f   :  { %v5238_v54 = vld [vmem:[#allocation5 + $0x360] sm:$0xf]  ;;  %v6962_v55 = vld [vmem:[#allocation5 + $0x36c] sm:$0xf0]  ;;  %v5111_v58 = vor.u32 %v6930_v53, %v5110_v52  ;;  %899 = vmatpush.bf16.msra.mxu0 %v4855_v56  ;;  %v6876_v42 = vld [vmem:[#allocation5 + $0xc4] sm:$0xf]  ;;  %v5307_v50 = vor.u32 %v6976_v37, %v5304_v38 }
  0x30   :  { %v4838_v59 = vld [vmem:[#allocation5 + $0x40] sm:$0xf]  ;;  %v6862_v60 = vld [vmem:[#allocation5 + $0x4c] sm:$0xf0]  ;;  %v5239_v62 = vor.u32 %v6962_v55, %v5238_v54  ;;  %912 = vmatpush.bf16.msra.mxu1 %v4983_v57  ;;  %v4904_v43 = vld [vmem:[#allocation5 + $0xd0] sm:$0xf0] }
  0x31   :  { %v4966_v61 = vld [vmem:[#allocation5 + $0x140] sm:$0xf]  ;;  %v6894_v63 = vld [vmem:[#allocation5 + $0x14c] sm:$0xf0]  ;;  %v4839_v4 = vor.u32 %v6862_v60, %v4838_v59  ;;  %925 = vmatpush.bf16.msra.mxu2 %v5111_v58  ;;  %v119_v44 = vld [vmem:[#allocation2 + $0x18] sm:$0xff]  ;;  %v4907_v59 = vor.u32 %v6876_v42, %v4904_v43 }
  0x32   :  { %v5094_v0 = vld [vmem:[#allocation5 + $0x240] sm:$0xf]  ;;  %v6926_v1 = vld [vmem:[#allocation5 + $0x24c] sm:$0xf0]  ;;  %v4967_v5 = vor.u32 %v6894_v63, %v4966_v61  ;;  %938 = vmatpush.bf16.msra.mxu3 %v5239_v62  ;;  %v6908_v47 = vld [vmem:[#allocation5 + $0x1c4] sm:$0xf]  ;;  %v7667_v57 = vpack.c.bf16 %v119_v44, %v119_v44 }
  0x33   :  { %v5222_v2 = vld [vmem:[#allocation5 + $0x340] sm:$0xf]  ;;  %v6958_v3 = vld [vmem:[#allocation5 + $0x34c] sm:$0xf0]  ;;  %v5095_v6 = vor.u32 %v6926_v1, %v5094_v0  ;;  %900 = vmatpush.bf16.msra.mxu0 %v4839_v4  ;;  %v117_v49 = vld [vmem:[#allocation2 + $0x8] sm:$0xff] }
  0x34   :  { %v4822_v7 = vld [vmem:[#allocation5 + $0x20] sm:$0xf]  ;;  %v6858_v8 = vld [vmem:[#allocation5 + $0x2c] sm:$0xf0]  ;;  %v5223_v10 = vor.u32 %v6958_v3, %v5222_v2  ;;  %913 = vmatpush.bf16.msra.mxu1 %v4967_v5  ;;  %v5032_v51 = vld [vmem:[#allocation5 + $0x1d0] sm:$0xf0]  ;;  %v7671_v60 = vpack.c.bf16 %v117_v49, %v117_v49 }
  0x35   :  { %v4950_v9 = vld [vmem:[#allocation5 + $0x120] sm:$0xf]  ;;  %v6890_v11 = vld [vmem:[#allocation5 + $0x12c] sm:$0xf0]  ;;  %v4823_v16 = vor.u32 %v6858_v8, %v4822_v7  ;;  %926 = vmatpush.bf16.msra.mxu2 %v5095_v6  ;;  %v6940_v52 = vld [vmem:[#allocation5 + $0x2c4] sm:$0xf]  ;;  %v5035_v61 = vor.u32 %v6908_v47, %v5032_v51 }
  0x36   :  { %v5078_v12 = vld [vmem:[#allocation5 + $0x220] sm:$0xf]  ;;  %v6922_v13 = vld [vmem:[#allocation5 + $0x22c] sm:$0xf0]  ;;  %v4951_v19 = vor.u32 %v6890_v11, %v4950_v9  ;;  %939 = vmatpush.bf16.msra.mxu3 %v5223_v10  ;;  %v5160_v53 = vld [vmem:[#allocation5 + $0x2d0] sm:$0xf0] }
  0x37   :  { %v5206_v14 = vld [vmem:[#allocation5 + $0x320] sm:$0xf]  ;;  %v6954_v15 = vld [vmem:[#allocation5 + $0x32c] sm:$0xf0]  ;;  %v5079_v20 = vor.u32 %v6922_v13, %v5078_v12  ;;  %901 = vmatpush.bf16.msra.mxu0 %v4823_v16  ;;  %v6972_v55 = vld [vmem:[#allocation5 + $0x3c4] sm:$0xf]  ;;  %v5163_v62 = vor.u32 %v6940_v52, %v5160_v53 }
  0x38   :  { %v4806_v17 = vld [vmem:[#allocation5] sm:$0xf]  ;;  %v6854_v18 = vld [vmem:[#allocation5 + $0xc] sm:$0xf0]  ;;  %v5207_v24 = vor.u32 %v6954_v15, %v5206_v14  ;;  %914 = vmatpush.bf16.msra.mxu1 %v4951_v19  ;;  %v5288_v56 = vld [vmem:[#allocation5 + $0x3d0] sm:$0xf0] }
  0x39   :  { %v4934_v21 = vld [vmem:[#allocation5 + $0x100] sm:$0xf]  ;;  %v6886_v22 = vld [vmem:[#allocation5 + $0x10c] sm:$0xf0]  ;;  %v4807_v31 = vor.u32 %v6854_v18, %v4806_v17  ;;  %927 = vmatpush.bf16.msra.mxu2 %v5079_v20  ;;  %v6872_v63 = vld [vmem:[#allocation5 + $0xa4] sm:$0xf]  ;;  %v5291_v2 = vor.u32 %v6972_v55, %v5288_v56 }
  0x3a   :  { %v5062_v23 = vld [vmem:[#allocation5 + $0x200] sm:$0xf]  ;;  %v6918_v25 = vld [vmem:[#allocation5 + $0x20c] sm:$0xf0]  ;;  %v4935_v35 = vor.u32 %v6886_v22, %v4934_v21  ;;  %940 = vmatpush.bf16.msra.mxu3 %v5207_v24  ;;  %v4888_v0 = vld [vmem:[#allocation5 + $0xb0] sm:$0xf0] }
  0x3b   :  { %v5190_v26 = vld [vmem:[#allocation5 + $0x300] sm:$0xf]  ;;  %v6950_v27 = vld [vmem:[#allocation5 + $0x30c] sm:$0xf0]  ;;  %v5063_v36 = vor.u32 %v6918_v25, %v5062_v23  ;;  %902 = vmatpush.bf16.msra.mxu0 %v4807_v31  ;;  %v6904_v1 = vld [vmem:[#allocation5 + $0x1a4] sm:$0xf]  ;;  %v4891_v8 = vor.u32 %v6872_v63, %v4888_v0 }
  0x3c   :  { %v118_v39 = vld [vmem:[#allocation2 + $0x10] sm:$0xff]  ;;  %v5191_v40 = vor.u32 %v6950_v27, %v5190_v26  ;;  %v116_v48 = vld [vmem:[#allocation2] sm:$0xff]  ;;  %915 = vmatpush.bf16.msra.mxu1 %v4935_v35 }
  0x3d   :  { %v7665_v54 = vpack.c.bf16 %v118_v39, %v118_v39  ;;  %928 = vmatpush.bf16.msra.mxu2 %v5063_v36  ;;  %v7669_v58 = vpack.c.bf16 %v116_v48, %v116_v48  ;;  %v5016_v3 = vld [vmem:[#allocation5 + $0x1b0] sm:$0xf0]  ;;  %v6936_v4 = vld [vmem:[#allocation5 + $0x2a4] sm:$0xf] }
  0x3e   :  { %941 = vmatpush.bf16.msra.mxu3 %v5191_v40  ;;  %v5144_v5 = vld [vmem:[#allocation5 + $0x2b0] sm:$0xf0]  ;;  %v6968_v6 = vld [vmem:[#allocation5 + $0x3a4] sm:$0xf]  ;;  %v5019_v9 = vor.u32 %v6904_v1, %v5016_v3 }
  0x3f   :  { %947 = vmatpush.bf16.msrb.mxu0 %v4923_v41  ;;  %v5272_v7 = vld [vmem:[#allocation5 + $0x3b0] sm:$0xf0]  ;;  %916 = vmatmul.bf16.vlgmr.msra.gmra.mxu1 %v7671_v60  ;;  %v5147_v10 = vor.u32 %v6936_v4, %v5144_v5  ;;  %v6868_v11 = vld [vmem:[#allocation5 + $0x84] sm:$0xf] }
  0x40   :  { %960 = vmatpush.bf16.msrb.mxu1 %v5051_v45  ;;  %929 = vmatmul.bf16.vlgmr.msra.gmra.mxu2 %v7665_v54  ;;  %v4872_v12 = vld [vmem:[#allocation5 + $0x90] sm:$0xf0]  ;;  %v6900_v13 = vld [vmem:[#allocation5 + $0x184] sm:$0xf]  ;;  %v5275_v14 = vor.u32 %v6968_v6, %v5272_v7 }
  0x41   :  { %973 = vmatpush.bf16.msrb.mxu2 %v5179_v46  ;;  %942 = vmatmul.bf16.vlgmr.msra.gmra.mxu3 %v7667_v57  ;;  %v5000_v15 = vld [vmem:[#allocation5 + $0x190] sm:$0xf0]  ;;  %v6932_v16 = vld [vmem:[#allocation5 + $0x284] sm:$0xf]  ;;  %v4875_v20 = vor.u32 %v6868_v11, %v4872_v12  ;;  %v6915_v12 = vld [vmem:[#allocation5 + $0x1f4] sm:$0xf0] }
  0x42   :  { %986 = vmatpush.bf16.msrb.mxu3 %v5307_v50  ;;  %903 = vmatmul.bf16.vlgmr.msra.gmra.mxu0 %v7669_v58  ;;  %v5128_v17 = vld [vmem:[#allocation5 + $0x290] sm:$0xf0]  ;;  %v6964_v18 = vld [vmem:[#allocation5 + $0x384] sm:$0xf]  ;;  %v5003_v21 = vor.u32 %v6900_v13, %v5000_v15  ;;  %v5182_v13 = vld [vmem:[#allocation5 + $0x2e8] sm:$0xf] }
  0x43   :  { %948 = vmatpush.bf16.msrb.mxu0 %v4907_v59  ;;  %v5256_v19 = vld [vmem:[#allocation5 + $0x390] sm:$0xf0]  ;;  %v5131_v22 = vor.u32 %v6932_v16, %v5128_v17  ;;  %v6864_v23 = vld [vmem:[#allocation5 + $0x64] sm:$0xf]  ;;  %v5310_v17 = vld [vmem:[#allocation5 + $0x3e8] sm:$0xf] }
  0x44   :  { %961 = vmatpush.bf16.msrb.mxu1 %v5035_v61  ;;  %v4856_v24 = vld [vmem:[#allocation5 + $0x70] sm:$0xf0]  ;;  %v6896_v25 = vld [vmem:[#allocation5 + $0x164] sm:$0xf]  ;;  %v5259_v26 = vor.u32 %v6964_v18, %v5256_v19  ;;  %v6979_v18 = vld [vmem:[#allocation5 + $0x3f4] sm:$0xf0] }
  0x45   :  { %974 = vmatpush.bf16.msrb.mxu2 %v5163_v62  ;;  %v4984_v27 = vld [vmem:[#allocation5 + $0x170] sm:$0xf0]  ;;  %v6928_v28 = vld [vmem:[#allocation5 + $0x264] sm:$0xf]  ;;  %v4859_v32 = vor.u32 %v6864_v23, %v4856_v24  ;;  %v4910_v23 = vld [vmem:[#allocation5 + $0xc8] sm:$0xf] }
  0x46   :  { %987 = vmatpush.bf16.msrb.mxu3 %v5291_v2  ;;  %v5112_v29 = vld [vmem:[#allocation5 + $0x270] sm:$0xf0]  ;;  %v6960_v30 = vld [vmem:[#allocation5 + $0x364] sm:$0xf]  ;;  %v4987_v33 = vor.u32 %v6896_v25, %v4984_v27  ;;  %v6879_v24 = vld [vmem:[#allocation5 + $0xd4] sm:$0xf0] }
  0x47   :  { %949 = vmatpush.bf16.msrb.mxu0 %v4891_v8  ;;  %v5240_v31 = vld [vmem:[#allocation5 + $0x370] sm:$0xf0]  ;;  %v5115_v34 = vor.u32 %v6928_v28, %v5112_v29  ;;  %v6860_v35 = vld [vmem:[#allocation5 + $0x44] sm:$0xf]  ;;  %v4926_v8 = vld [vmem:[#allocation5 + $0xe8] sm:$0xf] }
  0x48   :  { %962 = vmatpush.bf16.msrb.mxu1 %v5019_v9  ;;  %v4840_v36 = vld [vmem:[#allocation5 + $0x50] sm:$0xf0]  ;;  %v6892_v37 = vld [vmem:[#allocation5 + $0x144] sm:$0xf]  ;;  %v5243_v38 = vor.u32 %v6960_v30, %v5240_v31  ;;  %v6883_v9 = vld [vmem:[#allocation5 + $0xf4] sm:$0xf0] }
  0x49   :  { %975 = vmatpush.bf16.msrb.mxu2 %v5147_v10  ;;  %v4968_v39 = vld [vmem:[#allocation5 + $0x150] sm:$0xf0]  ;;  %v6924_v40 = vld [vmem:[#allocation5 + $0x244] sm:$0xf]  ;;  %v4843_v44 = vor.u32 %v6860_v35, %v4840_v36  ;;  %v5054_v10 = vld [vmem:[#allocation5 + $0x1e8] sm:$0xf] }
  0x4a   :  { %988 = vmatpush.bf16.msrb.mxu3 %v5275_v14  ;;  %v5096_v41 = vld [vmem:[#allocation5 + $0x250] sm:$0xf0]  ;;  %v6956_v42 = vld [vmem:[#allocation5 + $0x344] sm:$0xf]  ;;  %v4971_v45 = vor.u32 %v6892_v37, %v4968_v39  ;;  %v6947_v14 = vld [vmem:[#allocation5 + $0x2f4] sm:$0xf0] }
  0x4b   :  { %950 = vmatpush.bf16.msrb.mxu0 %v4875_v20  ;;  %v5224_v43 = vld [vmem:[#allocation5 + $0x350] sm:$0xf0]  ;;  %v5099_v46 = vor.u32 %v6924_v40, %v5096_v41  ;;  %v6856_v47 = vld [vmem:[#allocation5 + $0x24] sm:$0xf]  ;;  %v4927_v20 = vor.u32 %v6883_v9, %v4926_v8  ;;  %v5038_v25 = vld [vmem:[#allocation5 + $0x1c8] sm:$0xf] }
  0x4c   :  { %963 = vmatpush.bf16.msrb.mxu1 %v5003_v21  ;;  %v4824_v48 = vld [vmem:[#allocation5 + $0x30] sm:$0xf0]  ;;  %v6888_v49 = vld [vmem:[#allocation5 + $0x124] sm:$0xf]  ;;  %v5227_v50 = vor.u32 %v6956_v42, %v5224_v43  ;;  %v5055_v21 = vor.u32 %v6915_v12, %v5054_v10  ;;  %v6911_v27 = vld [vmem:[#allocation5 + $0x1d4] sm:$0xf0] }
  0x4d   :  { %976 = vmatpush.bf16.msrb.mxu2 %v5131_v22  ;;  %v4952_v51 = vld [vmem:[#allocation5 + $0x130] sm:$0xf0]  ;;  %v6920_v52 = vld [vmem:[#allocation5 + $0x224] sm:$0xf]  ;;  %v4827_v59 = vor.u32 %v6856_v47, %v4824_v48  ;;  %v5183_v22 = vor.u32 %v6947_v14, %v5182_v13  ;;  %v5166_v28 = vld [vmem:[#allocation5 + $0x2c8] sm:$0xf] }
  0x4e   :  { %989 = vmatpush.bf16.msrb.mxu3 %v5259_v26  ;;  %v5080_v53 = vld [vmem:[#allocation5 + $0x230] sm:$0xf0]  ;;  %v6952_v55 = vld [vmem:[#allocation5 + $0x324] sm:$0xf]  ;;  %v4955_v63 = vor.u32 %v6888_v49, %v4952_v51  ;;  %v5311_v26 = vor.u32 %v6979_v18, %v5310_v17  ;;  %v6943_v29 = vld [vmem:[#allocation5 + $0x2d4] sm:$0xf0] }
  0x4f   :  { %951 = vmatpush.bf16.msrb.mxu0 %v4859_v32  ;;  %v5208_v56 = vld [vmem:[#allocation5 + $0x330] sm:$0xf0]  ;;  %v6852_v61 = vld [vmem:[#allocation5 + $0x4] sm:$0xf]  ;;  %v5083_v0 = vor.u32 %v6920_v52, %v5080_v53  ;;  %v5294_v30 = vld [vmem:[#allocation5 + $0x3c8] sm:$0xf]  ;;  %v4911_v32 = vor.u32 %v6879_v24, %v4910_v23 }
  0x50   :  { %964 = vmatpush.bf16.msrb.mxu1 %v4987_v33  ;;  %v4808_v62 = vld [vmem:[#allocation5 + $0x10] sm:$0xf0]  ;;  %v6884_v1 = vld [vmem:[#allocation5 + $0x104] sm:$0xf]  ;;  %v5211_v4 = vor.u32 %v6952_v55, %v5208_v56  ;;  %v6975_v31 = vld [vmem:[#allocation5 + $0x3d4] sm:$0xf0]  ;;  %v5039_v33 = vor.u32 %v6911_v27, %v5038_v25 }
  0x51   :  { %977 = vmatpush.bf16.msrb.mxu2 %v5115_v34  ;;  %v4936_v2 = vld [vmem:[#allocation5 + $0x110] sm:$0xf0]  ;;  %v6916_v3 = vld [vmem:[#allocation5 + $0x204] sm:$0xf]  ;;  %v4811_v11 = vor.u32 %v6852_v61, %v4808_v62  ;;  %v5167_v34 = vor.u32 %v6943_v29, %v5166_v28  ;;  %v4894_v35 = vld [vmem:[#allocation5 + $0xa8] sm:$0xf] }
  0x52   :  { %990 = vmatpush.bf16.msrb.mxu3 %v5243_v38  ;;  %v5064_v5 = vld [vmem:[#allocation5 + $0x210] sm:$0xf0]  ;;  %v6948_v6 = vld [vmem:[#allocation5 + $0x304] sm:$0xf]  ;;  %v4939_v15 = vor.u32 %v6884_v1, %v4936_v2  ;;  %v6875_v36 = vld [vmem:[#allocation5 + $0xb4] sm:$0xf0]  ;;  %v5295_v38 = vor.u32 %v6975_v31, %v5294_v30 }
  0x53   :  { %952 = vmatpush.bf16.msrb.mxu0 %v4843_v44  ;;  %v5192_v7 = vld [vmem:[#allocation5 + $0x310] sm:$0xf0]  ;;  %v5067_v16 = vor.u32 %v6916_v3, %v5064_v5  ;;  %v5022_v37 = vld [vmem:[#allocation5 + $0x1a8] sm:$0xf]  ;;  %v6907_v39 = vld [vmem:[#allocation5 + $0x1b4] sm:$0xf0]  ;;  %v4895_v44 = vor.u32 %v6875_v36, %v4894_v35 }
  0x54   :  { %965 = vmatpush.bf16.msrb.mxu1 %v4971_v45  ;;  %v5195_v19 = vor.u32 %v6948_v6, %v5192_v7  ;;  %v5150_v40 = vld [vmem:[#allocation5 + $0x2a8] sm:$0xf]  ;;  %v6939_v41 = vld [vmem:[#allocation5 + $0x2b4] sm:$0xf0]  ;;  %v5023_v45 = vor.u32 %v6907_v39, %v5022_v37 }
  0x55   :  { %978 = vmatpush.bf16.msrb.mxu2 %v5099_v46  ;;  %v5278_v42 = vld [vmem:[#allocation5 + $0x3a8] sm:$0xf]  ;;  %v6971_v43 = vld [vmem:[#allocation5 + $0x3b4] sm:$0xf0]  ;;  %v5151_v46 = vor.u32 %v6939_v41, %v5150_v40 }
  0x56   :  { %991 = vmatpush.bf16.msrb.mxu3 %v5227_v50  ;;  %v4878_v47 = vld [vmem:[#allocation5 + $0x88] sm:$0xf]  ;;  %v6871_v48 = vld [vmem:[#allocation5 + $0x94] sm:$0xf0]  ;;  %v5279_v50 = vor.u32 %v6971_v43, %v5278_v42 }
  0x57   :  { %953 = vmatpush.bf16.msrb.mxu0 %v4827_v59  ;;  %v5006_v49 = vld [vmem:[#allocation5 + $0x188] sm:$0xf]  ;;  %v6903_v51 = vld [vmem:[#allocation5 + $0x194] sm:$0xf0]  ;;  %v4879_v59 = vor.u32 %v6871_v48, %v4878_v47  ;;  %v5056_v48 = vld [vmem:[#allocation5 + $0x1f8] sm:$0xf0] }
  0x58   :  { %966 = vmatpush.bf16.msrb.mxu1 %v4955_v63  ;;  %v5134_v52 = vld [vmem:[#allocation5 + $0x288] sm:$0xf]  ;;  %v6935_v53 = vld [vmem:[#allocation5 + $0x294] sm:$0xf0]  ;;  %v5007_v61 = vor.u32 %v6903_v51, %v5006_v49  ;;  %v6945_v49 = vld [vmem:[#allocation5 + $0x2ec] sm:$0xf] }
  0x59   :  { %979 = vmatpush.bf16.msrb.mxu2 %v5083_v0  ;;  %v5262_v55 = vld [vmem:[#allocation5 + $0x388] sm:$0xf]  ;;  %v6967_v56 = vld [vmem:[#allocation5 + $0x394] sm:$0xf0]  ;;  %v5135_v62 = vor.u32 %v6935_v53, %v5134_v52  ;;  %v6977_v53 = vld [vmem:[#allocation5 + $0x3ec] sm:$0xf] }
  0x5a   :  { %992 = vmatpush.bf16.msrb.mxu3 %v5211_v4  ;;  %v4862_v63 = vld [vmem:[#allocation5 + $0x68] sm:$0xf]  ;;  %v6867_v0 = vld [vmem:[#allocation5 + $0x74] sm:$0xf0]  ;;  %v5263_v2 = vor.u32 %v6967_v56, %v5262_v55  ;;  %v5312_v55 = vld [vmem:[#allocation5 + $0x3f8] sm:$0xf0] }
  0x5b   :  { %954 = vmatpush.bf16.msrb.mxu0 %v4811_v11  ;;  %v4990_v1 = vld [vmem:[#allocation5 + $0x168] sm:$0xf]  ;;  %v6899_v3 = vld [vmem:[#allocation5 + $0x174] sm:$0xf0]  ;;  %v4863_v8 = vor.u32 %v6867_v0, %v4862_v63  ;;  %v6877_v63 = vld [vmem:[#allocation5 + $0xcc] sm:$0xf] }
  0x5c   :  { %967 = vmatpush.bf16.msrb.mxu1 %v4939_v15  ;;  %v5118_v4 = vld [vmem:[#allocation5 + $0x268] sm:$0xf]  ;;  %v6931_v5 = vld [vmem:[#allocation5 + $0x274] sm:$0xf0]  ;;  %v4991_v9 = vor.u32 %v6899_v3, %v4990_v1  ;;  %v4912_v0 = vld [vmem:[#allocation5 + $0xd8] sm:$0xf0] }
  0x5d   :  { %980 = vmatpush.bf16.msrb.mxu2 %v5067_v16  ;;  %v5246_v6 = vld [vmem:[#allocation5 + $0x368] sm:$0xf]  ;;  %v6963_v7 = vld [vmem:[#allocation5 + $0x374] sm:$0xf0]  ;;  %v5119_v10 = vor.u32 %v6931_v5, %v5118_v4  ;;  %v6909_v1 = vld [vmem:[#allocation5 + $0x1cc] sm:$0xf] }
  0x5e   :  { %993 = vmatpush.bf16.msrb.mxu3 %v5195_v19  ;;  %955 = vmatmul.bf16.vlgmr.msrb.gmra.mxu0 %v7669_v58  ;;  %v4846_v11 = vld [vmem:[#allocation5 + $0x48] sm:$0xf]  ;;  %v6863_v12 = vld [vmem:[#allocation5 + $0x54] sm:$0xf0]  ;;  %v5247_v14 = vor.u32 %v6963_v7, %v5246_v6  ;;  %v5040_v3 = vld [vmem:[#allocation5 + $0x1d8] sm:$0xf0] }
  0x5f   :  { %999 = vmatpush.bf16.msra.mxu0 %v4927_v20  ;;  %968 = vmatmul.bf16.vlgmr.msrb.gmra.mxu1 %v7671_v60  ;;  %v4974_v13 = vld [vmem:[#allocation5 + $0x148] sm:$0xf]  ;;  %v6895_v15 = vld [vmem:[#allocation5 + $0x154] sm:$0xf0]  ;;  %v4847_v20 = vor.u32 %v6863_v12, %v4846_v11  ;;  %v6941_v4 = vld [vmem:[#allocation5 + $0x2cc] sm:$0xf] }
  0x60   :  { %1012 = vmatpush.bf16.msra.mxu1 %v5055_v21  ;;  %981 = vmatmul.bf16.vlgmr.msrb.gmra.mxu2 %v7665_v54  ;;  %v5102_v16 = vld [vmem:[#allocation5 + $0x248] sm:$0xf]  ;;  %v6927_v17 = vld [vmem:[#allocation5 + $0x254] sm:$0xf0]  ;;  %v4975_v21 = vor.u32 %v6895_v15, %v4974_v13  ;;  %v5168_v5 = vld [vmem:[#allocation5 + $0x2d8] sm:$0xf0] }
  0x61   :  { %1025 = vmatpush.bf16.msra.mxu2 %v5183_v22  ;;  %994 = vmatmul.bf16.vlgmr.msrb.gmra.mxu3 %v7667_v57  ;;  %v5230_v18 = vld [vmem:[#allocation5 + $0x348] sm:$0xf]  ;;  %v6959_v19 = vld [vmem:[#allocation5 + $0x354] sm:$0xf0]  ;;  %v5103_v22 = vor.u32 %v6927_v17, %v5102_v16  ;;  %v6973_v6 = vld [vmem:[#allocation5 + $0x3cc] sm:$0xf] }
  0x62   :  { %1038 = vmatpush.bf16.msra.mxu3 %v5311_v26  ;;  %v4830_v23 = vld [vmem:[#allocation5 + $0x28] sm:$0xf]  ;;  %v6859_v24 = vld [vmem:[#allocation5 + $0x34] sm:$0xf0]  ;;  %v5231_v26 = vor.u32 %v6959_v19, %v5230_v18  ;;  %v5296_v7 = vld [vmem:[#allocation5 + $0x3d8] sm:$0xf0] }
  0x63   :  { %1000 = vmatpush.bf16.msra.mxu0 %v4911_v32  ;;  %v4958_v25 = vld [vmem:[#allocation5 + $0x128] sm:$0xf]  ;;  %v6891_v27 = vld [vmem:[#allocation5 + $0x134] sm:$0xf0]  ;;  %v4831_v32 = vor.u32 %v6859_v24, %v4830_v23  ;;  %v6873_v11 = vld [vmem:[#allocation5 + $0xac] sm:$0xf] }
  0x64   :  { %1013 = vmatpush.bf16.msra.mxu1 %v5039_v33  ;;  %v5086_v28 = vld [vmem:[#allocation5 + $0x228] sm:$0xf]  ;;  %v6923_v29 = vld [vmem:[#allocation5 + $0x234] sm:$0xf0]  ;;  %v4959_v35 = vor.u32 %v6891_v27, %v4958_v25  ;;  %v4896_v12 = vld [vmem:[#allocation5 + $0xb8] sm:$0xf0] }
  0x65   :  { %1026 = vmatpush.bf16.msra.mxu2 %v5167_v34  ;;  %v5214_v30 = vld [vmem:[#allocation5 + $0x328] sm:$0xf]  ;;  %v6955_v31 = vld [vmem:[#allocation5 + $0x334] sm:$0xf0]  ;;  %v5087_v36 = vor.u32 %v6923_v29, %v5086_v28  ;;  %v6905_v13 = vld [vmem:[#allocation5 + $0x1ac] sm:$0xf] }
  0x66   :  { %1039 = vmatpush.bf16.msra.mxu3 %v5295_v38  ;;  %v4814_v33 = vld [vmem:[#allocation5 + $0x8] sm:$0xf]  ;;  %v6855_v34 = vld [vmem:[#allocation5 + $0x14] sm:$0xf0]  ;;  %v5215_v40 = vor.u32 %v6955_v31, %v5214_v30  ;;  %v5024_v15 = vld [vmem:[#allocation5 + $0x1b8] sm:$0xf0] }
  0x67   :  { %1001 = vmatpush.bf16.msra.mxu0 %v4895_v44  ;;  %v4942_v37 = vld [vmem:[#allocation5 + $0x108] sm:$0xf]  ;;  %v6887_v38 = vld [vmem:[#allocation5 + $0x114] sm:$0xf0]  ;;  %v6881_v44 = vld [vmem:[#allocation5 + $0xec] sm:$0xf]  ;;  %v4815_v47 = vor.u32 %v6855_v34, %v4814_v33 }
  0x68   :  { %1014 = vmatpush.bf16.msra.mxu1 %v5023_v45  ;;  %v5070_v39 = vld [vmem:[#allocation5 + $0x208] sm:$0xf]  ;;  %v6919_v41 = vld [vmem:[#allocation5 + $0x214] sm:$0xf0]  ;;  %v4928_v45 = vld [vmem:[#allocation5 + $0xf8] sm:$0xf0]  ;;  %v4943_v51 = vor.u32 %v6887_v38, %v4942_v37 }
  0x69   :  { %1027 = vmatpush.bf16.msra.mxu2 %v5151_v46  ;;  %v5198_v42 = vld [vmem:[#allocation5 + $0x308] sm:$0xf]  ;;  %v6951_v43 = vld [vmem:[#allocation5 + $0x314] sm:$0xf0]  ;;  %v6913_v46 = vld [vmem:[#allocation5 + $0x1ec] sm:$0xf]  ;;  %v5071_v52 = vor.u32 %v6919_v41, %v5070_v39 }
  0x6a   :  { %1040 = vmatpush.bf16.msra.mxu3 %v5279_v50  ;;  %v5184_v50 = vld [vmem:[#allocation5 + $0x2f8] sm:$0xf0]  ;;  %v5199_v56 = vor.u32 %v6951_v43, %v5198_v42  ;;  %v6937_v16 = vld [vmem:[#allocation5 + $0x2ac] sm:$0xf] }
  0x6b   :  { %1002 = vmatpush.bf16.msra.mxu0 %v4879_v59  ;;  %v4931_v59 = vor.u32 %v6881_v44, %v4928_v45  ;;  %v5152_v17 = vld [vmem:[#allocation5 + $0x2b8] sm:$0xf0]  ;;  %v6969_v18 = vld [vmem:[#allocation5 + $0x3ac] sm:$0xf] }
  0x6c   :  { %1015 = vmatpush.bf16.msra.mxu1 %v5007_v61  ;;  %v5059_v61 = vor.u32 %v6913_v46, %v5056_v48  ;;  %v5280_v19 = vld [vmem:[#allocation5 + $0x3b8] sm:$0xf0]  ;;  %v6869_v23 = vld [vmem:[#allocation5 + $0x8c] sm:$0xf] }
  0x6d   :  { %1028 = vmatpush.bf16.msra.mxu2 %v5135_v62  ;;  %v5187_v62 = vor.u32 %v6945_v49, %v5184_v50  ;;  %v4880_v24 = vld [vmem:[#allocation5 + $0x98] sm:$0xf0]  ;;  %v6901_v25 = vld [vmem:[#allocation5 + $0x18c] sm:$0xf] }
  0x6e   :  { %1041 = vmatpush.bf16.msra.mxu3 %v5263_v2  ;;  %v5315_v2 = vor.u32 %v6977_v53, %v5312_v55  ;;  %v5008_v27 = vld [vmem:[#allocation5 + $0x198] sm:$0xf0]  ;;  %v6933_v28 = vld [vmem:[#allocation5 + $0x28c] sm:$0xf] }
  0x6f   :  { %1003 = vmatpush.bf16.msra.mxu0 %v4863_v8  ;;  %v4915_v8 = vor.u32 %v6877_v63, %v4912_v0  ;;  %v5136_v29 = vld [vmem:[#allocation5 + $0x298] sm:$0xf0]  ;;  %v6965_v30 = vld [vmem:[#allocation5 + $0x38c] sm:$0xf]  ;;  %v5011_v33 = vor.u32 %v6901_v25, %v5008_v27  ;;  %v7598_v27 = vmov 8.0  }
  0x70   :  { %1016 = vmatpush.bf16.msra.mxu1 %v4991_v9  ;;  %v5043_v9 = vor.u32 %v6909_v1, %v5040_v3  ;;  %v5264_v31 = vld [vmem:[#allocation5 + $0x398] sm:$0xf0]  ;;  %v5139_v34 = vor.u32 %v6933_v28, %v5136_v29  ;;  %v6897_v37 = vld [vmem:[#allocation5 + $0x16c] sm:$0xf]  ;;  %7376 = vrcp.f32 %v7598_v27 }
  0x71   :  { %1029 = vmatpush.bf16.msra.mxu2 %v5119_v10  ;;  %v5171_v10 = vor.u32 %v6941_v4, %v5168_v5  ;;  %v5267_v38 = vor.u32 %v6965_v30, %v5264_v31  ;;  %v4992_v39 = vld [vmem:[#allocation5 + $0x178] sm:$0xf0]  ;;  %v6961_v42 = vld [vmem:[#allocation5 + $0x36c] sm:$0xf] }
  0x72   :  { %1042 = vmatpush.bf16.msra.mxu3 %v5247_v14  ;;  %v5299_v14 = vor.u32 %v6973_v6, %v5296_v7  ;;  %v5120_v41 = vld [vmem:[#allocation5 + $0x278] sm:$0xf0]  ;;  %v4995_v45 = vor.u32 %v6897_v37, %v4992_v39  ;;  %v6893_v49 = vld [vmem:[#allocation5 + $0x14c] sm:$0xf] }
  0x73   :  { %1004 = vmatpush.bf16.msra.mxu0 %v4847_v20  ;;  %v4899_v20 = vor.u32 %v6873_v11, %v4896_v12  ;;  %v5248_v43 = vld [vmem:[#allocation5 + $0x378] sm:$0xf0]  ;;  %v6957_v55 = vld [vmem:[#allocation5 + $0x34c] sm:$0xf] }
  0x74   :  { %1017 = vmatpush.bf16.msra.mxu1 %v4975_v21  ;;  %v5027_v21 = vor.u32 %v6905_v13, %v5024_v15  ;;  %v4848_v48 = vld [vmem:[#allocation5 + $0x58] sm:$0xf0]  ;;  %v5251_v50 = vor.u32 %v6961_v42, %v5248_v43  ;;  %v6857_v63 = vld [vmem:[#allocation5 + $0x2c] sm:$0xf] }
  0x75   :  { %1030 = vmatpush.bf16.msra.mxu2 %v5103_v22  ;;  %v5155_v22 = vor.u32 %v6937_v16, %v5152_v17  ;;  %v5104_v53 = vld [vmem:[#allocation5 + $0x258] sm:$0xf0]  ;;  %v6889_v1 = vld [vmem:[#allocation5 + $0x12c] sm:$0xf] }
  0x76   :  { %1043 = vmatpush.bf16.msra.mxu3 %v5231_v26  ;;  %v5283_v26 = vor.u32 %v6969_v18, %v5280_v19  ;;  %v4832_v0 = vld [vmem:[#allocation5 + $0x38] sm:$0xf0]  ;;  %v6921_v4 = vld [vmem:[#allocation5 + $0x22c] sm:$0xf] }
  0x77   :  { %1005 = vmatpush.bf16.msra.mxu0 %v4831_v32  ;;  %v4883_v32 = vor.u32 %v6869_v23, %v4880_v24  ;;  %v4960_v3 = vld [vmem:[#allocation5 + $0x138] sm:$0xf0]  ;;  %v6953_v6 = vld [vmem:[#allocation5 + $0x32c] sm:$0xf] }
  0x78   :  { %1018 = vmatpush.bf16.msra.mxu1 %v4959_v35  ;;  %v6865_v35 = vld [vmem:[#allocation5 + $0x6c] sm:$0xf]  ;;  %v5088_v5 = vld [vmem:[#allocation5 + $0x238] sm:$0xf0] }
  0x79   :  { %1031 = vmatpush.bf16.msra.mxu2 %v5087_v36  ;;  %v4864_v36 = vld [vmem:[#allocation5 + $0x78] sm:$0xf0]  ;;  %v6853_v11 = vld [vmem:[#allocation5 + $0xc] sm:$0xf] }
  0x7a   :  { %1044 = vmatpush.bf16.msra.mxu3 %v5215_v40  ;;  %v6929_v40 = vld [vmem:[#allocation5 + $0x26c] sm:$0xf]  ;;  %v4867_v44 = vor.u32 %v6865_v35, %v4864_v36  ;;  %v5216_v7 = vld [vmem:[#allocation5 + $0x338] sm:$0xf0] }
  0x7b   :  { %1006 = vmatpush.bf16.msra.mxu0 %v4815_v47  ;;  %v5123_v46 = vor.u32 %v6929_v40, %v5120_v41  ;;  %v6861_v47 = vld [vmem:[#allocation5 + $0x4c] sm:$0xf]  ;;  %v4816_v12 = vld [vmem:[#allocation5 + $0x18] sm:$0xf0] }
  0x7c   :  { %1019 = vmatpush.bf16.msra.mxu1 %v4943_v51  ;;  %v4976_v51 = vld [vmem:[#allocation5 + $0x158] sm:$0xf0]  ;;  %v6885_v13 = vld [vmem:[#allocation5 + $0x10c] sm:$0xf] }
  0x7d   :  { %1032 = vmatpush.bf16.msra.mxu2 %v5071_v52  ;;  %v6925_v52 = vld [vmem:[#allocation5 + $0x24c] sm:$0xf]  ;;  %v4944_v15 = vld [vmem:[#allocation5 + $0x118] sm:$0xf0] }
  0x7e   :  { %1045 = vmatpush.bf16.msra.mxu3 %v5199_v56  ;;  %1007 = vmatmul.bf16.vlgmr.msra.gmra.mxu0 %v7669_v58  ;;  %v5232_v56 = vld [vmem:[#allocation5 + $0x358] sm:$0xf0]  ;;  %v6917_v16 = vld [vmem:[#allocation5 + $0x20c] sm:$0xf] }
  0x7f   :  { %1051 = vmatpush.bf16.msrb.mxu0 %v4931_v59  ;;  %1020 = vmatmul.bf16.vlgmr.msra.gmra.mxu1 %v7671_v60  ;;  %v4851_v59 = vor.u32 %v6861_v47, %v4848_v48  ;;  %v5072_v17 = vld [vmem:[#allocation5 + $0x218] sm:$0xf0]  ;;  %v6949_v18 = vld [vmem:[#allocation5 + $0x30c] sm:$0xf] }
  0x80   :  { %1064 = vmatpush.bf16.msrb.mxu1 %v5059_v61  ;;  %1033 = vmatmul.bf16.vlgmr.msra.gmra.mxu2 %v7665_v54  ;;  %v4979_v61 = vor.u32 %v6893_v49, %v4976_v51  ;;  %v5200_v19 = vld [vmem:[#allocation5 + $0x318] sm:$0xf0] }
  0x81   :  { %1077 = vmatpush.bf16.msrb.mxu2 %v5187_v62  ;;  %1046 = vmatmul.bf16.vlgmr.msra.gmra.mxu3 %v7667_v57  ;;  %v5107_v62 = vor.u32 %v6925_v52, %v5104_v53  ;;  %v5203_v23 = vor.u32 %v6949_v18, %v5200_v19 }
  0x82   :  { %1090 = vmatpush.bf16.msrb.mxu3 %v5315_v2  ;;  %v5235_v2 = vor.u32 %v6957_v55, %v5232_v56 }
  0x83   :  { %1052 = vmatpush.bf16.msrb.mxu0 %v4915_v8  ;;  %v4835_v8 = vor.u32 %v6857_v63, %v4832_v0 }
  0x84   :  { %1065 = vmatpush.bf16.msrb.mxu1 %v5043_v9  ;;  %v4963_v9 = vor.u32 %v6889_v1, %v4960_v3 }
  0x85   :  { %1078 = vmatpush.bf16.msrb.mxu2 %v5171_v10  ;;  %v5091_v10 = vor.u32 %v6921_v4, %v5088_v5 }
  0x86   :  { %1091 = vmatpush.bf16.msrb.mxu3 %v5299_v14  ;;  %v5219_v14 = vor.u32 %v6953_v6, %v5216_v7 }
  0x87   :  { %1053 = vmatpush.bf16.msrb.mxu0 %v4899_v20  ;;  %v4819_v20 = vor.u32 %v6853_v11, %v4816_v12 }
  0x88   :  { %1066 = vmatpush.bf16.msrb.mxu1 %v5027_v21  ;;  %v4947_v21 = vor.u32 %v6885_v13, %v4944_v15 }
  0x89   :  { %1079 = vmatpush.bf16.msrb.mxu2 %v5155_v22  ;;  %v5075_v22 = vor.u32 %v6917_v16, %v5072_v17 }
  0x8a   :  { %1092 = vmatpush.bf16.msrb.mxu3 %v5283_v26 }
  0x8b   :  { %1054 = vmatpush.bf16.msrb.mxu0 %v4883_v32 }
  0x8c   :  { %1067 = vmatpush.bf16.msrb.mxu1 %v5011_v33  ;;  %v7377_v33 = vpop.eup %7376 }
  0x8d   :  { %1080 = vmatpush.bf16.msrb.mxu2 %v5139_v34  ;;  %vm1132_vm0 = vweird.f32 %v7377_v33 }
  0x8e   :  { %1093 = vmatpush.bf16.msrb.mxu3 %v5267_v38 }
  0x8f   :  { %1055 = vmatpush.bf16.msrb.mxu0 %v4867_v44 }
  0x90   :  { %1068 = vmatpush.bf16.msrb.mxu1 %v4995_v45 }
  0x91   :  { %1081 = vmatpush.bf16.msrb.mxu2 %v5123_v46 }
  0x92   :  { %1094 = vmatpush.bf16.msrb.mxu3 %v5251_v50 }
  0x93   :  { %1056 = vmatpush.bf16.msrb.mxu0 %v4851_v59 }
  0x94   :  { %1069 = vmatpush.bf16.msrb.mxu1 %v4979_v61 }
  0x95   :  { %1082 = vmatpush.bf16.msrb.mxu2 %v5107_v62 }
  0x96   :  { %1095 = vmatpush.bf16.msrb.mxu3 %v5235_v2 }
  0x97   :  { %1057 = vmatpush.bf16.msrb.mxu0 %v4835_v8 }
  0x98   :  { %1070 = vmatpush.bf16.msrb.mxu1 %v4963_v9 }
  0x99   :  { %1083 = vmatpush.bf16.msrb.mxu2 %v5091_v10 }
  0x9a   :  { %1096 = vmatpush.bf16.msrb.mxu3 %v5219_v14 }
  0x9b   :  { %1058 = vmatpush.bf16.msrb.mxu0 %v4819_v20 }
  0x9c   :  { %1071 = vmatpush.bf16.msrb.mxu1 %v4947_v21 }
  0x9d   :  { %1084 = vmatpush.bf16.msrb.mxu2 %v5075_v22 }
  0x9e   :  { %1097 = vmatpush.bf16.msrb.mxu3 %v5203_v23  ;;  %1059 = vmatmul.bf16.vlgmr.msrb.gmra.mxu0 %v7669_v58 }
  0x9f   :  { %1072 = vmatmul.bf16.vlgmr.msrb.gmra.mxu1 %v7671_v60  ;;  %v1128_v60 = vmul.f32 8.0, %v7377_v33 }
  0xa0   :  { %1085 = vmatmul.bf16.vlgmr.msrb.gmra.mxu2 %v7665_v54 }
  0xa1   :  { %1098 = vmatmul.bf16.vlgmr.msrb.gmra.mxu3 %v7667_v57  ;;  %v1129_v40 = vsub.f32 1.0, %v1128_v60 }
  0xa3   :  { %v1130_v43 = vmul.f32 %v7377_v33, %v1129_v40 }
  0xa5   :  { %v1131_v46 = vadd.f32 %v7377_v33, %v1130_v43 }
  0xa7   :  { %v7695_v49 = vsel %vm1132_vm0, %v7377_v33, %v1131_v46  ;;  %v7010_v46 = vld [vmem:[#allocation7 + $0xec] sm:$0xf0] }
  0xbc   :  { %v917_v25 = vpop.f32.mrf.mxu1 }
  0xbf   :  { %v904_v24 = vpop.f32.mrf.mxu0 }
  0xc0   :  { %v918_v26 = vadd.f32 %v917_v25, %v904_v24 }
  0xc3   :  { %v930_v28 = vpop.f32.mrf.mxu2 }
  0xc4   :  { %v931_v29 = vadd.f32 %v930_v28, %v918_v26  ;;  %v943_v30 = vpop.f32.mrf.mxu3  ;;  %v919_v34 = vpop.f32.mrf.mxu1 }
  0xc6   :  { %v7689_v31 = vadd.f32 %v943_v30, %v931_v29 }
  0xc7   :  { %v906_v32 = vpop.f32.mrf.mxu0 }
  0xc8   :  { %v1103_v58 = vrot.slane %v7689_v31, 4  ;;  %v1138_v54 = vmul.f32 %v7689_v31, %v7689_v31 }
  0xca   :  { %v1104_v57 = vadd.f32 %v1103_v58, %v7689_v31  ;;  %v1142_v35 = vrot.slane %v1138_v54, 4 }
  0xcb   :  { %v932_v36 = vpop.f32.mrf.mxu2 }
  0xcc   :  { %v945_v37 = vpop.f32.mrf.mxu3  ;;  %v1105_v38 = vrot.slane %v1104_v57, 2  ;;  %v1143_v39 = vadd.f32 %v1142_v35, %v1138_v54 }
  0xce   :  { %v1106_v41 = vadd.f32 %v1105_v38, %v1104_v57  ;;  %v1144_v42 = vrot.slane %v1143_v39, 2 }
  0xd0   :  { %v1107_v44 = vrot.slane %v1106_v41, 1  ;;  %v1145_v45 = vadd.f32 %v1144_v42, %v1143_v39 }
  0xd2   :  { %v1108_v47 = vadd.f32 %v1107_v44, %v1106_v41  ;;  %v1146_v48 = vrot.slane %v1145_v45, 1 }
  0xd4   :  { %v7698_v51 = vmul.f32 %v7695_v49, %v1108_v47  ;;  %v1147_v52 = vadd.f32 %v1146_v48, %v1145_v45  ;;  %v5430_v45 = vld [vmem:[#allocation7 + $0xe0] sm:$0xf] }
  0xd6   :  { %v1166_v56 = vmul.f32 %v1147_v52, %v7695_v49  ;;  %v1170_v59 = vmul.f32 %v7698_v51, %v7698_v51  ;;  %v5558_v52 = vld [vmem:[#allocation7 + $0x1e0] sm:$0xf] }
  0xd8   :  { %v1174_v2 = vsub.f32 %v1166_v56, %v1170_v59 }
  0xda   :  { %v1178_v8 = vmax.f32 %v1174_v2, 0.0 }
  0xdb   :  { %v956_v50 = vpop.f32.mrf.mxu0 }
  0xdc   :  { %v969_v53 = vpop.f32.mrf.mxu1  ;;  %v7709_v15 = vadd.f32 1e-05, %v1178_v8  ;;  %v5414_v8 = vld [vmem:[#allocation7 + $0xc0] sm:$0xf] }
  0xdd   :  { %v970_v55 = vadd.f32 %v969_v53, %v956_v50  ;;  %v5431_v50 = vor.u32 %v7010_v46, %v5430_v45  ;;  %v7042_v53 = vld [vmem:[#allocation7 + $0x1ec] sm:$0xf0]  ;;  %v5510_v45 = vld [vmem:[#allocation7 + $0x180] sm:$0xf] }
  0xde   :  { %7378 = vrsqrt.f32 %v7709_v15  ;;  %vm1192_vm3 = vweird.f32 %v7709_v15 }
  0xdf   :  { %2063 = vmatpush.bf16.msra.mxu0 %v5431_v50  ;;  %v7062_v50 = vld [vmem:[#allocation7 + $0x28c] sm:$0xf0] }
  0xe3   :  { %v982_v61 = vpop.f32.mrf.mxu2  ;;  %v958_v1 = vpop.f32.mrf.mxu0 }
  0xe4   :  { %v983_v62 = vadd.f32 %v982_v61, %v970_v55  ;;  %v995_v63 = vpop.f32.mrf.mxu3  ;;  %v971_v3 = vpop.f32.mrf.mxu1  ;;  %v5559_v61 = vor.u32 %v7042_v53, %v5558_v52 }
  0xe5   :  { %v7718_v25 = vpop.eup %7378  ;;  %v5814_v3 = vld [vmem:[#allocation7 + $0x3e0] sm:$0xf] }
  0xe6   :  { %v7703_v0 = vadd.f32 %v995_v63, %v983_v62  ;;  %v1187_v27 = vmul.f32 %v7718_v25, %v7709_v15  ;;  %v5686_v62 = vld [vmem:[#allocation7 + $0x2e0] sm:$0xf]  ;;  %v7074_v63 = vld [vmem:[#allocation7 + $0x2ec] sm:$0xf0]  ;;  %vm1193_vm4 = vweird.f32 %v7718_v25  ;;  %2076 = vmatpush.bf16.msra.mxu1 %v5559_v61 }
  0xe7   :  { %v5687_v2 = vor.u32 %v7074_v63, %v5686_v62  ;;  %vm7742_vm6 = vmor %vm1192_vm3, %vm1193_vm4 }
  0xe8   :  { %v1109_v4 = vrot.slane %v7703_v0, 4  ;;  %v1139_v5 = vmul.f32 %v7703_v0, %v7703_v0  ;;  %v1188_v33 = vmul.f32 %v7718_v25, %v1187_v27  ;;  %v5798_v27 = vld [vmem:[#allocation7 + $0x3c0] sm:$0xf] }
  0xe9   :  { %2089 = vmatpush.bf16.msra.mxu2 %v5687_v2  ;;  %v6994_v2 = vld [vmem:[#allocation7 + $0x6c] sm:$0xf0] }
  0xea   :  { %v1110_v6 = vadd.f32 %v1109_v4, %v7703_v0  ;;  %v1148_v7 = vrot.slane %v1139_v5, 4  ;;  %v1189_v60 = vmul.f32 0.5, %v1188_v33 }
  0xeb   :  { %v984_v9 = vpop.f32.mrf.mxu2 }
  0xec   :  { %v1111_v10 = vrot.slane %v1110_v6, 2  ;;  %v1149_v11 = vadd.f32 %v1148_v7, %v1139_v5  ;;  %v997_v12 = vpop.f32.mrf.mxu3  ;;  %v1190_v42 = vsub.f32 1.5, %v1189_v60  ;;  %v7106_v7 = vld [vmem:[#allocation7 + $0x3ec] sm:$0xf0]  ;;  %v5654_v60 = vld [vmem:[#allocation7 + $0x2a0] sm:$0xf] }
  0xed   :  { %v7006_v12 = vld [vmem:[#allocation7 + $0xcc] sm:$0xf0] }
  0xee   :  { %v1112_v13 = vadd.f32 %v1111_v10, %v1110_v6  ;;  %v1150_v14 = vrot.slane %v1149_v11, 2  ;;  %v1191_v10 = vmul.f32 %v7718_v25, %v1190_v42 }
  0xf0   :  { %v1113_v16 = vrot.slane %v1112_v13, 1  ;;  %v1151_v17 = vadd.f32 %v1150_v14, %v1149_v11  ;;  %v5815_v11 = vor.u32 %v7106_v7, %v5814_v3  ;;  %v7038_v14 = vld [vmem:[#allocation7 + $0x1cc] sm:$0xf0]  ;;  %v1195_v33 = vsel %vm7742_vm6, %v7718_v25, %v1191_v10  ;;  %v5382_v25 = vld [vmem:[#allocation7 + $0x80] sm:$0xf] }
  0xf1   :  { %v5622_v7 = vld [vmem:[#allocation7 + $0x260] sm:$0xf] }
  0xf2   :  { %v1114_v18 = vadd.f32 %v1113_v16, %v1112_v13  ;;  %v1152_v19 = vrot.slane %v1151_v17, 1  ;;  %v5542_v13 = vld [vmem:[#allocation7 + $0x1c0] sm:$0xf]  ;;  %2102 = vmatpush.bf16.msra.mxu3 %v5815_v11 }
  0xf3   :  { %v5750_v10 = vld [vmem:[#allocation7 + $0x360] sm:$0xf] }
  0xf4   :  { %v7713_v20 = vmul.f32 %v7695_v49, %v1114_v18  ;;  %v1153_v21 = vadd.f32 %v1152_v19, %v1151_v17  ;;  %v5415_v17 = vor.u32 %v7006_v12, %v5414_v8  ;;  %v5543_v18 = vor.u32 %v7038_v14, %v5542_v13  ;;  %v5670_v19 = vld [vmem:[#allocation7 + $0x2c0] sm:$0xf]  ;;  %v7090_v14 = vld [vmem:[#allocation7 + $0x36c] sm:$0xf0] }
  0xf6   :  { %v1167_v22 = vmul.f32 %v1153_v21, %v7695_v49  ;;  %v1171_v23 = vmul.f32 %v7713_v20, %v7713_v20  ;;  %v7070_v21 = vld [vmem:[#allocation7 + $0x2cc] sm:$0xf0]  ;;  %2064 = vmatpush.bf16.msra.mxu0 %v5415_v17  ;;  %2077 = vmatpush.bf16.msra.mxu1 %v5543_v18  ;;  %v5751_v17 = vor.u32 %v7090_v14, %v5750_v10  ;;  %v5350_v18 = vld [vmem:[#allocation7 + $0x40] sm:$0xf]  ;;  %v7008_v10 = vld [vmem:[#allocation7 + $0xe4] sm:$0xf] }
  0xf8   :  { %v1175_v24 = vsub.f32 %v1167_v22, %v1171_v23 }
  0xfa   :  { %v1179_v26 = vmax.f32 %v1175_v24, 0.0 }
  0xfb   :  { %v1008_v29 = vpop.f32.mrf.mxu0 }
  0xfc   :  { %v1183_v28 = vadd.f32 1e-05, %v1179_v26  ;;  %v1021_v30 = vpop.f32.mrf.mxu1  ;;  %v5671_v26 = vor.u32 %v7070_v21, %v5670_v19  ;;  %v6990_v19 = vld [vmem:[#allocation7 + $0x4c] sm:$0xf0]  ;;  %v5478_v21 = vld [vmem:[#allocation7 + $0x140] sm:$0xf] }
  0xfd   :  { %v1022_v32 = vadd.f32 %v1021_v30, %v1008_v29  ;;  %v5398_v30 = vld [vmem:[#allocation7 + $0xa0] sm:$0xf] }
  0xfe   :  { %7380 = vrsqrt.f32 %v1183_v28  ;;  %vm1202_vm1 = vweird.f32 %v1183_v28  ;;  %2090 = vmatpush.bf16.msra.mxu2 %v5671_v26  ;;  %v7054_v26 = vld [vmem:[#allocation7 + $0x24c] sm:$0xf0] }
 0x103   :  { %v1034_v34 = vpop.f32.mrf.mxu2  ;;  %v1010_v36 = vpop.f32.mrf.mxu0 }
 0x104   :  { %v1035_v58 = vadd.f32 %v1034_v34, %v1022_v32  ;;  %v1047_v54 = vpop.f32.mrf.mxu3  ;;  %v7381_v57 = vpop.eup %7380  ;;  %v7002_v32 = vld [vmem:[#allocation7 + $0xac] sm:$0xf0] }
 0x105   :  { %v1197_v37 = vmul.f32 %v7381_v57, %v1183_v28  ;;  %v1023_v38 = vpop.f32.mrf.mxu1  ;;  %vm1203_vm2 = vweird.f32 %v7381_v57  ;;  %v7102_v28 = vld [vmem:[#allocation7 + $0x3cc] sm:$0xf0]  ;;  %v5399_v34 = vor.u32 %v7002_v32, %v5398_v30 }
 0x106   :  { %v7723_v35 = vadd.f32 %v1047_v54, %v1035_v58  ;;  %vm7733_vm5 = vmor %vm1202_vm1, %vm1203_vm2  ;;  %v5799_v15 = vor.u32 %v7102_v28, %v5798_v27  ;;  %v5526_v58 = vld [vmem:[#allocation7 + $0x1a0] sm:$0xf]  ;;  %v7034_v54 = vld [vmem:[#allocation7 + $0x1ac] sm:$0xf0] }
 0x107   :  { %v1198_v41 = vmul.f32 %v7381_v57, %v1197_v37  ;;  %v5527_v36 = vor.u32 %v7034_v54, %v5526_v58  ;;  %v7066_v37 = vld [vmem:[#allocation7 + $0x2ac] sm:$0xf0]  ;;  %v5782_v38 = vld [vmem:[#allocation7 + $0x3a0] sm:$0xf]  ;;  %2065 = vmatpush.bf16.msra.mxu0 %v5399_v34 }
 0x108   :  { %v1115_v39 = vrot.slane %v7723_v35, 4  ;;  %v1140_v40 = vmul.f32 %v7723_v35, %v7723_v35  ;;  %2103 = vmatpush.bf16.msra.mxu3 %v5799_v15  ;;  %v5655_v42 = vor.u32 %v7066_v37, %v5654_v60  ;;  %v7086_v15 = vld [vmem:[#allocation7 + $0x34c] sm:$0xf0]  ;;  %v5334_v60 = vld [vmem:[#allocation7 + $0x20] sm:$0xf] }
 0x109   :  { %v1199_v47 = vmul.f32 0.5, %v1198_v41  ;;  %2078 = vmatpush.bf16.msra.mxu1 %v5527_v36  ;;  %v6986_v36 = vld [vmem:[#allocation7 + $0x2c] sm:$0xf0]  ;;  %v5462_v37 = vld [vmem:[#allocation7 + $0x120] sm:$0xf] }
 0x10a   :  { %v1116_v43 = vadd.f32 %v1115_v39, %v7723_v35  ;;  %v1154_v44 = vrot.slane %v1140_v40, 4  ;;  %v7098_v39 = vld [vmem:[#allocation7 + $0x3ac] sm:$0xf0]  ;;  %2091 = vmatpush.bf16.msra.mxu2 %v5655_v42 }
 0x10b   :  { %v1036_v48 = vpop.f32.mrf.mxu2  ;;  %v1200_v1 = vsub.f32 1.5, %v1199_v47  ;;  %v7030_v47 = vld [vmem:[#allocation7 + $0x18c] sm:$0xf0] }
 0x10c   :  { %v1117_v55 = vrot.slane %v1116_v43, 2  ;;  %v1155_v56 = vadd.f32 %v1154_v44, %v1140_v40  ;;  %v1049_v59 = vpop.f32.mrf.mxu3  ;;  %v6998_v44 = vld [vmem:[#allocation7 + $0x8c] sm:$0xf0]  ;;  %v5638_v48 = vld [vmem:[#allocation7 + $0x280] sm:$0xf]  ;;  %v5511_v52 = vor.u32 %v7030_v47, %v5510_v45 }
 0x10d   :  { %v1201_v9 = vmul.f32 %v7381_v57, %v1200_v1  ;;  %v5383_v46 = vor.u32 %v6998_v44, %v5382_v25  ;;  %v5639_v53 = vor.u32 %v7062_v50, %v5638_v48  ;;  %v5366_v1 = vld [vmem:[#allocation7 + $0x60] sm:$0xf]  ;;  %v7050_v42 = vld [vmem:[#allocation7 + $0x22c] sm:$0xf0] }
 0x10e   :  { %v1118_v5 = vadd.f32 %v1117_v55, %v1116_v43  ;;  %v1156_v6 = vrot.slane %v1155_v56, 2  ;;  %v5783_v43 = vor.u32 %v7098_v39, %v5782_v38  ;;  %v5766_v55 = vld [vmem:[#allocation7 + $0x380] sm:$0xf]  ;;  %2079 = vmatpush.bf16.msra.mxu1 %v5511_v52  ;;  %v5367_v4 = vor.u32 %v6994_v2, %v5366_v1 }
 0x10f   :  { %v1205_v24 = vsel %vm7733_vm5, %v7381_v57, %v1201_v9  ;;  %2066 = vmatpush.bf16.msra.mxu0 %v5383_v46  ;;  %2092 = vmatpush.bf16.msra.mxu2 %v5639_v53  ;;  %v7058_v9 = vld [vmem:[#allocation7 + $0x26c] sm:$0xf0]  ;;  %v5335_v39 = vor.u32 %v6986_v36, %v5334_v60  ;;  %v5718_v45 = vld [vmem:[#allocation7 + $0x320] sm:$0xf] }
 0x110   :  { %v1119_v22 = vrot.slane %v1118_v5, 1  ;;  %v1157_v23 = vadd.f32 %v1156_v6, %v1155_v56  ;;  %v1230_v29 = vrot.slane %v1205_v24, 7  ;;  %v7094_v56 = vld [vmem:[#allocation7 + $0x38c] sm:$0xf0]  ;;  %2104 = vmatpush.bf16.msra.mxu3 %v5783_v43  ;;  %v5623_v13 = vor.u32 %v7058_v9, %v5622_v7  ;;  %v5606_v24 = vld [vmem:[#allocation7 + $0x240] sm:$0xf] }
 0x111   :  { %v5767_v62 = vor.u32 %v7094_v56, %v5766_v55  ;;  %v7026_v6 = vld [vmem:[#allocation7 + $0x16c] sm:$0xf0]  ;;  %v5607_v28 = vor.u32 %v7054_v26, %v5606_v24  ;;  %v5318_v53 = vld [vmem:[#allocation7] sm:$0xf]  ;;  %v5688_v26 = vld [vmem:[#allocation7 + $0x2f0] sm:$0xf0] }
 0x112   :  { %v7752_v57 = vsel %vm1233_vm7, %v1195_v33, %v1230_v29  ;;  %v1120_v40 = vadd.f32 %v1119_v22, %v1118_v5  ;;  %v1158_v41 = vrot.slane %v1157_v23, 1  ;;  %v5494_v5 = vld [vmem:[#allocation7 + $0x160] sm:$0xf]  ;;  %v5351_v22 = vor.u32 %v6990_v19, %v5350_v18  ;;  %v7082_v46 = vld [vmem:[#allocation7 + $0x32c] sm:$0xf0] }
 0x113   :  { %v5495_v8 = vor.u32 %v7026_v6, %v5494_v5  ;;  %2067 = vmatpush.bf16.msra.mxu0 %v5367_v4  ;;  %2093 = vmatpush.bf16.msra.mxu2 %v5623_v13  ;;  %v5734_v29 = vld [vmem:[#allocation7 + $0x340] sm:$0xf]  ;;  %v5719_v48 = vor.u32 %v7082_v46, %v5718_v45  ;;  %v6982_v55 = vld [vmem:[#allocation7 + $0xc] sm:$0xf0]  ;;  %v5560_v19 = vld [vmem:[#allocation7 + $0x1f0] sm:$0xf0] }
 0x114   :  { %v7755_v59 = vmul.f32 %v7695_v49, %v1120_v40  ;;  %v1159_v61 = vadd.f32 %v1158_v41, %v1157_v23  ;;  %2105 = vmatpush.bf16.msra.mxu3 %v5767_v62  ;;  %v7022_v23 = vld [vmem:[#allocation7 + $0x14c] sm:$0xf0]  ;;  %v5735_v33 = vor.u32 %v7086_v15, %v5734_v29  ;;  %v5590_v41 = vld [vmem:[#allocation7 + $0x220] sm:$0xf]  ;;  %v5319_v56 = vor.u32 %v6982_v55, %v5318_v53  ;;  %v5816_v29 = vld [vmem:[#allocation7 + $0x3f0] sm:$0xf0] }
 0x115   :  { %2080 = vmatpush.bf16.msra.mxu1 %v5495_v8  ;;  %v5479_v27 = vor.u32 %v7022_v23, %v5478_v21  ;;  %v7018_v40 = vld [vmem:[#allocation7 + $0x12c] sm:$0xf0]  ;;  %v5591_v44 = vor.u32 %v7050_v42, %v5590_v41  ;;  %v5702_v5 = vld [vmem:[#allocation7 + $0x300] sm:$0xf]  ;;  %v7072_v21 = vld [vmem:[#allocation7 + $0x2e4] sm:$0xf] }
 0x116   :  { %v1168_v11 = vmul.f32 %v1159_v61, %v7695_v49  ;;  %v1172_v12 = vmul.f32 %v7755_v59, %v7755_v59  ;;  %v5463_v25 = vor.u32 %v7018_v40, %v5462_v37  ;;  %v5446_v61 = vld [vmem:[#allocation7 + $0x100] sm:$0xf]  ;;  %v7014_v62 = vld [vmem:[#allocation7 + $0x10c] sm:$0xf0]  ;;  %v7004_v15 = vld [vmem:[#allocation7 + $0xc4] sm:$0xf] }
 0x117   :  { %2068 = vmatpush.bf16.msra.mxu0 %v5351_v22  ;;  %2094 = vmatpush.bf16.msra.mxu2 %v5607_v28  ;;  %v7046_v4 = vld [vmem:[#allocation7 + $0x20c] sm:$0xf0]  ;;  %v5691_v28 = vor.u32 %v7072_v21, %v5688_v26  ;;  %v7068_v37 = vld [vmem:[#allocation7 + $0x2c4] sm:$0xf]  ;;  %v5800_v42 = vld [vmem:[#allocation7 + $0x3d0] sm:$0xf0] }
 0x118   :  { %v1176_v30 = vsub.f32 %v1168_v11, %v1172_v12  ;;  %2106 = vmatpush.bf16.msra.mxu3 %v5751_v17  ;;  %v7078_v9 = vld [vmem:[#allocation7 + $0x30c] sm:$0xf0]  ;;  %v7040_v17 = vld [vmem:[#allocation7 + $0x1e4] sm:$0xf]  ;;  %v5400_v46 = vld [vmem:[#allocation7 + $0xb0] sm:$0xf0] }
 0x119   :  { %2081 = vmatpush.bf16.msra.mxu1 %v5479_v27  ;;  %v5703_v14 = vor.u32 %v7078_v9, %v5702_v5  ;;  %v5563_v24 = vor.u32 %v7040_v17, %v5560_v19  ;;  %v7104_v27 = vld [vmem:[#allocation7 + $0x3e4] sm:$0xf]  ;;  %v5528_v53 = vld [vmem:[#allocation7 + $0x1b0] sm:$0xf0] }
 0x11a   :  { %v1180_v47 = vmax.f32 %v1176_v30, 0.0  ;;  %v5416_v30 = vld [vmem:[#allocation7 + $0xd0] sm:$0xf0]  ;;  %v7000_v45 = vld [vmem:[#allocation7 + $0xa4] sm:$0xf] }
 0x11b   :  { %v1060_v63 = vpop.f32.mrf.mxu0  ;;  %2069 = vmatpush.bf16.msra.mxu0 %v5335_v39  ;;  %2095 = vmatpush.bf16.msra.mxu2 %v5591_v44  ;;  %v5419_v60 = vor.u32 %v7004_v15, %v5416_v30  ;;  %v7100_v39 = vld [vmem:[#allocation7 + $0x3c4] sm:$0xf]  ;;  %v5624_v30 = vld [vmem:[#allocation7 + $0x270] sm:$0xf0] }
 0x11c   :  { %v1073_v3 = vpop.f32.mrf.mxu1  ;;  %2107 = vmatpush.bf16.msra.mxu3 %v5735_v33  ;;  %v7766_v6 = vadd.f32 1e-05, %v1180_v47  ;;  %v5803_v44 = vor.u32 %v7100_v39, %v5800_v42  ;;  %v7032_v47 = vld [vmem:[#allocation7 + $0x1a4] sm:$0xf]  ;;  %v5480_v39 = vld [vmem:[#allocation7 + $0x150] sm:$0xf0] }
 0x11d   :  { %v1074_v16 = vadd.f32 %v1073_v3, %v1060_v63  ;;  %2082 = vmatpush.bf16.msra.mxu1 %v5463_v25  ;;  %v5574_v63 = vld [vmem:[#allocation7 + $0x200] sm:$0xf]  ;;  %v5447_v3 = vor.u32 %v7014_v62, %v5446_v61  ;;  %v7064_v55 = vld [vmem:[#allocation7 + $0x2a4] sm:$0xf]  ;;  %v5531_v61 = vor.u32 %v7032_v47, %v5528_v53  ;;  %v5608_v42 = vld [vmem:[#allocation7 + $0x250] sm:$0xf0] }
 0x11e   :  { %v5575_v8 = vor.u32 %v7046_v4, %v5574_v63  ;;  %7382 = vrsqrt.f32 %v7766_v6  ;;  %v7096_v63 = vld [vmem:[#allocation7 + $0x3a4] sm:$0xf]  ;;  %vm1212_vm8 = vweird.f32 %v7766_v6 }
 0x11f   :  { %2070 = vmatpush.bf16.msra.mxu0 %v5319_v56  ;;  %v5656_v56 = vld [vmem:[#allocation7 + $0x2b0] sm:$0xf0]  ;;  %v7028_v9 = vld [vmem:[#allocation7 + $0x184] sm:$0xf] }
 0x120   :  { %2108 = vmatpush.bf16.msra.mxu3 %v5719_v48  ;;  %2096 = vmatpush.bf16.msra.mxu2 %v5575_v8  ;;  %v5659_v62 = vor.u32 %v7064_v55, %v5656_v56  ;;  %v5384_v8 = vld [vmem:[#allocation7 + $0x90] sm:$0xf0]  ;;  %v6984_v47 = vld [vmem:[#allocation7 + $0x24] sm:$0xf] }
 0x121   :  { %2083 = vmatpush.bf16.msra.mxu1 %v5447_v3  ;;  %v7016_v55 = vld [vmem:[#allocation7 + $0x124] sm:$0xf]  ;;  %v5464_v56 = vld [vmem:[#allocation7 + $0x130] sm:$0xf0] }
 0x123   :  { %v1086_v32 = vpop.f32.mrf.mxu2  ;;  %v1062_v54 = vpop.f32.mrf.mxu0 }
 0x124   :  { %v1087_v34 = vadd.f32 %v1086_v32, %v1074_v16  ;;  %v1099_v58 = vpop.f32.mrf.mxu3  ;;  %v1075_v38 = vpop.f32.mrf.mxu1  ;;  %v5432_v16 = vld [vmem:[#allocation7 + $0xf0] sm:$0xf0]  ;;  %2109 = vmatpush.bf16.msra.mxu3 %v5703_v14  ;;  %2141 = vmatpush.bf16.msrb.mxu2 %v5691_v28  ;;  %v7092_v14 = vld [vmem:[#allocation7 + $0x384] sm:$0xf] }
 0x125   :  { %v5435_v18 = vor.u32 %v7008_v10, %v5432_v16  ;;  %2128 = vmatpush.bf16.msrb.mxu1 %v5563_v24  ;;  %v5544_v54 = vld [vmem:[#allocation7 + $0x1d0] sm:$0xf0]  ;;  %v7772_v3 = vpop.eup %7382  ;;  %v7024_v24 = vld [vmem:[#allocation7 + $0x164] sm:$0xf] }
 0x126   :  { %v7760_v43 = vadd.f32 %v1099_v58, %v1087_v34  ;;  %v5819_v34 = vor.u32 %v7104_v27, %v5816_v29  ;;  %v7036_v58 = vld [vmem:[#allocation7 + $0x1c4] sm:$0xf]  ;;  %v5672_v38 = vld [vmem:[#allocation7 + $0x2d0] sm:$0xf0]  ;;  %v1207_v19 = vmul.f32 %v7772_v3, %v7766_v6  ;;  %vm1213_vm9 = vweird.f32 %v7772_v3 }
 0x127   :  { %2115 = vmatpush.bf16.msrb.mxu0 %v5435_v18  ;;  %v5547_v36 = vor.u32 %v7036_v58, %v5544_v54  ;;  %v5675_v25 = vor.u32 %v7068_v37, %v5672_v38  ;;  %v5512_v10 = vld [vmem:[#allocation7 + $0x190] sm:$0xf0]  ;;  %v7056_v29 = vld [vmem:[#allocation7 + $0x264] sm:$0xf]  ;;  %vm1214_vm11 = vmor %vm1212_vm8, %vm1213_vm9 }
 0x128   :  { %v1121_v50 = vrot.slane %v7760_v43, 4  ;;  %v1141_v52 = vmul.f32 %v7760_v43, %v7760_v43  ;;  %2154 = vmatpush.bf16.msrb.mxu3 %v5819_v34  ;;  %v5515_v17 = vor.u32 %v7028_v9, %v5512_v10  ;;  %v5768_v18 = vld [vmem:[#allocation7 + $0x390] sm:$0xf0]  ;;  %v6988_v54 = vld [vmem:[#allocation7 + $0x44] sm:$0xf]  ;;  %v5627_v37 = vor.u32 %v7056_v29, %v5624_v30 }
 0x129   :  { %2129 = vmatpush.bf16.msrb.mxu1 %v5547_v36  ;;  %2142 = vmatpush.bf16.msrb.mxu2 %v5675_v25  ;;  %v5771_v27 = vor.u32 %v7092_v14, %v5768_v18  ;;  %v5496_v28 = vld [vmem:[#allocation7 + $0x170] sm:$0xf0]  ;;  %v1208_v36 = vmul.f32 %v7772_v3, %v1207_v19  ;;  %v7020_v38 = vld [vmem:[#allocation7 + $0x144] sm:$0xf] }
 0x12a   :  { %v1122_v1 = vadd.f32 %v1121_v50, %v7760_v43  ;;  %v1160_v2 = vrot.slane %v1141_v52, 4  ;;  %v5499_v58 = vor.u32 %v7024_v24, %v5496_v28  ;;  %v5320_v9 = vld [vmem:[#allocation7 + $0x10] sm:$0xf0] }
 0x12b   :  { %v1088_v7 = vpop.f32.mrf.mxu2  ;;  %2116 = vmatpush.bf16.msrb.mxu0 %v5419_v60  ;;  %v5352_v60 = vld [vmem:[#allocation7 + $0x50] sm:$0xf0] }
 0x12c   :  { %v1123_v11 = vrot.slane %v1122_v1, 2  ;;  %v1161_v12 = vadd.f32 %v1160_v2, %v1141_v52  ;;  %v1101_v13 = vpop.f32.mrf.mxu3  ;;  %v5403_v52 = vor.u32 %v7000_v45, %v5400_v46  ;;  %v6996_v2 = vld [vmem:[#allocation7 + $0x84] sm:$0xf]  ;;  %2155 = vmatpush.bf16.msrb.mxu3 %v5803_v44  ;;  %v5355_v25 = vor.u32 %v6988_v54, %v5352_v60  ;;  %v5736_v45 = vld [vmem:[#allocation7 + $0x350] sm:$0xf0] }
 0x12d   :  { %v5640_v13 = vld [vmem:[#allocation7 + $0x290] sm:$0xf0]  ;;  %2130 = vmatpush.bf16.msrb.mxu1 %v5531_v61  ;;  %2143 = vmatpush.bf16.msrb.mxu2 %v5659_v62  ;;  %v7084_v44 = vld [vmem:[#allocation7 + $0x344] sm:$0xf]  ;;  %v5483_v46 = vor.u32 %v7020_v38, %v5480_v39 }
 0x12e   :  { %v1124_v22 = vadd.f32 %v1123_v11, %v1122_v1  ;;  %v1162_v23 = vrot.slane %v1161_v12, 2  ;;  %v5784_v1 = vld [vmem:[#allocation7 + $0x3b0] sm:$0xf0]  ;;  %v5387_v11 = vor.u32 %v6996_v2, %v5384_v8  ;;  %v5739_v61 = vor.u32 %v7084_v44, %v5736_v45  ;;  %v7048_v62 = vld [vmem:[#allocation7 + $0x224] sm:$0xf] }
 0x12f   :  { %v5787_v7 = vor.u32 %v7096_v63, %v5784_v1  ;;  %2117 = vmatpush.bf16.msrb.mxu0 %v5403_v52  ;;  %v1209_v52 = vmul.f32 0.5, %v1208_v36  ;;  %v5592_v63 = vld [vmem:[#allocation7 + $0x230] sm:$0xf0]  ;;  %v7080_v2 = vld [vmem:[#allocation7 + $0x324] sm:$0xf] }
 0x130   :  { %v1125_v32 = vrot.slane %v1124_v22, 1  ;;  %v1163_v33 = vadd.f32 %v1162_v23, %v1161_v12  ;;  %v7060_v12 = vld [vmem:[#allocation7 + $0x284] sm:$0xf]  ;;  %v5368_v23 = vld [vmem:[#allocation7 + $0x70] sm:$0xf0] }
 0x131   :  { %v5643_v21 = vor.u32 %v7060_v12, %v5640_v13  ;;  %2156 = vmatpush.bf16.msrb.mxu3 %v5787_v7  ;;  %2131 = vmatpush.bf16.msrb.mxu1 %v5515_v17  ;;  %v5467_v7 = vor.u32 %v7016_v55, %v5464_v56  ;;  %v6980_v8 = vld [vmem:[#allocation7 + $0x4] sm:$0xf]  ;;  %v1210_v10 = vsub.f32 1.5, %v1209_v52  ;;  %v5595_v12 = vor.u32 %v7048_v62, %v5592_v63  ;;  %v5448_v14 = vld [vmem:[#allocation7 + $0x110] sm:$0xf0] }
 0x132   :  { %v1126_v40 = vadd.f32 %v1125_v32, %v1124_v22  ;;  %v1164_v41 = vrot.slane %v1163_v33, 1  ;;  %v6992_v22 = vld [vmem:[#allocation7 + $0x64] sm:$0xf]  ;;  %v5576_v18 = vld [vmem:[#allocation7 + $0x210] sm:$0xf0] }
 0x133   :  { %2118 = vmatpush.bf16.msrb.mxu0 %v5387_v11  ;;  %v5371_v15 = vor.u32 %v6992_v22, %v5368_v23  ;;  %v7088_v32 = vld [vmem:[#allocation7 + $0x364] sm:$0xf]  ;;  %2144 = vmatpush.bf16.msrb.mxu2 %v5643_v21  ;;  %v5323_v21 = vor.u32 %v6980_v8, %v5320_v9  ;;  %v5704_v23 = vld [vmem:[#allocation7 + $0x310] sm:$0xf0]  ;;  %v5694_v8 = vld [vmem:[#allocation7 + $0x2e8] sm:$0xf] }
 0x134   :  { %v7770_v48 = vmul.f32 %v7695_v49, %v1126_v40  ;;  %v1165_v50 = vadd.f32 %v1164_v41, %v1163_v33  ;;  %v5752_v33 = vld [vmem:[#allocation7 + $0x370] sm:$0xf0]  ;;  %v7052_v41 = vld [vmem:[#allocation7 + $0x244] sm:$0xf]  ;;  %v7075_v9 = vld [vmem:[#allocation7 + $0x2f4] sm:$0xf0] }
 0x135   :  { %2157 = vmatpush.bf16.msrb.mxu3 %v5771_v27  ;;  %v5755_v40 = vor.u32 %v7088_v32, %v5752_v33  ;;  %2132 = vmatpush.bf16.msrb.mxu1 %v5499_v58  ;;  %v5611_v53 = vor.u32 %v7052_v41, %v5608_v42  ;;  %v7012_v13 = vld [vmem:[#allocation7 + $0x104] sm:$0xf]  ;;  %v120_v54 = vld [vmem:[#allocation11] ss:$8 sm:$0xf] }
 0x136   :  { %v1169_v4 = vmul.f32 %v1165_v50, %v7695_v49  ;;  %v1173_v5 = vmul.f32 %v7770_v48, %v7770_v48  ;;  %v5336_v50 = vld [vmem:[#allocation7 + $0x30] sm:$0xf0]  ;;  %v7044_v17 = vld [vmem:[#allocation7 + $0x204] sm:$0xf]  ;;  %v5451_v24 = vor.u32 %v7012_v13, %v5448_v14 }
 0x137   :  { %2119 = vmatpush.bf16.msrb.mxu0 %v5371_v15  ;;  %2145 = vmatpush.bf16.msrb.mxu2 %v5627_v37  ;;  %v5339_v1 = vor.u32 %v6984_v47, %v5336_v50  ;;  %v7076_v22 = vld [vmem:[#allocation7 + $0x304] sm:$0xf]  ;;  %v5579_v28 = vor.u32 %v7044_v17, %v5576_v18 }
 0x138   :  { %v1177_v16 = vsub.f32 %v1169_v4, %v1173_v5  ;;  %v5720_v4 = vld [vmem:[#allocation7 + $0x330] sm:$0xf0]  ;;  %v5707_v29 = vor.u32 %v7076_v22, %v5704_v23  ;;  %v5422_v22 = vld [vmem:[#allocation7 + $0xc8] sm:$0xf]  ;;  %v7007_v23 = vld [vmem:[#allocation7 + $0xd4] sm:$0xf0] }
 0x139   :  { %2158 = vmatpush.bf16.msrb.mxu3 %v5755_v40  ;;  %2133 = vmatpush.bf16.msrb.mxu1 %v5483_v46  ;;  %v122_v52 = vld [vmem:[#allocation11 + $0x4] ss:$8 sm:$0xf] }
 0x13a   :  { %v1181_v26 = vmax.f32 %v1177_v16, 0.0  ;;  %v5723_v16 = vor.u32 %v7080_v2, %v5720_v4  ;;  %v7011_v4 = vld [vmem:[#allocation7 + $0xf4] sm:$0xf0] }
 0x13b   :  { %2120 = vmatpush.bf16.msrb.mxu0 %v5355_v25  ;;  %2146 = vmatpush.bf16.msrb.mxu2 %v5611_v53 }
 0x13c   :  { %v7779_v34 = vadd.f32 1e-05, %v1181_v26  ;;  %v1211_v26 = vmul.f32 %v7772_v3, %v1210_v10  ;;  %v5822_v10 = vld [vmem:[#allocation7 + $0x3e8] sm:$0xf] }
 0x13d   :  { %2159 = vmatpush.bf16.msrb.mxu3 %v5739_v61  ;;  %2134 = vmatpush.bf16.msrb.mxu1 %v5467_v7  ;;  %v7043_v7 = vld [vmem:[#allocation7 + $0x1f4] sm:$0xf0] }
 0x13e   :  { %7384 = vrsqrt.f32 %v7779_v34  ;;  %v1215_v30 = vsel %vm1214_vm11, %v7772_v3, %v1211_v26  ;;  %vm1222_vm12 = vweird.f32 %v7779_v34 }
 0x13f   :  { %2121 = vmatpush.bf16.msrb.mxu0 %v5339_v1  ;;  %2147 = vmatpush.bf16.msrb.mxu2 %v5595_v12  ;;  %v1231_v33 = vrot.slane %v1215_v30, 6  ;;  %v5806_v30 = vld [vmem:[#allocation7 + $0x3c8] sm:$0xf] }
 0x141   :  { %2160 = vmatpush.bf16.msrb.mxu3 %v5723_v16  ;;  %2135 = vmatpush.bf16.msrb.mxu1 %v5451_v24  ;;  %v5695_v24 = vor.u32 %v7075_v9, %v5694_v8  ;;  %v6991_v8 = vld [vmem:[#allocation7 + $0x54] sm:$0xf0] }
 0x143   :  { %2122 = vmatpush.bf16.msrb.mxu0 %v5323_v21  ;;  %2148 = vmatpush.bf16.msrb.mxu2 %v5579_v28  ;;  %v7039_v28 = vld [vmem:[#allocation7 + $0x1d4] sm:$0xf0] }
 0x144   :  { %v7385_v5 = vpop.eup %7384 }
 0x145   :  { %v1217_v11 = vmul.f32 %v7385_v5, %v7779_v34  ;;  %vm1223_vm10 = vweird.f32 %v7385_v5  ;;  %2161 = vmatpush.bf16.msrb.mxu3 %v5707_v29  ;;  %v5678_v29 = vld [vmem:[#allocation7 + $0x2c8] sm:$0xf] }
 0x146   :  { %vm1224_vm13 = vmor %vm1222_vm12, %vm1223_vm10 }
 0x147   :  { %v1218_v19 = vmul.f32 %v7385_v5, %v1217_v11 }
 0x149   :  { %v1219_v27 = vmul.f32 0.5, %v1218_v19 }
 0x14b   :  { %v1220_v15 = vsub.f32 1.5, %v1219_v27  ;;  %v5550_v27 = vld [vmem:[#allocation7 + $0x1c8] sm:$0xf] }
 0x14d   :  { %v1221_v32 = vmul.f32 %v7385_v5, %v1220_v15  ;;  %v7071_v15 = vld [vmem:[#allocation7 + $0x2d4] sm:$0xf0] }
 0x14f   :  { %v1225_v6 = vsel %vm1224_vm13, %v7385_v5, %v1221_v32  ;;  %v5566_v5 = vld [vmem:[#allocation7 + $0x1e8] sm:$0xf]  ;;  %v7103_v32 = vld [vmem:[#allocation7 + $0x3d4] sm:$0xf0] }
 0x150   :  { %v1232_v58 = vrot.slane %v1225_v6, 5  ;;  %v5567_v16 = vor.u32 %v7043_v7, %v5566_v5  ;;  %v5423_v6 = vor.u32 %v7007_v23, %v5422_v22  ;;  %v5358_v7 = vld [vmem:[#allocation7 + $0x48] sm:$0xf] }
 0x151   :  { %v5342_v23 = vld [vmem:[#allocation7 + $0x28] sm:$0xf] }
 0x152   :  { %v1236_v60 = vsel %vm1235_vm14, %v1231_v33, %v1232_v58  ;;  %v5551_v33 = vor.u32 %v7039_v28, %v5550_v27  ;;  %v5406_v58 = vld [vmem:[#allocation7 + $0xa8] sm:$0xf] }
 0x153   :  { %v1238_v36 = vsel %vm1237_vm15, %v7752_v57, %v1236_v60  ;;  %v5679_v60 = vor.u32 %v7071_v15, %v5678_v29  ;;  %v5470_v28 = vld [vmem:[#allocation7 + $0x128] sm:$0xf]  ;;  %v7019_v29 = vld [vmem:[#allocation7 + $0x134] sm:$0xf0] }
 0x154   :  { %v1240_v37 = vmul.f32 %v1238_v36, %v120_v54  ;;  %v7003_v54 = vld [vmem:[#allocation7 + $0xb4] sm:$0xf0]  ;;  %v5807_v36 = vor.u32 %v7103_v32, %v5806_v30  ;;  %v5598_v15 = vld [vmem:[#allocation7 + $0x228] sm:$0xf] }
 0x155   :  { %v7051_v30 = vld [vmem:[#allocation7 + $0x234] sm:$0xf0]  ;;  %v5726_v32 = vld [vmem:[#allocation7 + $0x328] sm:$0xf] }
 0x156   :  { %v1244_v38 = vperm.slane %v1240_v37, 2  ;;  %v1245_v3 = vperm.slane %v1240_v37, 3  ;;  %v1242_v39 = vperm.slane %v1240_v37, 0  ;;  %v1243_v40 = vperm.slane %v1240_v37, 1  ;;  %v5534_v37 = vld [vmem:[#allocation7 + $0x1a8] sm:$0xf] }
 0x158   :  { %v1252_v34 = vmul.f32 %v1244_v38, %v7755_v59  ;;  %v1253_v41 = vmul.f32 %v1245_v3, %v7770_v48  ;;  %v1250_v42 = vmul.f32 %v1242_v39, %v7698_v51  ;;  %v1251_v25 = vmul.f32 %v1243_v40, %v7713_v20 }
 0x159   :  { %v1266_v44 = vmul.f32 %v1242_v39, %v7689_v31  ;;  %v1267_v45 = vmul.f32 %v1243_v40, %v7703_v0  ;;  %v1269_v48 = vmul.f32 %v1245_v3, %v7760_v43  ;;  %v1268_v51 = vmul.f32 %v1244_v38, %v7723_v35  ;;  %v5438_v0 = vld [vmem:[#allocation7 + $0xe8] sm:$0xf]  ;;  %v7107_v35 = vld [vmem:[#allocation7 + $0x3f4] sm:$0xf0] }
 0x15a   :  { %v1259_v46 = vrot.slane %v1252_v34, 6  ;;  %v1260_v47 = vrot.slane %v1253_v41, 5  ;;  %v1258_v57 = vrot.slane %v1251_v25, 7  ;;  %v5439_v14 = vor.u32 %v7011_v4, %v5438_v0  ;;  %v7035_v38 = vld [vmem:[#allocation7 + $0x1b4] sm:$0xf0] }
 0x15b   :  { %v5823_v26 = vor.u32 %v7107_v35, %v5822_v10  ;;  %v5662_v3 = vld [vmem:[#allocation7 + $0x2a8] sm:$0xf]  ;;  %v7067_v39 = vld [vmem:[#allocation7 + $0x2b4] sm:$0xf0]  ;;  %v5407_v41 = vor.u32 %v7003_v54, %v5406_v58  ;;  %v5471_v54 = vor.u32 %v7019_v29, %v5470_v28  ;;  %v7029_v29 = vld [vmem:[#allocation7 + $0x18c] sm:$0xf] }
 0x15c   :  { %v1262_v50 = vsel %vm1235_vm14, %v1259_v46, %v1260_v47  ;;  %v1261_v53 = vsel %vm1233_vm7, %v1250_v42, %v1258_v57  ;;  %v5790_v40 = vld [vmem:[#allocation7 + $0x3a8] sm:$0xf]  ;;  %v7099_v34 = vld [vmem:[#allocation7 + $0x3b4] sm:$0xf0]  ;;  %v5535_v42 = vor.u32 %v7035_v38, %v5534_v37  ;;  %v5599_v38 = vor.u32 %v7051_v30, %v5598_v15  ;;  %v5520_v15 = vld [vmem:[#allocation7 + $0x198] sm:$0xf0] }
 0x15d   :  { %v1263_v59 = vsel %vm1237_vm15, %v1261_v53, %v1262_v50  ;;  %v5390_v25 = vld [vmem:[#allocation7 + $0x88] sm:$0xf]  ;;  %v5791_v46 = vor.u32 %v7099_v34, %v5790_v40  ;;  %v7031_v57 = vld [vmem:[#allocation7 + $0x194] sm:$0xf0]  ;;  %v7061_v30 = vld [vmem:[#allocation7 + $0x28c] sm:$0xf] }
 0x15e   :  { %v1265_v55 = vsub.f32 %v122_v52, %v1263_v59  ;;  %v5518_v47 = vld [vmem:[#allocation7 + $0x188] sm:$0xf]  ;;  %v7063_v52 = vld [vmem:[#allocation7 + $0x294] sm:$0xf0] }
 0x15f   :  { %v5646_v50 = vld [vmem:[#allocation7 + $0x288] sm:$0xf]  ;;  %v7095_v59 = vld [vmem:[#allocation7 + $0x394] sm:$0xf0] }
 0x160   :  { %v1271_v20 = vperm.slane %v1265_v55, 0  ;;  %v1272_v56 = vperm.slane %v1265_v55, 1  ;;  %v1273_v31 = vperm.slane %v1265_v55, 2  ;;  %v1274_v61 = vperm.slane %v1265_v55, 3  ;;  %v5774_v53 = vld [vmem:[#allocation7 + $0x388] sm:$0xf] }
 0x161   :  { %v7027_v0 = vld [vmem:[#allocation7 + $0x174] sm:$0xf0]  ;;  %v5742_v35 = vld [vmem:[#allocation7 + $0x348] sm:$0xf] }
 0x162   :  { %v1279_v62 = vadd.f32 %v1271_v20, %v1266_v44  ;;  %v1280_v63 = vadd.f32 %v1272_v56, %v1267_v45  ;;  %v1281_v1 = vadd.f32 %v1273_v31, %v1268_v51  ;;  %v1282_v2 = vadd.f32 %v1274_v61, %v1269_v48  ;;  %v6999_v44 = vld [vmem:[#allocation7 + $0x94] sm:$0xf0]  ;;  %v5374_v51 = vld [vmem:[#allocation7 + $0x68] sm:$0xf] }
 0x163   :  { %v5663_v45 = vor.u32 %v7067_v39, %v5662_v3  ;;  %v5391_v55 = vor.u32 %v6999_v44, %v5390_v25  ;;  %v5519_v48 = vor.u32 %v7031_v57, %v5518_v47  ;;  %v6995_v20 = vld [vmem:[#allocation7 + $0x74] sm:$0xf0]  ;;  %v5647_v56 = vor.u32 %v7063_v52, %v5646_v50  ;;  %v5502_v61 = vld [vmem:[#allocation7 + $0x168] sm:$0xf]  ;;  %v5440_v25 = vld [vmem:[#allocation7 + $0xf8] sm:$0xf0] }
 0x164   :  { %v1283_v11 = vmax.f32 %v1279_v62, 0.0  ;;  %v1284_v12 = vmax.f32 %v1280_v63, 0.0  ;;  %v1285_v43 = vmax.f32 %v1281_v1, 0.0  ;;  %v1286_v13 = vmax.f32 %v1282_v2, 0.0  ;;  %v5630_v62 = vld [vmem:[#allocation7 + $0x268] sm:$0xf] }
 0x165   :  { %v5775_v31 = vor.u32 %v7095_v59, %v5774_v53  ;;  %v7059_v63 = vld [vmem:[#allocation7 + $0x274] sm:$0xf0]  ;;  %v5758_v1 = vld [vmem:[#allocation7 + $0x368] sm:$0xf]  ;;  %v5375_v4 = vor.u32 %v6995_v20, %v5374_v51  ;;  %v5503_v5 = vor.u32 %v7027_v0, %v5502_v61  ;;  %v7041_v44 = vld [vmem:[#allocation7 + $0x1ec] sm:$0xf] }
 0x166   :  { %v7803_v17 = vpack.c.bf16 %v1283_v11, %v1283_v11  ;;  %v7805_v18 = vpack.c.bf16 %v1284_v12, %v1284_v12  ;;  %v7807_v19 = vpack.c.bf16 %v1285_v43, %v1285_v43  ;;  %v7809_v21 = vpack.c.bf16 %v1286_v13, %v1286_v13  ;;  %v7091_v2 = vld [vmem:[#allocation7 + $0x374] sm:$0xf0]  ;;  %v5486_v11 = vld [vmem:[#allocation7 + $0x148] sm:$0xf]  ;;  %v5696_v50 = vld [vmem:[#allocation7 + $0x2f8] sm:$0xf0] }
 0x167   :  { %v5631_v9 = vor.u32 %v7059_v63, %v5630_v62  ;;  %v5759_v10 = vor.u32 %v7091_v2, %v5758_v1  ;;  %v7023_v12 = vld [vmem:[#allocation7 + $0x154] sm:$0xf0]  ;;  %v5614_v43 = vld [vmem:[#allocation7 + $0x248] sm:$0xf]  ;;  %v7105_v52 = vld [vmem:[#allocation7 + $0x3ec] sm:$0xf] }
 0x168   :  { %2071 = vmatmul.bf16.vlgmr.msra.gmra.mxu0 %v7803_v17  ;;  %2084 = vmatmul.bf16.vlgmr.msra.gmra.mxu1 %v7805_v18  ;;  %v7055_v13 = vld [vmem:[#allocation7 + $0x254] sm:$0xf0]  ;;  %v5487_v22 = vor.u32 %v7023_v12, %v5486_v11  ;;  %v5582_v39 = vld [vmem:[#allocation7 + $0x208] sm:$0xf]  ;;  %v5824_v53 = vld [vmem:[#allocation7 + $0x3f8] sm:$0xf0] }
 0x169   :  { %2097 = vmatmul.bf16.vlgmr.msra.gmra.mxu2 %v7807_v19  ;;  %2110 = vmatmul.bf16.vlgmr.msra.gmra.mxu3 %v7809_v21  ;;  %v7015_v37 = vld [vmem:[#allocation7 + $0x114] sm:$0xf0]  ;;  %v5710_v34 = vld [vmem:[#allocation7 + $0x308] sm:$0xf]  ;;  %v7005_v20 = vld [vmem:[#allocation7 + $0xcc] sm:$0xf]  ;;  %v5827_v61 = vor.u32 %v7105_v52, %v5824_v53 }
 0x16a   :  { %2167 = vmatpush.bf16.msra.mxu0 %v5439_v14  ;;  %2180 = vmatpush.bf16.msra.mxu1 %v5567_v16  ;;  %v7087_v14 = vld [vmem:[#allocation7 + $0x354] sm:$0xf0]  ;;  %v5359_v16 = vor.u32 %v6991_v8, %v5358_v7  ;;  %v7037_v0 = vld [vmem:[#allocation7 + $0x1cc] sm:$0xf]  ;;  %v5552_v62 = vld [vmem:[#allocation7 + $0x1d8] sm:$0xf0] }
 0x16b   :  { %2193 = vmatpush.bf16.msra.mxu2 %v5695_v24  ;;  %2206 = vmatpush.bf16.msra.mxu3 %v5823_v26  ;;  %v6987_v24 = vld [vmem:[#allocation7 + $0x34] sm:$0xf0]  ;;  %v5615_v26 = vor.u32 %v7055_v13, %v5614_v43  ;;  %v5743_v27 = vor.u32 %v7087_v14, %v5742_v35  ;;  %v7069_v63 = vld [vmem:[#allocation7 + $0x2cc] sm:$0xf]  ;;  %v5680_v1 = vld [vmem:[#allocation7 + $0x2d8] sm:$0xf0]  ;;  %v5555_v7 = vor.u32 %v7037_v0, %v5552_v62 }
 0x16c   :  { %v5343_v58 = vor.u32 %v6987_v24, %v5342_v23  ;;  %v7047_v40 = vld [vmem:[#allocation7 + $0x214] sm:$0xf0]  ;;  %v7101_v2 = vld [vmem:[#allocation7 + $0x3cc] sm:$0xf]  ;;  %v5536_v43 = vld [vmem:[#allocation7 + $0x1b8] sm:$0xf0] }
 0x16d   :  { %v5583_v59 = vor.u32 %v7047_v40, %v5582_v39  ;;  %v7001_v8 = vld [vmem:[#allocation7 + $0xac] sm:$0xf]  ;;  %v5664_v35 = vld [vmem:[#allocation7 + $0x2b8] sm:$0xf0] }
 0x16e   :  { %2168 = vmatpush.bf16.msra.mxu0 %v5423_v6  ;;  %2181 = vmatpush.bf16.msra.mxu1 %v5551_v33  ;;  %v7083_v6 = vld [vmem:[#allocation7 + $0x334] sm:$0xf0]  ;;  %v5326_v33 = vld [vmem:[#allocation7 + $0x8] sm:$0xf]  ;;  %v7033_v12 = vld [vmem:[#allocation7 + $0x1ac] sm:$0xf] }
 0x16f   :  { %2194 = vmatpush.bf16.msra.mxu2 %v5679_v60  ;;  %2207 = vmatpush.bf16.msra.mxu3 %v5807_v36  ;;  %v6983_v60 = vld [vmem:[#allocation7 + $0x14] sm:$0xf0]  ;;  %v5454_v36 = vld [vmem:[#allocation7 + $0x108] sm:$0xf]  ;;  %v5727_v3 = vor.u32 %v7083_v6, %v5726_v32  ;;  %v7065_v13 = vld [vmem:[#allocation7 + $0x2ac] sm:$0xf]  ;;  %v5539_v23 = vor.u32 %v7033_v12, %v5536_v43 }
 0x170   :  { %v5327_v47 = vor.u32 %v6983_v60, %v5326_v33  ;;  %v5455_v57 = vor.u32 %v7015_v37, %v5454_v36  ;;  %v7097_v14 = vld [vmem:[#allocation7 + $0x3ac] sm:$0xf]  ;;  %v5648_v32 = vld [vmem:[#allocation7 + $0x298] sm:$0xf0] }
 0x171   :  { %v6997_v24 = vld [vmem:[#allocation7 + $0x8c] sm:$0xf]  ;;  %v5776_v33 = vld [vmem:[#allocation7 + $0x398] sm:$0xf0]  ;;  %v5651_v37 = vor.u32 %v7061_v30, %v5648_v32 }
 0x172   :  { %2169 = vmatpush.bf16.msra.mxu0 %v5407_v41  ;;  %2182 = vmatpush.bf16.msra.mxu1 %v5535_v42  ;;  %v7079_v41 = vld [vmem:[#allocation7 + $0x314] sm:$0xf0]  ;;  %v7009_v42 = vld [vmem:[#allocation7 + $0xec] sm:$0xf]  ;;  %v5376_v36 = vld [vmem:[#allocation7 + $0x78] sm:$0xf0] }
 0x173   :  { %2195 = vmatpush.bf16.msra.mxu2 %v5663_v45  ;;  %2208 = vmatpush.bf16.msra.mxu3 %v5791_v46  ;;  %v5568_v45 = vld [vmem:[#allocation7 + $0x1f8] sm:$0xf0]  ;;  %v7073_v46 = vld [vmem:[#allocation7 + $0x2ec] sm:$0xf] }
 0x174   :  { %v5571_v51 = vor.u32 %v7041_v44, %v5568_v45  ;;  %v7093_v6 = vld [vmem:[#allocation7 + $0x38c] sm:$0xf]  ;;  %v5504_v39 = vld [vmem:[#allocation7 + $0x178] sm:$0xf0] }
 0x175   :  { %v6993_v60 = vld [vmem:[#allocation7 + $0x6c] sm:$0xf]  ;;  %v5488_v52 = vld [vmem:[#allocation7 + $0x158] sm:$0xf0] }
 0x176   :  { %2170 = vmatpush.bf16.msra.mxu0 %v5391_v55  ;;  %2183 = vmatpush.bf16.msra.mxu1 %v5519_v48  ;;  %v5711_v55 = vor.u32 %v7079_v41, %v5710_v34  ;;  %v5443_v48 = vor.u32 %v7009_v42, %v5440_v25  ;;  %v7057_v40 = vld [vmem:[#allocation7 + $0x26c] sm:$0xf]  ;;  %v5632_v34 = vld [vmem:[#allocation7 + $0x278] sm:$0xf0]  ;;  %v5379_v25 = vor.u32 %v6993_v60, %v5376_v36 }
 0x177   :  { %2196 = vmatpush.bf16.msra.mxu2 %v5647_v56  ;;  %2209 = vmatpush.bf16.msra.mxu3 %v5775_v31  ;;  %v5424_v56 = vld [vmem:[#allocation7 + $0xd8] sm:$0xf0]  ;;  %v5699_v31 = vor.u32 %v7073_v46, %v5696_v50  ;;  %v7089_v41 = vld [vmem:[#allocation7 + $0x36c] sm:$0xf] }
 0x178   :  { %2123 = vmatmul.bf16.vlgmr.msrb.gmra.mxu0 %v7803_v17  ;;  %2136 = vmatmul.bf16.vlgmr.msrb.gmra.mxu1 %v7805_v18  ;;  %v5760_v42 = vld [vmem:[#allocation7 + $0x378] sm:$0xf0]  ;;  %v6989_v45 = vld [vmem:[#allocation7 + $0x4c] sm:$0xf] }
 0x179   :  { %2149 = vmatmul.bf16.vlgmr.msrb.gmra.mxu2 %v7807_v19  ;;  %2162 = vmatmul.bf16.vlgmr.msrb.gmra.mxu3 %v7809_v21  ;;  %v5360_v46 = vld [vmem:[#allocation7 + $0x58] sm:$0xf0]  ;;  %v7021_v50 = vld [vmem:[#allocation7 + $0x14c] sm:$0xf] }
 0x17a   :  { %2171 = vmatpush.bf16.msra.mxu0 %v5375_v4  ;;  %2184 = vmatpush.bf16.msra.mxu1 %v5503_v5  ;;  %v5808_v4 = vld [vmem:[#allocation7 + $0x3d8] sm:$0xf0]  ;;  %v5427_v5 = vor.u32 %v7005_v20, %v5424_v56  ;;  %v7053_v53 = vld [vmem:[#allocation7 + $0x24c] sm:$0xf]  ;;  %v5491_v20 = vor.u32 %v7021_v50, %v5488_v52 }
 0x17b   :  { %2197 = vmatpush.bf16.msra.mxu2 %v5631_v9  ;;  %2210 = vmatpush.bf16.msra.mxu3 %v5759_v10  ;;  %v5408_v9 = vld [vmem:[#allocation7 + $0xb8] sm:$0xf0]  ;;  %v5683_v10 = vor.u32 %v7069_v63, %v5680_v1  ;;  %v5811_v11 = vor.u32 %v7101_v2, %v5808_v4  ;;  %v6985_v56 = vld [vmem:[#allocation7 + $0x2c] sm:$0xf] }
 0x17c   :  { %v7017_v62 = vld [vmem:[#allocation7 + $0x12c] sm:$0xf]  ;;  %v5472_v63 = vld [vmem:[#allocation7 + $0x138] sm:$0xf0] }
 0x17d   :  { %v7049_v1 = vld [vmem:[#allocation7 + $0x22c] sm:$0xf]  ;;  %v5600_v2 = vld [vmem:[#allocation7 + $0x238] sm:$0xf0] }
 0x17e   :  { %2172 = vmatpush.bf16.msra.mxu0 %v5359_v16  ;;  %2185 = vmatpush.bf16.msra.mxu1 %v5487_v22  ;;  %v5792_v16 = vld [vmem:[#allocation7 + $0x3b8] sm:$0xf0]  ;;  %v5411_v22 = vor.u32 %v7001_v8, %v5408_v9  ;;  %v7081_v4 = vld [vmem:[#allocation7 + $0x32c] sm:$0xf]  ;;  %v5475_v8 = vor.u32 %v7017_v62, %v5472_v63 }
 0x17f   :  { %2198 = vmatpush.bf16.msra.mxu2 %v5615_v26  ;;  %2211 = vmatpush.bf16.msra.mxu3 %v5743_v27  ;;  %v5392_v26 = vld [vmem:[#allocation7 + $0x98] sm:$0xf0]  ;;  %v5667_v27 = vor.u32 %v7065_v13, %v5664_v35  ;;  %v5795_v28 = vor.u32 %v7097_v14, %v5792_v16  ;;  %v6981_v9 = vld [vmem:[#allocation7 + $0xc] sm:$0xf] }
 0x180   :  { %v7013_v43 = vld [vmem:[#allocation7 + $0x10c] sm:$0xf]  ;;  %v5456_v13 = vld [vmem:[#allocation7 + $0x118] sm:$0xf0] }
 0x181   :  { %v7045_v35 = vld [vmem:[#allocation7 + $0x20c] sm:$0xf]  ;;  %v5584_v14 = vld [vmem:[#allocation7 + $0x218] sm:$0xf0] }
 0x182   :  { %2173 = vmatpush.bf16.msra.mxu0 %v5343_v58  ;;  %2186 = vmatpush.bf16.msra.mxu1 %v5471_v54  ;;  %v5395_v58 = vor.u32 %v6997_v24, %v5392_v26  ;;  %v5523_v54 = vor.u32 %v7029_v29, %v5520_v15  ;;  %v7077_v16 = vld [vmem:[#allocation7 + $0x30c] sm:$0xf]  ;;  %v5459_v24 = vor.u32 %v7013_v43, %v5456_v13 }
 0x183   :  { %2199 = vmatpush.bf16.msra.mxu2 %v5599_v38  ;;  %2212 = vmatpush.bf16.msra.mxu3 %v5727_v3  ;;  %v5779_v38 = vor.u32 %v7093_v6, %v5776_v33  ;;  %v7025_v3 = vld [vmem:[#allocation7 + $0x16c] sm:$0xf]  ;;  %v5587_v26 = vor.u32 %v7045_v35, %v5584_v14  ;;  %v6070_v14 = vld [vmem:[#allocation8 + $0x1e0] sm:$0xf] }
 0x184   :  { %v5507_v44 = vor.u32 %v7025_v3, %v5504_v39 }
 0x186   :  { %2174 = vmatpush.bf16.msra.mxu0 %v5327_v47  ;;  %2187 = vmatpush.bf16.msra.mxu1 %v5455_v57  ;;  %v5635_v47 = vor.u32 %v7057_v40, %v5632_v34  ;;  %v5763_v57 = vor.u32 %v7089_v41, %v5760_v42 }
 0x187   :  { %2200 = vmatpush.bf16.msra.mxu2 %v5583_v59  ;;  %2213 = vmatpush.bf16.msra.mxu3 %v5711_v55  ;;  %v5616_v59 = vld [vmem:[#allocation7 + $0x258] sm:$0xf0]  ;;  %v7085_v55 = vld [vmem:[#allocation7 + $0x34c] sm:$0xf] }
 0x189   :  { %2175 = vmatmul.bf16.vlgmr.msra.gmra.mxu0 %v7803_v17  ;;  %2188 = vmatmul.bf16.vlgmr.msra.gmra.mxu1 %v7805_v18 }
 0x18a   :  { %2219 = vmatpush.bf16.msrb.mxu0 %v5443_v48  ;;  %2232 = vmatpush.bf16.msrb.mxu1 %v5571_v51  ;;  %v5744_v48 = vld [vmem:[#allocation7 + $0x358] sm:$0xf0]  ;;  %v5363_v51 = vor.u32 %v6989_v45, %v5360_v46 }
 0x18b   :  { %2245 = vmatpush.bf16.msrb.mxu2 %v5699_v31  ;;  %2258 = vmatpush.bf16.msrb.mxu3 %v5827_v61  ;;  %v5344_v31 = vld [vmem:[#allocation7 + $0x38] sm:$0xf0]  ;;  %v5619_v61 = vor.u32 %v7053_v53, %v5616_v59  ;;  %v5747_v0 = vor.u32 %v7085_v55, %v5744_v48 }
 0x18c   :  { %2201 = vmatmul.bf16.vlgmr.msra.gmra.mxu2 %v7807_v19  ;;  %2214 = vmatmul.bf16.vlgmr.msra.gmra.mxu3 %v7809_v21 }
 0x18e   :  { %2220 = vmatpush.bf16.msrb.mxu0 %v5427_v5  ;;  %2233 = vmatpush.bf16.msrb.mxu1 %v5555_v7  ;;  %v5728_v5 = vld [vmem:[#allocation7 + $0x338] sm:$0xf0]  ;;  %v5347_v7 = vor.u32 %v6985_v56, %v5344_v31 }
 0x18f   :  { %2246 = vmatpush.bf16.msrb.mxu2 %v5683_v10  ;;  %2259 = vmatpush.bf16.msrb.mxu3 %v5811_v11  ;;  %v5328_v10 = vld [vmem:[#allocation7 + $0x18] sm:$0xf0]  ;;  %v5603_v11 = vor.u32 %v7049_v1, %v5600_v2  ;;  %v5731_v12 = vor.u32 %v7081_v4, %v5728_v5 }
 0x192   :  { %2221 = vmatpush.bf16.msrb.mxu0 %v5411_v22  ;;  %2234 = vmatpush.bf16.msrb.mxu1 %v5539_v23  ;;  %v5712_v22 = vld [vmem:[#allocation7 + $0x318] sm:$0xf0]  ;;  %v5331_v23 = vor.u32 %v6981_v9, %v5328_v10 }
 0x193   :  { %2247 = vmatpush.bf16.msrb.mxu2 %v5667_v27  ;;  %2260 = vmatpush.bf16.msrb.mxu3 %v5795_v28  ;;  %v5715_v27 = vor.u32 %v7077_v16, %v5712_v22  ;;  %v7170_v16 = vld [vmem:[#allocation8 + $0x1ec] sm:$0xf0] }
 0x196   :  { %2222 = vmatpush.bf16.msrb.mxu0 %v5395_v58  ;;  %2235 = vmatpush.bf16.msrb.mxu1 %v5523_v54 }
 0x197   :  { %2248 = vmatpush.bf16.msrb.mxu2 %v5651_v37  ;;  %2261 = vmatpush.bf16.msrb.mxu3 %v5779_v38 }
 0x19a   :  { %2223 = vmatpush.bf16.msrb.mxu0 %v5379_v25  ;;  %2236 = vmatpush.bf16.msrb.mxu1 %v5507_v44 }
 0x19b   :  { %2249 = vmatpush.bf16.msrb.mxu2 %v5635_v47  ;;  %2262 = vmatpush.bf16.msrb.mxu3 %v5763_v57 }
 0x19e   :  { %2224 = vmatpush.bf16.msrb.mxu0 %v5363_v51  ;;  %2237 = vmatpush.bf16.msrb.mxu1 %v5491_v20 }
 0x19f   :  { %2250 = vmatpush.bf16.msrb.mxu2 %v5619_v61  ;;  %2263 = vmatpush.bf16.msrb.mxu3 %v5747_v0 }
 0x1a2   :  { %2225 = vmatpush.bf16.msrb.mxu0 %v5347_v7  ;;  %2238 = vmatpush.bf16.msrb.mxu1 %v5475_v8 }
 0x1a3   :  { %2251 = vmatpush.bf16.msrb.mxu2 %v5603_v11  ;;  %2264 = vmatpush.bf16.msrb.mxu3 %v5731_v12  ;;  %v5942_v11 = vld [vmem:[#allocation8 + $0xe0] sm:$0xf]  ;;  %v7138_v12 = vld [vmem:[#allocation8 + $0xec] sm:$0xf0] }
 0x1a4   :  { %v5943_v35 = vor.u32 %v7138_v12, %v5942_v11  ;;  %v5894_v11 = vld [vmem:[#allocation8 + $0x80] sm:$0xf]  ;;  %v7126_v12 = vld [vmem:[#allocation8 + $0x8c] sm:$0xf0] }
 0x1a6   :  { %2226 = vmatpush.bf16.msrb.mxu0 %v5331_v23  ;;  %2239 = vmatpush.bf16.msrb.mxu1 %v5459_v24 }
 0x1a7   :  { %2252 = vmatpush.bf16.msrb.mxu2 %v5587_v26  ;;  %2265 = vmatpush.bf16.msrb.mxu3 %v5715_v27  ;;  %v6071_v26 = vor.u32 %v7170_v16, %v6070_v14  ;;  %v6198_v27 = vld [vmem:[#allocation8 + $0x2e0] sm:$0xf]  ;;  %v7158_v14 = vld [vmem:[#allocation8 + $0x18c] sm:$0xf0] }
 0x1a8   :  { %v6150_v16 = vld [vmem:[#allocation8 + $0x280] sm:$0xf] }
 0x1a9   :  { %2227 = vmatmul.bf16.vlgmr.msrb.gmra.mxu0 %v7803_v17  ;;  %2240 = vmatmul.bf16.vlgmr.msrb.gmra.mxu1 %v7805_v18 }
 0x1aa   :  { %2253 = vmatmul.bf16.vlgmr.msrb.gmra.mxu2 %v7807_v19  ;;  %2266 = vmatmul.bf16.vlgmr.msrb.gmra.mxu3 %v7809_v21 }
 0x1ab   :  { %3221 = vmatpush.bf16.msra.mxu0 %v5943_v35  ;;  %3234 = vmatpush.bf16.msra.mxu1 %v6071_v26  ;;  %v6022_v35 = vld [vmem:[#allocation8 + $0x180] sm:$0xf] }
 0x1ac   :  { %v6023_v26 = vor.u32 %v7158_v14, %v6022_v35  ;;  %v7178_v35 = vld [vmem:[#allocation8 + $0x22c] sm:$0xf0] }
 0x1e5   :  { %v2072_v28 = vpop.f32.mrf.mxu0  ;;  %v2085_v29 = vpop.f32.mrf.mxu1 }
 0x1e6   :  { %v2086_v15 = vadd.f32 %v2085_v29, %v2072_v28 }
 0x1ec   :  { %v2098_v30 = vpop.f32.mrf.mxu2  ;;  %v2111_v32 = vpop.f32.mrf.mxu3 }
 0x1ed   :  { %v2099_v6 = vadd.f32 %v2098_v30, %v2086_v15  ;;  %v2074_v33 = vpop.f32.mrf.mxu0  ;;  %v2087_v58 = vpop.f32.mrf.mxu1  ;;  %v7202_v30 = vld [vmem:[#allocation8 + $0x2ec] sm:$0xf0] }
 0x1ef   :  { %v7827_v54 = vadd.f32 %v2111_v32, %v2099_v6  ;;  %v6326_v32 = vld [vmem:[#allocation8 + $0x3e0] sm:$0xf]  ;;  %v7234_v6 = vld [vmem:[#allocation8 + $0x3ec] sm:$0xf0] }
 0x1f1   :  { %v2271_v42 = vrot.slane %v7827_v54, 4  ;;  %v2299_v25 = vmul.f32 %v7827_v54, %v7827_v54 }
 0x1f3   :  { %v2272_v52 = vadd.f32 %v2271_v42, %v7827_v54  ;;  %v2303_v53 = vrot.slane %v2299_v25, 4 }
 0x1f4   :  { %v2100_v60 = vpop.f32.mrf.mxu2  ;;  %v2113_v36 = vpop.f32.mrf.mxu3 }
 0x1f5   :  { %v2124_v37 = vpop.f32.mrf.mxu0  ;;  %v2137_v17 = vpop.f32.mrf.mxu1  ;;  %v2273_v48 = vrot.slane %v2272_v52, 2  ;;  %v2304_v51 = vadd.f32 %v2303_v53, %v2299_v25  ;;  %v5926_v60 = vld [vmem:[#allocation8 + $0xc0] sm:$0xf]  ;;  %v7134_v36 = vld [vmem:[#allocation8 + $0xcc] sm:$0xf0] }
 0x1f6   :  { %v2138_v38 = vadd.f32 %v2137_v17, %v2124_v37  ;;  %v6199_v17 = vor.u32 %v7202_v30, %v6198_v27  ;;  %v7190_v27 = vld [vmem:[#allocation8 + $0x28c] sm:$0xf0] }
 0x1f7   :  { %v2274_v2 = vadd.f32 %v2273_v48, %v2272_v52  ;;  %v2305_v4 = vrot.slane %v2304_v51, 2  ;;  %v6151_v30 = vor.u32 %v7190_v27, %v6150_v16 }
 0x1f8   :  { %3247 = vmatpush.bf16.msra.mxu2 %v6199_v17  ;;  %v7154_v17 = vld [vmem:[#allocation8 + $0x16c] sm:$0xf0] }
 0x1f9   :  { %v2275_v43 = vrot.slane %v2274_v2, 1  ;;  %v2306_v13 = vadd.f32 %v2305_v4, %v2304_v51 }
 0x1fb   :  { %v2307_v37 = vrot.slane %v2306_v13, 1 }
 0x1fc   :  { %v2150_v18 = vpop.f32.mrf.mxu2  ;;  %v2163_v3 = vpop.f32.mrf.mxu3 }
 0x1fd   :  { %v2151_v19 = vadd.f32 %v2150_v18, %v2138_v38  ;;  %v2126_v39 = vpop.f32.mrf.mxu0  ;;  %v2139_v21 = vpop.f32.mrf.mxu1  ;;  %v6327_v38 = vor.u32 %v7234_v6, %v6326_v32  ;;  %v5927_v18 = vor.u32 %v7134_v36, %v5926_v60  ;;  %v2308_v48 = vadd.f32 %v2307_v37, %v2306_v13  ;;  %v5878_v6 = vld [vmem:[#allocation8 + $0x60] sm:$0xf] }
 0x1fe   :  { %v5895_v13 = vor.u32 %v7126_v12, %v5894_v11 }
 0x1ff   :  { %v7829_v40 = vadd.f32 %v2163_v3, %v2151_v19  ;;  %v6054_v3 = vld [vmem:[#allocation8 + $0x1c0] sm:$0xf]  ;;  %v2276_v19 = vadd.f32 %v2275_v43, %v2274_v2  ;;  %3260 = vmatpush.bf16.msra.mxu3 %v6327_v38  ;;  %3222 = vmatpush.bf16.msra.mxu0 %v5927_v18  ;;  %v2327_v43 = vmul.f32 %v2308_v48, %v7695_v49  ;;  %v7182_v48 = vld [vmem:[#allocation8 + $0x24c] sm:$0xf0] }
 0x200   :  { %v6294_v2 = vld [vmem:[#allocation8 + $0x3a0] sm:$0xf] }
 0x201   :  { %v2300_v34 = vmul.f32 %v7829_v40, %v7829_v40  ;;  %v2277_v41 = vrot.slane %v7829_v40, 4  ;;  %v6134_v38 = vld [vmem:[#allocation8 + $0x260] sm:$0xf] }
 0x203   :  { %v2309_v46 = vrot.slane %v2300_v34, 4  ;;  %v2278_v47 = vadd.f32 %v2277_v41, %v7829_v40  ;;  %v6182_v41 = vld [vmem:[#allocation8 + $0x2c0] sm:$0xf] }
 0x204   :  { %v2152_v44 = vpop.f32.mrf.mxu2  ;;  %v2165_v45 = vpop.f32.mrf.mxu3 }
 0x205   :  { %v2310_v59 = vadd.f32 %v2309_v46, %v2300_v34  ;;  %v2279_v55 = vrot.slane %v2278_v47, 2  ;;  %v7166_v34 = vld [vmem:[#allocation8 + $0x1cc] sm:$0xf0]  ;;  %v6310_v46 = vld [vmem:[#allocation8 + $0x3c0] sm:$0xf] }
 0x206   :  { %v2176_v57 = vpop.f32.mrf.mxu0  ;;  %v2189_v50 = vpop.f32.mrf.mxu1  ;;  %v6055_v44 = vor.u32 %v7166_v34, %v6054_v3  ;;  %v7198_v45 = vld [vmem:[#allocation8 + $0x2cc] sm:$0xf0] }
 0x207   :  { %v2311_v20 = vrot.slane %v2310_v59, 2  ;;  %v2190_v56 = vadd.f32 %v2189_v50, %v2176_v57  ;;  %v2280_v31 = vadd.f32 %v2279_v55, %v2278_v47  ;;  %v7230_v47 = vld [vmem:[#allocation8 + $0x3cc] sm:$0xf0]  ;;  %v6183_v52 = vor.u32 %v7198_v45, %v6182_v41 }
 0x208   :  { %v6311_v53 = vor.u32 %v7230_v47, %v6310_v46  ;;  %v7130_v55 = vld [vmem:[#allocation8 + $0xac] sm:$0xf0]  ;;  %3235 = vmatpush.bf16.msra.mxu1 %v6055_v44  ;;  %v5862_v46 = vld [vmem:[#allocation8 + $0x40] sm:$0xf] }
 0x209   :  { %v2312_v5 = vadd.f32 %v2311_v20, %v2310_v59  ;;  %v2281_v8 = vrot.slane %v2280_v31, 1  ;;  %v5910_v59 = vld [vmem:[#allocation8 + $0xa0] sm:$0xf]  ;;  %3248 = vmatpush.bf16.msra.mxu2 %v6183_v52  ;;  %v7218_v44 = vld [vmem:[#allocation8 + $0x36c] sm:$0xf0] }
 0x20a   :  { %v5911_v51 = vor.u32 %v7130_v55, %v5910_v59  ;;  %v6038_v20 = vld [vmem:[#allocation8 + $0x1a0] sm:$0xf]  ;;  %3261 = vmatpush.bf16.msra.mxu3 %v6311_v53  ;;  %v7118_v47 = vld [vmem:[#allocation8 + $0x4c] sm:$0xf0] }
 0x20b   :  { %v2313_v22 = vrot.slane %v2312_v5, 1  ;;  %v2282_v28 = vadd.f32 %v2281_v8, %v2280_v31  ;;  %v6166_v31 = vld [vmem:[#allocation8 + $0x2a0] sm:$0xf]  ;;  %v7150_v52 = vld [vmem:[#allocation8 + $0x14c] sm:$0xf0] }
 0x20c   :  { %3223 = vmatpush.bf16.msra.mxu0 %v5911_v51  ;;  %v6118_v53 = vld [vmem:[#allocation8 + $0x240] sm:$0xf] }
 0x20d   :  { %v7846_v42 = vmul.f32 %v2282_v28, %v7695_v49  ;;  %v2314_v25 = vadd.f32 %v2313_v22, %v2312_v5  ;;  %v6278_v28 = vld [vmem:[#allocation8 + $0x380] sm:$0xf] }
 0x20e   :  { %v2178_v63 = vpop.f32.mrf.mxu0  ;;  %v2191_v1 = vpop.f32.mrf.mxu1  ;;  %v6246_v51 = vld [vmem:[#allocation8 + $0x340] sm:$0xf] }
 0x20f   :  { %v2202_v61 = vpop.f32.mrf.mxu2  ;;  %v2215_v0 = vpop.f32.mrf.mxu3  ;;  %v7194_v1 = vld [vmem:[#allocation8 + $0x2ac] sm:$0xf0]  ;;  %v2328_v4 = vmul.f32 %v2314_v25, %v7695_v49  ;;  %v2332_v5 = vmul.f32 %v7846_v42, %v7846_v42 }
 0x210   :  { %v2203_v62 = vadd.f32 %v2202_v61, %v2190_v56  ;;  %v7162_v56 = vld [vmem:[#allocation8 + $0x1ac] sm:$0xf0]  ;;  %v7849_v61 = vmul.f32 %v2276_v19, %v7695_v49  ;;  %v6167_v8 = vor.u32 %v7194_v1, %v6166_v31  ;;  %3224 = vmatpush.bf16.msra.mxu0 %v5895_v13  ;;  %v6102_v13 = vld [vmem:[#allocation8 + $0x220] sm:$0xf] }
 0x211   :  { %v6039_v63 = vor.u32 %v7162_v56, %v6038_v20 }
 0x212   :  { %v7839_v7 = vadd.f32 %v2215_v0, %v2203_v62  ;;  %v2331_v22 = vmul.f32 %v7849_v61, %v7849_v61  ;;  %3249 = vmatpush.bf16.msra.mxu2 %v6167_v8  ;;  %v5974_v8 = vld [vmem:[#allocation8 + $0x120] sm:$0xf] }
 0x213   :  { %3236 = vmatpush.bf16.msra.mxu1 %v6039_v63 }
 0x214   :  { %v2283_v9 = vrot.slane %v7839_v7, 4  ;;  %v2301_v10 = vmul.f32 %v7839_v7, %v7839_v7  ;;  %v2335_v34 = vsub.f32 %v2327_v43, %v2331_v22  ;;  %v7146_v43 = vld [vmem:[#allocation8 + $0x12c] sm:$0xf0]  ;;  %v6230_v22 = vld [vmem:[#allocation8 + $0x320] sm:$0xf] }
 0x215   :  { %v5975_v16 = vor.u32 %v7146_v43, %v5974_v8  ;;  %v6056_v8 = vld [vmem:[#allocation8 + $0x1d0] sm:$0xf0] }
 0x216   :  { %v2284_v23 = vadd.f32 %v2283_v9, %v7839_v7  ;;  %v2315_v24 = vrot.slane %v2301_v10, 4  ;;  %v7226_v9 = vld [vmem:[#allocation8 + $0x3ac] sm:$0xf0]  ;;  %3250 = vmatpush.bf16.msra.mxu2 %v6151_v30  ;;  %v2339_v20 = vmax.f32 %v2335_v34, 0.0  ;;  %v7136_v34 = vld [vmem:[#allocation8 + $0xe4] sm:$0xf] }
 0x217   :  { %v2204_v29 = vpop.f32.mrf.mxu2  ;;  %v2217_v15 = vpop.f32.mrf.mxu3  ;;  %3237 = vmatpush.bf16.msra.mxu1 %v6023_v26  ;;  %v7110_v30 = vld [vmem:[#allocation8 + $0xc] sm:$0xf0] }
 0x218   :  { %v2285_v33 = vrot.slane %v2284_v23, 2  ;;  %v2316_v58 = vadd.f32 %v2315_v24, %v2301_v10  ;;  %v6295_v10 = vor.u32 %v7226_v9, %v6294_v2  ;;  %v7222_v29 = vld [vmem:[#allocation8 + $0x38c] sm:$0xf0]  ;;  %v2336_v15 = vsub.f32 %v2328_v4, %v2332_v5  ;;  %v5846_v4 = vld [vmem:[#allocation8 + $0x20] sm:$0xf] }
 0x219   :  { %v6279_v32 = vor.u32 %v7222_v29, %v6278_v28  ;;  %v7114_v5 = vld [vmem:[#allocation8 + $0x2c] sm:$0xf0]  ;;  %v7865_v26 = vadd.f32 1e-05, %v2339_v20  ;;  %v6103_v28 = vor.u32 %v7178_v35, %v6102_v13  ;;  %v6328_v20 = vld [vmem:[#allocation8 + $0x3f0] sm:$0xf0] }
 0x21a   :  { %v2286_v39 = vadd.f32 %v2285_v33, %v2284_v23  ;;  %v2317_v21 = vrot.slane %v2316_v58, 2  ;;  %3262 = vmatpush.bf16.msra.mxu3 %v6295_v10  ;;  %v7122_v33 = vld [vmem:[#allocation8 + $0x6c] sm:$0xf0]  ;;  %v2340_v41 = vmax.f32 %v2336_v15, 0.0  ;;  %v5847_v12 = vor.u32 %v7114_v5, %v5846_v4  ;;  %v5830_v15 = vld [vmem:[#allocation8] sm:$0xf] }
 0x21b   :  { %v5879_v37 = vor.u32 %v7122_v33, %v5878_v6  ;;  %v7228_v13 = vld [vmem:[#allocation8 + $0x3c4] sm:$0xf]  ;;  %v6312_v35 = vld [vmem:[#allocation8 + $0x3d0] sm:$0xf0]  ;;  %vm2353_vm11 = vweird.f32 %v7865_v26 }
 0x21c   :  { %v2287_v57 = vrot.slane %v2286_v39, 1  ;;  %v2318_v50 = vadd.f32 %v2317_v21, %v2316_v58  ;;  %v6006_v58 = vld [vmem:[#allocation8 + $0x160] sm:$0xf]  ;;  %v7863_v56 = vadd.f32 1e-05, %v2340_v41 }
 0x21d   :  { %v6007_v19 = vor.u32 %v7154_v17, %v6006_v58  ;;  %v6262_v21 = vld [vmem:[#allocation8 + $0x360] sm:$0xf]  ;;  %3225 = vmatpush.bf16.msra.mxu0 %v5879_v37  ;;  %v7142_v58 = vld [vmem:[#allocation8 + $0x10c] sm:$0xf0]  ;;  %v5831_v37 = vor.u32 %v7110_v30, %v5830_v15 }
 0x21e   :  { %v2288_v0 = vadd.f32 %v2287_v57, %v2286_v39  ;;  %v2319_v62 = vrot.slane %v2318_v50, 1  ;;  %v7186_v39 = vld [vmem:[#allocation8 + $0x26c] sm:$0xf0]  ;;  %3263 = vmatpush.bf16.msra.mxu3 %v6279_v32  ;;  %v6263_v45 = vor.u32 %v7218_v44, %v6262_v21  ;;  %v5863_v57 = vor.u32 %v7118_v47, %v5862_v46  ;;  %v5958_v32 = vld [vmem:[#allocation8 + $0x100] sm:$0xf] }
 0x21f   :  { %v6135_v25 = vor.u32 %v7186_v39, %v6134_v38  ;;  %3238 = vmatpush.bf16.msra.mxu1 %v6007_v19  ;;  %7386 = vrsqrt.f32 %v7863_v56  ;;  %v5959_v17 = vor.u32 %v7142_v58, %v5958_v32  ;;  %v7174_v38 = vld [vmem:[#allocation8 + $0x20c] sm:$0xf0]  ;;  %v7168_v46 = vld [vmem:[#allocation8 + $0x1e4] sm:$0xf]  ;;  %v6072_v47 = vld [vmem:[#allocation8 + $0x1f0] sm:$0xf0]  ;;  %vm2363_vm1 = vweird.f32 %v7863_v56 }
 0x220   :  { %v7858_v23 = vmul.f32 %v2288_v0, %v7695_v49  ;;  %v2320_v24 = vadd.f32 %v2319_v62, %v2318_v50  ;;  %v5990_v50 = vld [vmem:[#allocation8 + $0x140] sm:$0xf]  ;;  %v6119_v0 = vor.u32 %v7182_v48, %v6118_v53  ;;  %v7214_v62 = vld [vmem:[#allocation8 + $0x34c] sm:$0xf0]  ;;  %v7200_v53 = vld [vmem:[#allocation8 + $0x2e4] sm:$0xf] }
 0x221   :  { %v5991_v55 = vor.u32 %v7150_v52, %v5990_v50  ;;  %3251 = vmatpush.bf16.msra.mxu2 %v6135_v25  ;;  %3226 = vmatpush.bf16.msra.mxu0 %v5863_v57  ;;  %v6247_v2 = vor.u32 %v7214_v62, %v6246_v51  ;;  %v7206_v21 = vld [vmem:[#allocation8 + $0x30c] sm:$0xf0]  ;;  %v7232_v51 = vld [vmem:[#allocation8 + $0x3e4] sm:$0xf]  ;;  %v6040_v32 = vld [vmem:[#allocation8 + $0x1b0] sm:$0xf0] }
 0x222   :  { %v2329_v18 = vmul.f32 %v2320_v24, %v7695_v49  ;;  %v2333_v3 = vmul.f32 %v7858_v23, %v7858_v23  ;;  %3264 = vmatpush.bf16.msra.mxu3 %v6263_v45  ;;  %v7210_v24 = vld [vmem:[#allocation8 + $0x32c] sm:$0xf0]  ;;  %v5944_v45 = vld [vmem:[#allocation8 + $0xf0] sm:$0xf0] }
 0x223   :  { %3239 = vmatpush.bf16.msra.mxu1 %v5991_v55  ;;  %v6231_v29 = vor.u32 %v7210_v24, %v6230_v22  ;;  %v5947_v52 = vor.u32 %v7136_v34, %v5944_v45  ;;  %v6075_v55 = vor.u32 %v7168_v46, %v6072_v47  ;;  %v7128_v22 = vld [vmem:[#allocation8 + $0xa4] sm:$0xf]  ;;  %v5912_v24 = vld [vmem:[#allocation8 + $0xb0] sm:$0xf0] }
 0x224   :  { %v2337_v59 = vsub.f32 %v2329_v18, %v2333_v3  ;;  %v6214_v18 = vld [vmem:[#allocation8 + $0x300] sm:$0xf] }
 0x225   :  { %3252 = vmatpush.bf16.msra.mxu2 %v6119_v0  ;;  %3227 = vmatpush.bf16.msra.mxu0 %v5847_v12  ;;  %v6215_v44 = vor.u32 %v7206_v21, %v6214_v18  ;;  %v7877_v4 = vpop.eup %7386  ;;  %v5896_v21 = vld [vmem:[#allocation8 + $0x90] sm:$0xf0] }
 0x226   :  { %v2228_v60 = vpop.f32.mrf.mxu0  ;;  %v2241_v36 = vpop.f32.mrf.mxu1  ;;  %v2341_v14 = vmax.f32 %v2337_v59, 0.0  ;;  %3265 = vmatpush.bf16.msra.mxu3 %v6247_v2  ;;  %v6200_v59 = vld [vmem:[#allocation8 + $0x2f0] sm:$0xf0]  ;;  %v7164_v2 = vld [vmem:[#allocation8 + $0x1c4] sm:$0xf]  ;;  %vm2364_vm0 = vweird.f32 %v7877_v4 }
 0x227   :  { %v2242_v31 = vadd.f32 %v2241_v36, %v2228_v60  ;;  %3240 = vmatpush.bf16.msra.mxu1 %v5975_v16  ;;  %v6086_v60 = vld [vmem:[#allocation8 + $0x200] sm:$0xf]  ;;  %v6203_v48 = vor.u32 %v7200_v53, %v6200_v59  ;;  %v6059_v43 = vor.u32 %v7164_v2, %v6056_v8  ;;  %v6315_v16 = vor.u32 %v7228_v13, %v6312_v35  ;;  %v7184_v2 = vld [vmem:[#allocation8 + $0x264] sm:$0xf]  ;;  %vm7910_vm3 = vmor %vm2363_vm1, %vm2364_vm0 }
 0x228   :  { %v7873_v36 = vadd.f32 1e-05, %v2341_v14  ;;  %v6087_v39 = vor.u32 %v7174_v38, %v6086_v60  ;;  %v6168_v60 = vld [vmem:[#allocation8 + $0x2b0] sm:$0xf0] }
 0x229   :  { %3253 = vmatpush.bf16.msra.mxu2 %v6103_v28  ;;  %3228 = vmatpush.bf16.msra.mxu0 %v5831_v37  ;;  %v7160_v28 = vld [vmem:[#allocation8 + $0x1a4] sm:$0xf] }
 0x22a   :  { %3266 = vmatpush.bf16.msra.mxu3 %v6231_v29  ;;  %7388 = vrsqrt.f32 %v7873_v36  ;;  %v2358_v29 = vmul.f32 %v7877_v4, %v7863_v56  ;;  %v6043_v58 = vor.u32 %v7160_v28, %v6040_v32  ;;  %v7224_v37 = vld [vmem:[#allocation8 + $0x3a4] sm:$0xf]  ;;  %v5864_v28 = vld [vmem:[#allocation8 + $0x50] sm:$0xf0]  ;;  %vm2373_vm4 = vweird.f32 %v7873_v36 }
 0x22b   :  { %3241 = vmatpush.bf16.msra.mxu1 %v5959_v17  ;;  %7390 = vrsqrt.f32 %v7865_v26  ;;  %v6120_v32 = vld [vmem:[#allocation8 + $0x250] sm:$0xf0] }
 0x22c   :  { %v2359_v45 = vmul.f32 %v7877_v4, %v2358_v29  ;;  %v7148_v29 = vld [vmem:[#allocation8 + $0x144] sm:$0xf] }
 0x22d   :  { %v2254_v63 = vpop.f32.mrf.mxu2  ;;  %v2267_v1 = vpop.f32.mrf.mxu3  ;;  %3254 = vmatpush.bf16.msra.mxu2 %v6087_v39  ;;  %3273 = vmatpush.bf16.msrb.mxu0 %v5947_v52  ;;  %v7124_v39 = vld [vmem:[#allocation8 + $0x84] sm:$0xf]  ;;  %v6280_v52 = vld [vmem:[#allocation8 + $0x390] sm:$0xf0] }
 0x22e   :  { %v2255_v9 = vadd.f32 %v2254_v63, %v2242_v31  ;;  %v2230_v10 = vpop.f32.mrf.mxu0  ;;  %v2243_v11 = vpop.f32.mrf.mxu1  ;;  %v7132_v31 = vld [vmem:[#allocation8 + $0xc4] sm:$0xf]  ;;  %3267 = vmatpush.bf16.msra.mxu3 %v6215_v44  ;;  %v6331_v63 = vor.u32 %v7232_v51, %v6328_v20 }
 0x22f   :  { %3286 = vmatpush.bf16.msrb.mxu1 %v6075_v55  ;;  %v6184_v10 = vld [vmem:[#allocation8 + $0x2d0] sm:$0xf0]  ;;  %v7188_v44 = vld [vmem:[#allocation8 + $0x284] sm:$0xf]  ;;  %v5899_v55 = vor.u32 %v7124_v39, %v5896_v21 }
 0x230   :  { %v7867_v27 = vadd.f32 %v2267_v1, %v2255_v9  ;;  %v5928_v1 = vld [vmem:[#allocation8 + $0xd0] sm:$0xf0]  ;;  %v7196_v9 = vld [vmem:[#allocation8 + $0x2c4] sm:$0xf]  ;;  %v7882_v17 = vpop.eup %7388 }
 0x231   :  { %v5931_v5 = vor.u32 %v7132_v31, %v5928_v1  ;;  %3299 = vmatpush.bf16.msrb.mxu2 %v6203_v48  ;;  %v6187_v14 = vor.u32 %v7196_v9, %v6184_v10  ;;  %v7891_v53 = vpop.eup %7390  ;;  %v2368_v59 = vmul.f32 %v7882_v17, %v7873_v36  ;;  %v6008_v1 = vld [vmem:[#allocation8 + $0x170] sm:$0xf0]  ;;  %v7216_v10 = vld [vmem:[#allocation8 + $0x364] sm:$0xf]  ;;  %vm2374_vm2 = vweird.f32 %v7882_v17 }
 0x232   :  { %v2289_v6 = vrot.slane %v7867_v27, 4  ;;  %v2302_v33 = vmul.f32 %v7867_v27, %v7867_v27  ;;  %3312 = vmatpush.bf16.msrb.mxu3 %v6331_v63  ;;  %v7152_v63 = vld [vmem:[#allocation8 + $0x164] sm:$0xf]  ;;  %v2348_v8 = vmul.f32 %v7891_v53, %v7865_v26  ;;  %vm2354_vm6 = vweird.f32 %v7891_v53  ;;  %vm2375_vm8 = vmor %vm2373_vm4, %vm2374_vm2 }
 0x233   :  { %3274 = vmatpush.bf16.msrb.mxu0 %v5931_v5  ;;  %3287 = vmatpush.bf16.msrb.mxu1 %v6059_v43  ;;  %v6136_v5 = vld [vmem:[#allocation8 + $0x270] sm:$0xf0]  ;;  %v2369_v43 = vmul.f32 %v7882_v17, %v2368_v59  ;;  %v6011_v35 = vor.u32 %v7152_v63, %v6008_v1  ;;  %v7172_v63 = vld [vmem:[#allocation8 + $0x204] sm:$0xf]  ;;  %vm2355_vm12 = vmor %vm2353_vm11, %vm2354_vm6 }
 0x234   :  { %v2290_v3 = vadd.f32 %v2289_v6, %v7867_v27  ;;  %v2321_v19 = vrot.slane %v2302_v33, 4  ;;  %v7192_v6 = vld [vmem:[#allocation8 + $0x2a4] sm:$0xf] }
 0x235   :  { %v2256_v41 = vpop.f32.mrf.mxu2  ;;  %v2269_v25 = vpop.f32.mrf.mxu3  ;;  %3300 = vmatpush.bf16.msrb.mxu2 %v6187_v14 }
 0x236   :  { %v2291_v57 = vrot.slane %v2290_v3, 2  ;;  %v2322_v50 = vadd.f32 %v2321_v19, %v2302_v33  ;;  %v5915_v33 = vor.u32 %v7128_v22, %v5912_v24  ;;  %3313 = vmatpush.bf16.msrb.mxu3 %v6315_v16  ;;  %v6296_v19 = vld [vmem:[#allocation8 + $0x3b0] sm:$0xf0]  ;;  %v7156_v41 = vld [vmem:[#allocation8 + $0x184] sm:$0xf]  ;;  %v6139_v16 = vor.u32 %v7184_v2, %v6136_v5 }
 0x237   :  { %v6299_v34 = vor.u32 %v7224_v37, %v6296_v19  ;;  %v6024_v25 = vld [vmem:[#allocation8 + $0x190] sm:$0xf0]  ;;  %3288 = vmatpush.bf16.msrb.mxu1 %v6043_v58  ;;  %v7116_v24 = vld [vmem:[#allocation8 + $0x44] sm:$0xf]  ;;  %v2349_v58 = vmul.f32 %v7891_v53, %v2348_v8 }
 0x238   :  { %v2292_v0 = vadd.f32 %v2291_v57, %v2290_v3  ;;  %v2323_v62 = vrot.slane %v2322_v50, 2  ;;  %v6171_v3 = vor.u32 %v7192_v6, %v6168_v60  ;;  %v6152_v57 = vld [vmem:[#allocation8 + $0x290] sm:$0xf0]  ;;  %3275 = vmatpush.bf16.msrb.mxu0 %v5915_v33  ;;  %v6027_v48 = vor.u32 %v7156_v41, %v6024_v25  ;;  %v7212_v6 = vld [vmem:[#allocation8 + $0x344] sm:$0xf] }
 0x239   :  { %v6155_v20 = vor.u32 %v7188_v44, %v6152_v57  ;;  %v6248_v33 = vld [vmem:[#allocation8 + $0x350] sm:$0xf0]  ;;  %v2370_v60 = vmul.f32 0.5, %v2369_v43  ;;  %v5867_v37 = vor.u32 %v7116_v24, %v5864_v28  ;;  %v7176_v25 = vld [vmem:[#allocation8 + $0x224] sm:$0xf]  ;;  %v2350_v57 = vmul.f32 0.5, %v2349_v58 }
 0x23a   :  { %v2293_v11 = vrot.slane %v2292_v0, 1  ;;  %v2324_v12 = vadd.f32 %v2323_v62, %v2322_v50  ;;  %v7220_v50 = vld [vmem:[#allocation8 + $0x384] sm:$0xf]  ;;  %3301 = vmatpush.bf16.msrb.mxu2 %v6171_v3  ;;  %3314 = vmatpush.bf16.msrb.mxu3 %v6299_v34  ;;  %v5880_v62 = vld [vmem:[#allocation8 + $0x70] sm:$0xf0]  ;;  %v6251_v21 = vor.u32 %v7212_v6, %v6248_v33 }
 0x23b   :  { %v6283_v31 = vor.u32 %v7220_v50, %v6280_v52  ;;  %3289 = vmatpush.bf16.msrb.mxu1 %v6027_v48  ;;  %v7112_v3 = vld [vmem:[#allocation8 + $0x24] sm:$0xf]  ;;  %v5848_v19 = vld [vmem:[#allocation8 + $0x30] sm:$0xf0]  ;;  %v2371_v50 = vsub.f32 1.5, %v2370_v60  ;;  %v2351_v43 = vsub.f32 1.5, %v2350_v57 }
 0x23c   :  { %v2294_v15 = vadd.f32 %v2293_v11, %v2292_v0  ;;  %v2325_v30 = vrot.slane %v2324_v12, 1  ;;  %v7120_v0 = vld [vmem:[#allocation8 + $0x64] sm:$0xf]  ;;  %v6264_v11 = vld [vmem:[#allocation8 + $0x370] sm:$0xf0]  ;;  %3276 = vmatpush.bf16.msrb.mxu0 %v5899_v55  ;;  %v5851_v52 = vor.u32 %v7112_v3, %v5848_v19 }
 0x23d   :  { %v5883_v13 = vor.u32 %v7120_v0, %v5880_v62  ;;  %v6267_v22 = vor.u32 %v7216_v10, %v6264_v11  ;;  %v7144_v34 = vld [vmem:[#allocation8 + $0x124] sm:$0xf]  ;;  %v5976_v41 = vld [vmem:[#allocation8 + $0x130] sm:$0xf0]  ;;  %v2352_v56 = vmul.f32 %v7891_v53, %v2351_v43  ;;  %v7135_v24 = vld [vmem:[#allocation8 + $0xd4] sm:$0xf0] }
 0x23e   :  { %v7885_v38 = vmul.f32 %v2294_v15, %v7695_v49  ;;  %v2326_v18 = vadd.f32 %v2325_v30, %v2324_v12  ;;  %v2360_v12 = vmul.f32 0.5, %v2359_v45  ;;  %3302 = vmatpush.bf16.msrb.mxu2 %v6155_v20  ;;  %3315 = vmatpush.bf16.msrb.mxu3 %v6283_v31  ;;  %v5992_v15 = vld [vmem:[#allocation8 + $0x150] sm:$0xf0]  ;;  %v7180_v30 = vld [vmem:[#allocation8 + $0x244] sm:$0xf]  ;;  %v5979_v59 = vor.u32 %v7144_v34, %v5976_v41 }
 0x23f   :  { %3290 = vmatpush.bf16.msrb.mxu1 %v6011_v35  ;;  %v6123_v39 = vor.u32 %v7180_v30, %v6120_v32  ;;  %v6104_v44 = vld [vmem:[#allocation8 + $0x230] sm:$0xf0]  ;;  %v7208_v45 = vld [vmem:[#allocation8 + $0x324] sm:$0xf]  ;;  %v2356_v58 = vsel %vm2355_vm12, %v7891_v53, %v2352_v56  ;;  %v6062_v56 = vld [vmem:[#allocation8 + $0x1c8] sm:$0xf] }
 0x240   :  { %v2330_v46 = vmul.f32 %v2326_v18, %v7695_v49  ;;  %v2334_v47 = vmul.f32 %v7885_v38, %v7885_v38  ;;  %3277 = vmatpush.bf16.msrb.mxu0 %v5883_v13  ;;  %v5995_v18 = vor.u32 %v7148_v29, %v5992_v15  ;;  %v7108_v55 = vld [vmem:[#allocation8 + $0x4] sm:$0xf]  ;;  %v5832_v48 = vld [vmem:[#allocation8 + $0x10] sm:$0xf0]  ;;  %v6107_v20 = vor.u32 %v7176_v25, %v6104_v44 }
 0x241   :  { %v7140_v0 = vld [vmem:[#allocation8 + $0x104] sm:$0xf]  ;;  %v5960_v62 = vld [vmem:[#allocation8 + $0x110] sm:$0xf0]  ;;  %v5835_v11 = vor.u32 %v7108_v55, %v5832_v48 }
 0x242   :  { %v2338_v51 = vsub.f32 %v2330_v46, %v2334_v47  ;;  %3303 = vmatpush.bf16.msrb.mxu2 %v6139_v16  ;;  %3316 = vmatpush.bf16.msrb.mxu3 %v6267_v22  ;;  %v6232_v46 = vld [vmem:[#allocation8 + $0x330] sm:$0xf0]  ;;  %v2361_v47 = vsub.f32 1.5, %v2360_v12  ;;  %v7204_v5 = vld [vmem:[#allocation8 + $0x304] sm:$0xf]  ;;  %v5963_v12 = vor.u32 %v7140_v0, %v5960_v62  ;;  %v2372_v16 = vmul.f32 %v7882_v17, %v2371_v50 }
 0x243   :  { %3291 = vmatpush.bf16.msrb.mxu1 %v5995_v18  ;;  %v6235_v31 = vor.u32 %v7208_v45, %v6232_v46  ;;  %v6088_v2 = vld [vmem:[#allocation8 + $0x210] sm:$0xf0]  ;;  %v1288_v33 = vld [vmem:[#allocation11 + $0x1] ss:$8 sm:$0xf] }
 0x244   :  { %v2342_v9 = vmax.f32 %v2338_v51, 0.0  ;;  %3278 = vmatpush.bf16.msrb.mxu0 %v5867_v37  ;;  %v6216_v8 = vld [vmem:[#allocation8 + $0x310] sm:$0xf0]  ;;  %v6091_v13 = vor.u32 %v7172_v63, %v6088_v2  ;;  %v2376_v15 = vsel %vm2375_vm8, %v7882_v17, %v2372_v16  ;;  %v7139_v63 = vld [vmem:[#allocation8 + $0xf4] sm:$0xf0] }
 0x245   :  { %v6219_v35 = vor.u32 %v7204_v5, %v6216_v8  ;;  %v2392_v32 = vrot.slane %v2376_v15, 6  ;;  %v1290_v46 = vld [vmem:[#allocation11 + $0x5] ss:$8 sm:$0xf]  ;;  %v7171_v2 = vld [vmem:[#allocation8 + $0x1f4] sm:$0xf0] }
 0x246   :  { %v7898_v14 = vadd.f32 1e-05, %v2342_v9  ;;  %3304 = vmatpush.bf16.msrb.mxu2 %v6123_v39  ;;  %3317 = vmatpush.bf16.msrb.mxu3 %v6251_v21  ;;  %v2362_v9 = vmul.f32 %v7877_v4, %v2361_v47  ;;  %v6206_v5 = vld [vmem:[#allocation8 + $0x2e8] sm:$0xf]  ;;  %v7167_v15 = vld [vmem:[#allocation8 + $0x1d4] sm:$0xf0] }
 0x247   :  { %3292 = vmatpush.bf16.msrb.mxu1 %v5979_v59  ;;  %v6334_v8 = vld [vmem:[#allocation8 + $0x3e8] sm:$0xf] }
 0x248   :  { %7392 = vrsqrt.f32 %v7898_v14  ;;  %3279 = vmatpush.bf16.msrb.mxu0 %v5851_v52  ;;  %v2366_v28 = vsel %vm7910_vm3, %v7877_v4, %v2362_v9  ;;  %vm2383_vm9 = vweird.f32 %v7898_v14 }
 0x249   :  { %v2391_v36 = vrot.slane %v2366_v28, 7 }
 0x24a   :  { %3305 = vmatpush.bf16.msrb.mxu2 %v6107_v20  ;;  %3318 = vmatpush.bf16.msrb.mxu3 %v6235_v31 }
 0x24b   :  { %3293 = vmatpush.bf16.msrb.mxu1 %v5963_v12  ;;  %v2394_v60 = vsel %vm1233_vm7, %v2356_v58, %v2391_v36  ;;  %v7199_v36 = vld [vmem:[#allocation8 + $0x2d4] sm:$0xf0]  ;;  %v5918_v58 = vld [vmem:[#allocation8 + $0xa8] sm:$0xf] }
 0x24c   :  { %3280 = vmatpush.bf16.msrb.mxu0 %v5835_v11 }
 0x24e   :  { %v7393_v51 = vpop.eup %7392  ;;  %3306 = vmatpush.bf16.msrb.mxu2 %v6091_v13  ;;  %3319 = vmatpush.bf16.msrb.mxu3 %v6219_v35 }
 0x24f   :  { %v2378_v1 = vmul.f32 %v7393_v51, %v7898_v14  ;;  %vm2384_vm5 = vweird.f32 %v7393_v51 }
 0x250   :  { %vm2385_vm10 = vmor %vm2383_vm9, %vm2384_vm5 }
 0x251   :  { %v2379_v10 = vmul.f32 %v7393_v51, %v2378_v1  ;;  %v6078_v1 = vld [vmem:[#allocation8 + $0x1e8] sm:$0xf] }
 0x252   :  { %v6079_v12 = vor.u32 %v7171_v2, %v6078_v1  ;;  %v5870_v2 = vld [vmem:[#allocation8 + $0x48] sm:$0xf] }
 0x253   :  { %v2380_v22 = vmul.f32 0.5, %v2379_v10 }
 0x255   :  { %v2381_v29 = vsub.f32 1.5, %v2380_v22  ;;  %v5934_v22 = vld [vmem:[#allocation8 + $0xc8] sm:$0xf] }
 0x257   :  { %v2382_v30 = vmul.f32 %v7393_v51, %v2381_v29 }
 0x259   :  { %v2386_v4 = vsel %vm2385_vm10, %v7393_v51, %v2382_v30  ;;  %v5950_v51 = vld [vmem:[#allocation8 + $0xe8] sm:$0xf] }
 0x25a   :  { %v2393_v6 = vrot.slane %v2386_v4, 5  ;;  %v5951_v11 = vor.u32 %v7139_v63, %v5950_v51  ;;  %v6190_v30 = vld [vmem:[#allocation8 + $0x2c8] sm:$0xf]  ;;  %v7155_v51 = vld [vmem:[#allocation8 + $0x174] sm:$0xf0] }
 0x25b   :  { %v6318_v4 = vld [vmem:[#allocation8 + $0x3c8] sm:$0xf] }
 0x25c   :  { %v2395_v37 = vsel %vm1235_vm14, %v2392_v32, %v2393_v6  ;;  %v7231_v32 = vld [vmem:[#allocation8 + $0x3d4] sm:$0xf0]  ;;  %v5935_v6 = vor.u32 %v7135_v24, %v5934_v22  ;;  %v5854_v24 = vld [vmem:[#allocation8 + $0x28] sm:$0xf] }
 0x25d   :  { %v2396_v17 = vsel %vm1237_vm15, %v2394_v60, %v2395_v37  ;;  %v7131_v60 = vld [vmem:[#allocation8 + $0xb4] sm:$0xf0]  ;;  %v6191_v37 = vor.u32 %v7199_v36, %v6190_v30  ;;  %v6110_v36 = vld [vmem:[#allocation8 + $0x228] sm:$0xf] }
 0x25e   :  { %v2398_v18 = vmul.f32 %v2396_v17, %v1288_v33  ;;  %v6063_v33 = vor.u32 %v7167_v15, %v6062_v56  ;;  %v6319_v17 = vor.u32 %v7231_v32, %v6318_v4  ;;  %v5982_v15 = vld [vmem:[#allocation8 + $0x128] sm:$0xf]  ;;  %v7147_v30 = vld [vmem:[#allocation8 + $0x134] sm:$0xf0] }
 0x25f   :  { %v7179_v4 = vld [vmem:[#allocation8 + $0x234] sm:$0xf0]  ;;  %v6238_v32 = vld [vmem:[#allocation8 + $0x328] sm:$0xf] }
 0x260   :  { %v2402_v3 = vperm.slane %v2398_v18, 2  ;;  %v2403_v14 = vperm.slane %v2398_v18, 3  ;;  %v2401_v19 = vperm.slane %v2398_v18, 1  ;;  %v2400_v39 = vperm.slane %v2398_v18, 0  ;;  %v6046_v18 = vld [vmem:[#allocation8 + $0x1a8] sm:$0xf] }
 0x262   :  { %v2410_v26 = vmul.f32 %v2402_v3, %v7858_v23  ;;  %v2411_v21 = vmul.f32 %v2403_v14, %v7885_v38  ;;  %v2409_v34 = vmul.f32 %v2401_v19, %v7846_v42  ;;  %v2408_v53 = vmul.f32 %v2400_v39, %v7849_v61 }
 0x263   :  { %v2427_v52 = vmul.f32 %v2403_v14, %v7867_v27  ;;  %v2424_v23 = vmul.f32 %v2400_v39, %v7827_v54  ;;  %v2425_v38 = vmul.f32 %v2401_v19, %v7829_v40  ;;  %v2426_v42 = vmul.f32 %v2402_v3, %v7839_v7  ;;  %v7203_v27 = vld [vmem:[#allocation8 + $0x2f4] sm:$0xf0]  ;;  %v6174_v14 = vld [vmem:[#allocation8 + $0x2a8] sm:$0xf] }
 0x264   :  { %v2417_v41 = vrot.slane %v2410_v26, 6  ;;  %v2418_v25 = vrot.slane %v2411_v21, 5  ;;  %v2416_v44 = vrot.slane %v2409_v34, 7  ;;  %v7235_v7 = vld [vmem:[#allocation8 + $0x3f4] sm:$0xf0]  ;;  %v6207_v28 = vor.u32 %v7203_v27, %v6206_v5 }
 0x265   :  { %v6335_v29 = vor.u32 %v7235_v7, %v6334_v8  ;;  %v7163_v3 = vld [vmem:[#allocation8 + $0x1b4] sm:$0xf0]  ;;  %v6302_v39 = vld [vmem:[#allocation8 + $0x3a8] sm:$0xf]  ;;  %v5919_v21 = vor.u32 %v7131_v60, %v5918_v58  ;;  %v5983_v60 = vor.u32 %v7147_v30, %v5982_v15  ;;  %v7157_v30 = vld [vmem:[#allocation8 + $0x18c] sm:$0xf] }
 0x266   :  { %v2420_v45 = vsel %vm1235_vm14, %v2417_v41, %v2418_v25  ;;  %v2419_v47 = vsel %vm1233_vm7, %v2408_v53, %v2416_v44  ;;  %v7195_v19 = vld [vmem:[#allocation8 + $0x2b4] sm:$0xf0]  ;;  %v6047_v34 = vor.u32 %v7163_v3, %v6046_v18  ;;  %v5902_v41 = vld [vmem:[#allocation8 + $0x88] sm:$0xf]  ;;  %v6111_v3 = vor.u32 %v7179_v4, %v6110_v36  ;;  %v6032_v36 = vld [vmem:[#allocation8 + $0x198] sm:$0xf0] }
 0x267   :  { %v2421_v57 = vsel %vm1237_vm15, %v2419_v47, %v2420_v45  ;;  %v7227_v26 = vld [vmem:[#allocation8 + $0x3b4] sm:$0xf0]  ;;  %v6175_v53 = vor.u32 %v7195_v19, %v6174_v14  ;;  %v6030_v45 = vld [vmem:[#allocation8 + $0x188] sm:$0xf]  ;;  %v7189_v4 = vld [vmem:[#allocation8 + $0x28c] sm:$0xf] }
 0x268   :  { %v2423_v50 = vsub.f32 %v1290_v46, %v2421_v57  ;;  %v7127_v25 = vld [vmem:[#allocation8 + $0x94] sm:$0xf0]  ;;  %v6303_v44 = vor.u32 %v7227_v26, %v6302_v39  ;;  %v6158_v47 = vld [vmem:[#allocation8 + $0x288] sm:$0xf] }
 0x269   :  { %v7159_v46 = vld [vmem:[#allocation8 + $0x194] sm:$0xf0]  ;;  %v6254_v7 = vld [vmem:[#allocation8 + $0x348] sm:$0xf] }
 0x26a   :  { %v2429_v59 = vperm.slane %v2423_v50, 0  ;;  %v2430_v55 = vperm.slane %v2423_v50, 1  ;;  %v2431_v61 = vperm.slane %v2423_v50, 2  ;;  %v2432_v48 = vperm.slane %v2423_v50, 3  ;;  %v7191_v57 = vld [vmem:[#allocation8 + $0x294] sm:$0xf0] }
 0x26b   :  { %v6286_v50 = vld [vmem:[#allocation8 + $0x388] sm:$0xf]  ;;  %v7119_v5 = vld [vmem:[#allocation8 + $0x54] sm:$0xf0] }
 0x26c   :  { %v2437_v20 = vadd.f32 %v2429_v59, %v2424_v23  ;;  %v2438_v31 = vadd.f32 %v2430_v55, %v2425_v38  ;;  %v2439_v0 = vadd.f32 %v2431_v61, %v2426_v42  ;;  %v2440_v62 = vadd.f32 %v2432_v48, %v2427_v52  ;;  %v7223_v52 = vld [vmem:[#allocation8 + $0x394] sm:$0xf0]  ;;  %v5886_v42 = vld [vmem:[#allocation8 + $0x68] sm:$0xf] }
 0x26d   :  { %v5903_v23 = vor.u32 %v7127_v25, %v5902_v41  ;;  %v6031_v38 = vor.u32 %v7159_v46, %v6030_v45  ;;  %v7123_v59 = vld [vmem:[#allocation8 + $0x74] sm:$0xf0]  ;;  %v6159_v55 = vor.u32 %v7191_v57, %v6158_v47  ;;  %v6287_v61 = vor.u32 %v7223_v52, %v6286_v50  ;;  %v6014_v48 = vld [vmem:[#allocation8 + $0x168] sm:$0xf]  ;;  %v5952_v41 = vld [vmem:[#allocation8 + $0xf8] sm:$0xf0] }
 0x26e   :  { %v2441_v54 = vmax.f32 %v2437_v20, 0.0  ;;  %v2442_v9 = vmax.f32 %v2438_v31, 0.0  ;;  %v2443_v40 = vmax.f32 %v2439_v0, 0.0  ;;  %v2444_v10 = vmax.f32 %v2440_v62, 0.0  ;;  %v6142_v20 = vld [vmem:[#allocation8 + $0x268] sm:$0xf] }
 0x26f   :  { %v7187_v31 = vld [vmem:[#allocation8 + $0x274] sm:$0xf0]  ;;  %v6270_v0 = vld [vmem:[#allocation8 + $0x368] sm:$0xf]  ;;  %v5887_v63 = vor.u32 %v7123_v59, %v5886_v42  ;;  %v6015_v1 = vor.u32 %v7155_v51, %v6014_v48  ;;  %v7169_v25 = vld [vmem:[#allocation8 + $0x1ec] sm:$0xf] }
 0x270   :  { %v7938_v43 = vpack.c.bf16 %v2441_v54, %v2441_v54  ;;  %v7940_v13 = vpack.c.bf16 %v2442_v9, %v2442_v9  ;;  %v7942_v35 = vpack.c.bf16 %v2443_v40, %v2443_v40  ;;  %v7944_v16 = vpack.c.bf16 %v2444_v10, %v2444_v10  ;;  %v7219_v62 = vld [vmem:[#allocation8 + $0x374] sm:$0xf0]  ;;  %v5998_v54 = vld [vmem:[#allocation8 + $0x148] sm:$0xf]  ;;  %v6208_v47 = vld [vmem:[#allocation8 + $0x2f8] sm:$0xf0] }
 0x271   :  { %v6143_v27 = vor.u32 %v7187_v31, %v6142_v20  ;;  %v6271_v8 = vor.u32 %v7219_v62, %v6270_v0  ;;  %v7151_v9 = vld [vmem:[#allocation8 + $0x154] sm:$0xf0]  ;;  %v6126_v40 = vld [vmem:[#allocation8 + $0x248] sm:$0xf]  ;;  %v7233_v57 = vld [vmem:[#allocation8 + $0x3ec] sm:$0xf] }
 0x272   :  { %3229 = vmatmul.bf16.vlgmr.msra.gmra.mxu0 %v7938_v43  ;;  %3242 = vmatmul.bf16.vlgmr.msra.gmra.mxu1 %v7940_v13  ;;  %v7183_v10 = vld [vmem:[#allocation8 + $0x254] sm:$0xf0]  ;;  %v5999_v22 = vor.u32 %v7151_v9, %v5998_v54  ;;  %v6094_v19 = vld [vmem:[#allocation8 + $0x208] sm:$0xf]  ;;  %v6336_v50 = vld [vmem:[#allocation8 + $0x3f8] sm:$0xf0] }
 0x273   :  { %3255 = vmatmul.bf16.vlgmr.msra.gmra.mxu2 %v7942_v35  ;;  %3268 = vmatmul.bf16.vlgmr.msra.gmra.mxu3 %v7944_v16  ;;  %v7143_v18 = vld [vmem:[#allocation8 + $0x114] sm:$0xf0]  ;;  %v6222_v26 = vld [vmem:[#allocation8 + $0x308] sm:$0xf]  ;;  %v7133_v59 = vld [vmem:[#allocation8 + $0xcc] sm:$0xf]  ;;  %v6339_v48 = vor.u32 %v7233_v57, %v6336_v50 }
 0x274   :  { %3325 = vmatpush.bf16.msra.mxu0 %v5951_v11  ;;  %3338 = vmatpush.bf16.msra.mxu1 %v6079_v12  ;;  %v7215_v11 = vld [vmem:[#allocation8 + $0x354] sm:$0xf0]  ;;  %v5871_v12 = vor.u32 %v7119_v5, %v5870_v2  ;;  %v7165_v51 = vld [vmem:[#allocation8 + $0x1cc] sm:$0xf]  ;;  %v6064_v20 = vld [vmem:[#allocation8 + $0x1d8] sm:$0xf0] }
 0x275   :  { %3351 = vmatpush.bf16.msra.mxu2 %v6207_v28  ;;  %3364 = vmatpush.bf16.msra.mxu3 %v6335_v29  ;;  %v7115_v28 = vld [vmem:[#allocation8 + $0x34] sm:$0xf0]  ;;  %v6127_v29 = vor.u32 %v7183_v10, %v6126_v40  ;;  %v6255_v56 = vor.u32 %v7215_v11, %v6254_v7  ;;  %v7197_v31 = vld [vmem:[#allocation8 + $0x2cc] sm:$0xf]  ;;  %v6192_v0 = vld [vmem:[#allocation8 + $0x2d8] sm:$0xf0]  ;;  %v6067_v2 = vor.u32 %v7165_v51, %v6064_v20 }
 0x276   :  { %v5855_v58 = vor.u32 %v7115_v28, %v5854_v24  ;;  %v7175_v39 = vld [vmem:[#allocation8 + $0x214] sm:$0xf0]  ;;  %v7229_v62 = vld [vmem:[#allocation8 + $0x3cc] sm:$0xf]  ;;  %v6048_v40 = vld [vmem:[#allocation8 + $0x1b8] sm:$0xf0] }
 0x277   :  { %v6095_v52 = vor.u32 %v7175_v39, %v6094_v19  ;;  %v7129_v5 = vld [vmem:[#allocation8 + $0xac] sm:$0xf]  ;;  %v6176_v7 = vld [vmem:[#allocation8 + $0x2b8] sm:$0xf0] }
 0x278   :  { %3326 = vmatpush.bf16.msra.mxu0 %v5935_v6  ;;  %3339 = vmatpush.bf16.msra.mxu1 %v6063_v33  ;;  %v7211_v6 = vld [vmem:[#allocation8 + $0x334] sm:$0xf0]  ;;  %v5838_v33 = vld [vmem:[#allocation8 + $0x8] sm:$0xf]  ;;  %v7161_v9 = vld [vmem:[#allocation8 + $0x1ac] sm:$0xf] }
 0x279   :  { %3352 = vmatpush.bf16.msra.mxu2 %v6191_v37  ;;  %3365 = vmatpush.bf16.msra.mxu3 %v6319_v17  ;;  %v7111_v37 = vld [vmem:[#allocation8 + $0x14] sm:$0xf0]  ;;  %v5966_v17 = vld [vmem:[#allocation8 + $0x108] sm:$0xf]  ;;  %v6239_v14 = vor.u32 %v7211_v6, %v6238_v32  ;;  %v7193_v10 = vld [vmem:[#allocation8 + $0x2ac] sm:$0xf]  ;;  %v6051_v24 = vor.u32 %v7161_v9, %v6048_v40 }
 0x27a   :  { %v5839_v45 = vor.u32 %v7111_v37, %v5838_v33  ;;  %v5967_v46 = vor.u32 %v7143_v18, %v5966_v17  ;;  %v7225_v11 = vld [vmem:[#allocation8 + $0x3ac] sm:$0xf]  ;;  %v6160_v32 = vld [vmem:[#allocation8 + $0x298] sm:$0xf0] }
 0x27b   :  { %v7125_v28 = vld [vmem:[#allocation8 + $0x8c] sm:$0xf]  ;;  %v6288_v33 = vld [vmem:[#allocation8 + $0x398] sm:$0xf0]  ;;  %v6163_v18 = vor.u32 %v7189_v4, %v6160_v32 }
 0x27c   :  { %3327 = vmatpush.bf16.msra.mxu0 %v5919_v21  ;;  %3340 = vmatpush.bf16.msra.mxu1 %v6047_v34  ;;  %v7207_v21 = vld [vmem:[#allocation8 + $0x314] sm:$0xf0]  ;;  %v7137_v34 = vld [vmem:[#allocation8 + $0xec] sm:$0xf]  ;;  %v5888_v17 = vld [vmem:[#allocation8 + $0x78] sm:$0xf0] }
 0x27d   :  { %3353 = vmatpush.bf16.msra.mxu2 %v6175_v53  ;;  %3366 = vmatpush.bf16.msra.mxu3 %v6303_v44  ;;  %v6080_v53 = vld [vmem:[#allocation8 + $0x1f8] sm:$0xf0]  ;;  %v7201_v44 = vld [vmem:[#allocation8 + $0x2ec] sm:$0xf] }
 0x27e   :  { %v6083_v42 = vor.u32 %v7169_v25, %v6080_v53  ;;  %v7221_v6 = vld [vmem:[#allocation8 + $0x38c] sm:$0xf]  ;;  %v6016_v19 = vld [vmem:[#allocation8 + $0x178] sm:$0xf0] }
 0x27f   :  { %v7121_v37 = vld [vmem:[#allocation8 + $0x6c] sm:$0xf]  ;;  %v6000_v57 = vld [vmem:[#allocation8 + $0x158] sm:$0xf0] }
 0x280   :  { %3328 = vmatpush.bf16.msra.mxu0 %v5903_v23  ;;  %3341 = vmatpush.bf16.msra.mxu1 %v6031_v38  ;;  %v6223_v23 = vor.u32 %v7207_v21, %v6222_v26  ;;  %v5955_v38 = vor.u32 %v7137_v34, %v5952_v41  ;;  %v7185_v39 = vld [vmem:[#allocation8 + $0x26c] sm:$0xf]  ;;  %v6144_v26 = vld [vmem:[#allocation8 + $0x278] sm:$0xf0]  ;;  %v5891_v41 = vor.u32 %v7121_v37, %v5888_v17 }
 0x281   :  { %3354 = vmatpush.bf16.msra.mxu2 %v6159_v55  ;;  %3367 = vmatpush.bf16.msra.mxu3 %v6287_v61  ;;  %v5936_v55 = vld [vmem:[#allocation8 + $0xd8] sm:$0xf0]  ;;  %v6211_v61 = vor.u32 %v7201_v44, %v6208_v47  ;;  %v7217_v21 = vld [vmem:[#allocation8 + $0x36c] sm:$0xf] }
 0x282   :  { %3281 = vmatmul.bf16.vlgmr.msrb.gmra.mxu0 %v7938_v43  ;;  %3294 = vmatmul.bf16.vlgmr.msrb.gmra.mxu1 %v7940_v13  ;;  %v6272_v34 = vld [vmem:[#allocation8 + $0x378] sm:$0xf0]  ;;  %v7117_v53 = vld [vmem:[#allocation8 + $0x4c] sm:$0xf] }
 0x283   :  { %3307 = vmatmul.bf16.vlgmr.msrb.gmra.mxu2 %v7942_v35  ;;  %3320 = vmatmul.bf16.vlgmr.msrb.gmra.mxu3 %v7944_v16  ;;  %v5872_v44 = vld [vmem:[#allocation8 + $0x58] sm:$0xf0]  ;;  %v7149_v47 = vld [vmem:[#allocation8 + $0x14c] sm:$0xf] }
 0x284   :  { %3329 = vmatpush.bf16.msra.mxu0 %v5887_v63  ;;  %3342 = vmatpush.bf16.msra.mxu1 %v6015_v1  ;;  %v6320_v63 = vld [vmem:[#allocation8 + $0x3d8] sm:$0xf0]  ;;  %v5939_v1 = vor.u32 %v7133_v59, %v5936_v55  ;;  %v7181_v50 = vld [vmem:[#allocation8 + $0x24c] sm:$0xf]  ;;  %v6003_v59 = vor.u32 %v7149_v47, %v6000_v57 }
 0x285   :  { %3355 = vmatpush.bf16.msra.mxu2 %v6143_v27  ;;  %3368 = vmatpush.bf16.msra.mxu3 %v6271_v8  ;;  %v5920_v27 = vld [vmem:[#allocation8 + $0xb8] sm:$0xf0]  ;;  %v6195_v8 = vor.u32 %v7197_v31, %v6192_v0  ;;  %v6323_v54 = vor.u32 %v7229_v62, %v6320_v63  ;;  %v7113_v55 = vld [vmem:[#allocation8 + $0x2c] sm:$0xf] }
 0x286   :  { %v7145_v20 = vld [vmem:[#allocation8 + $0x12c] sm:$0xf]  ;;  %v5984_v31 = vld [vmem:[#allocation8 + $0x138] sm:$0xf0] }
 0x287   :  { %v7177_v0 = vld [vmem:[#allocation8 + $0x22c] sm:$0xf]  ;;  %v6112_v62 = vld [vmem:[#allocation8 + $0x238] sm:$0xf0] }
 0x288   :  { %3330 = vmatpush.bf16.msra.mxu0 %v5871_v12  ;;  %3343 = vmatpush.bf16.msra.mxu1 %v5999_v22  ;;  %v6304_v12 = vld [vmem:[#allocation8 + $0x3b8] sm:$0xf0]  ;;  %v5923_v22 = vor.u32 %v7129_v5, %v5920_v27  ;;  %v7209_v63 = vld [vmem:[#allocation8 + $0x32c] sm:$0xf]  ;;  %v5987_v5 = vor.u32 %v7145_v20, %v5984_v31 }
 0x289   :  { %3356 = vmatpush.bf16.msra.mxu2 %v6127_v29  ;;  %3369 = vmatpush.bf16.msra.mxu3 %v6255_v56  ;;  %v5904_v29 = vld [vmem:[#allocation8 + $0x98] sm:$0xf0]  ;;  %v6179_v56 = vor.u32 %v7193_v10, %v6176_v7  ;;  %v6307_v15 = vor.u32 %v7225_v11, %v6304_v12  ;;  %v7109_v27 = vld [vmem:[#allocation8 + $0xc] sm:$0xf] }
 0x28a   :  { %v7141_v40 = vld [vmem:[#allocation8 + $0x10c] sm:$0xf]  ;;  %v5968_v10 = vld [vmem:[#allocation8 + $0x118] sm:$0xf0] }
 0x28b   :  { %v7173_v7 = vld [vmem:[#allocation8 + $0x20c] sm:$0xf]  ;;  %v6096_v11 = vld [vmem:[#allocation8 + $0x218] sm:$0xf0] }
 0x28c   :  { %3331 = vmatpush.bf16.msra.mxu0 %v5855_v58  ;;  %3344 = vmatpush.bf16.msra.mxu1 %v5983_v60  ;;  %v5907_v58 = vor.u32 %v7125_v28, %v5904_v29  ;;  %v6035_v60 = vor.u32 %v7157_v30, %v6032_v36  ;;  %v7205_v12 = vld [vmem:[#allocation8 + $0x30c] sm:$0xf]  ;;  %v5971_v28 = vor.u32 %v7141_v40, %v5968_v10 }
 0x28d   :  { %3357 = vmatpush.bf16.msra.mxu2 %v6111_v3  ;;  %3370 = vmatpush.bf16.msra.mxu3 %v6239_v14  ;;  %v6291_v3 = vor.u32 %v7221_v6, %v6288_v33  ;;  %v7153_v14 = vld [vmem:[#allocation8 + $0x16c] sm:$0xf]  ;;  %v6099_v29 = vor.u32 %v7173_v7, %v6096_v11 }
 0x28e   :  { %v6019_v25 = vor.u32 %v7153_v14, %v6016_v19 }
 0x290   :  { %3332 = vmatpush.bf16.msra.mxu0 %v5839_v45  ;;  %3345 = vmatpush.bf16.msra.mxu1 %v5967_v46  ;;  %v6147_v45 = vor.u32 %v7185_v39, %v6144_v26  ;;  %v6275_v46 = vor.u32 %v7217_v21, %v6272_v34 }
 0x291   :  { %3358 = vmatpush.bf16.msra.mxu2 %v6095_v52  ;;  %3371 = vmatpush.bf16.msra.mxu3 %v6223_v23  ;;  %v6128_v52 = vld [vmem:[#allocation8 + $0x258] sm:$0xf0]  ;;  %v7213_v23 = vld [vmem:[#allocation8 + $0x34c] sm:$0xf] }
 0x293   :  { %3333 = vmatmul.bf16.vlgmr.msra.gmra.mxu0 %v7938_v43  ;;  %3346 = vmatmul.bf16.vlgmr.msra.gmra.mxu1 %v7940_v13 }
 0x294   :  { %3377 = vmatpush.bf16.msrb.mxu0 %v5955_v38  ;;  %3390 = vmatpush.bf16.msrb.mxu1 %v6083_v42  ;;  %v6256_v38 = vld [vmem:[#allocation8 + $0x358] sm:$0xf0]  ;;  %v5875_v42 = vor.u32 %v7117_v53, %v5872_v44 }
 0x295   :  { %3403 = vmatpush.bf16.msrb.mxu2 %v6211_v61  ;;  %3416 = vmatpush.bf16.msrb.mxu3 %v6339_v48  ;;  %v5856_v61 = vld [vmem:[#allocation8 + $0x38] sm:$0xf0]  ;;  %v6131_v48 = vor.u32 %v7181_v50, %v6128_v52  ;;  %v6259_v51 = vor.u32 %v7213_v23, %v6256_v38 }
 0x296   :  { %3359 = vmatmul.bf16.vlgmr.msra.gmra.mxu2 %v7942_v35  ;;  %3372 = vmatmul.bf16.vlgmr.msra.gmra.mxu3 %v7944_v16 }
 0x298   :  { %3378 = vmatpush.bf16.msrb.mxu0 %v5939_v1  ;;  %3391 = vmatpush.bf16.msrb.mxu1 %v6067_v2  ;;  %v6240_v1 = vld [vmem:[#allocation8 + $0x338] sm:$0xf0]  ;;  %v5859_v2 = vor.u32 %v7113_v55, %v5856_v61 }
 0x299   :  { %3404 = vmatpush.bf16.msrb.mxu2 %v6195_v8  ;;  %3417 = vmatpush.bf16.msrb.mxu3 %v6323_v54  ;;  %v5840_v8 = vld [vmem:[#allocation8 + $0x18] sm:$0xf0]  ;;  %v6115_v54 = vor.u32 %v7177_v0, %v6112_v62  ;;  %v6243_v9 = vor.u32 %v7209_v63, %v6240_v1 }
 0x29c   :  { %3379 = vmatpush.bf16.msrb.mxu0 %v5923_v22  ;;  %3392 = vmatpush.bf16.msrb.mxu1 %v6051_v24  ;;  %v6224_v22 = vld [vmem:[#allocation8 + $0x318] sm:$0xf0]  ;;  %v5843_v24 = vor.u32 %v7109_v27, %v5840_v8 }
 0x29d   :  { %3405 = vmatpush.bf16.msrb.mxu2 %v6179_v56  ;;  %3418 = vmatpush.bf16.msrb.mxu3 %v6307_v15  ;;  %v6227_v56 = vor.u32 %v7205_v12, %v6224_v22  ;;  %v6582_v12 = vld [vmem:[#allocation10 + $0x1e0] sm:$0xf] }
 0x2a0   :  { %3380 = vmatpush.bf16.msrb.mxu0 %v5907_v58  ;;  %3393 = vmatpush.bf16.msrb.mxu1 %v6035_v60 }
 0x2a1   :  { %3406 = vmatpush.bf16.msrb.mxu2 %v6163_v18  ;;  %3419 = vmatpush.bf16.msrb.mxu3 %v6291_v3 }
 0x2a4   :  { %3381 = vmatpush.bf16.msrb.mxu0 %v5891_v41  ;;  %3394 = vmatpush.bf16.msrb.mxu1 %v6019_v25 }
 0x2a5   :  { %3407 = vmatpush.bf16.msrb.mxu2 %v6147_v45  ;;  %3420 = vmatpush.bf16.msrb.mxu3 %v6275_v46 }
 0x2a8   :  { %3382 = vmatpush.bf16.msrb.mxu0 %v5875_v42  ;;  %3395 = vmatpush.bf16.msrb.mxu1 %v6003_v59 }
 0x2a9   :  { %3408 = vmatpush.bf16.msrb.mxu2 %v6131_v48  ;;  %3421 = vmatpush.bf16.msrb.mxu3 %v6259_v51 }
 0x2ac   :  { %3383 = vmatpush.bf16.msrb.mxu0 %v5859_v2  ;;  %3396 = vmatpush.bf16.msrb.mxu1 %v5987_v5 }
 0x2ad   :  { %3409 = vmatpush.bf16.msrb.mxu2 %v6115_v54  ;;  %3422 = vmatpush.bf16.msrb.mxu3 %v6243_v9  ;;  %v6454_v54 = vld [vmem:[#allocation10 + $0xe0] sm:$0xf]  ;;  %v7266_v9 = vld [vmem:[#allocation10 + $0xec] sm:$0xf0] }
 0x2ae   :  { %v6455_v11 = vor.u32 %v7266_v9, %v6454_v54  ;;  %v6406_v54 = vld [vmem:[#allocation10 + $0x80] sm:$0xf]  ;;  %v7254_v9 = vld [vmem:[#allocation10 + $0x8c] sm:$0xf0] }
 0x2b0   :  { %3384 = vmatpush.bf16.msrb.mxu0 %v5843_v24  ;;  %3397 = vmatpush.bf16.msrb.mxu1 %v5971_v28  ;;  %v7298_v28 = vld [vmem:[#allocation10 + $0x1ec] sm:$0xf0] }
 0x2b1   :  { %3410 = vmatpush.bf16.msrb.mxu2 %v6099_v29  ;;  %3423 = vmatpush.bf16.msrb.mxu3 %v6227_v56  ;;  %v6710_v29 = vld [vmem:[#allocation10 + $0x2e0] sm:$0xf]  ;;  %v7330_v56 = vld [vmem:[#allocation10 + $0x2ec] sm:$0xf0] }
 0x2b3   :  { %3385 = vmatmul.bf16.vlgmr.msrb.gmra.mxu0 %v7938_v43  ;;  %3398 = vmatmul.bf16.vlgmr.msrb.gmra.mxu1 %v7940_v13 }
 0x2b4   :  { %3411 = vmatmul.bf16.vlgmr.msrb.gmra.mxu2 %v7942_v35  ;;  %3424 = vmatmul.bf16.vlgmr.msrb.gmra.mxu3 %v7944_v16 }
 0x2b5   :  { %4379 = vmatpush.bf16.msra.mxu0 %v6455_v11  ;;  %v6407_v11 = vor.u32 %v7254_v9, %v6406_v54  ;;  %v7242_v54 = vld [vmem:[#allocation10 + $0x2c] sm:$0xf0]  ;;  %v6486_v9 = vld [vmem:[#allocation10 + $0x120] sm:$0xf] }
 0x2ef   :  { %v3230_v15 = vpop.f32.mrf.mxu0  ;;  %v3243_v30 = vpop.f32.mrf.mxu1 }
 0x2f0   :  { %v3244_v36 = vadd.f32 %v3243_v30, %v3230_v15 }
 0x2f6   :  { %v3256_v4 = vpop.f32.mrf.mxu2  ;;  %v3269_v32 = vpop.f32.mrf.mxu3 }
 0x2f7   :  { %v3257_v6 = vadd.f32 %v3256_v4, %v3244_v36  ;;  %v3232_v33 = vpop.f32.mrf.mxu0  ;;  %v3245_v58 = vpop.f32.mrf.mxu1 }
 0x2f8   :  { %v6583_v58 = vor.u32 %v7298_v28, %v6582_v12  ;;  %v7286_v12 = vld [vmem:[#allocation10 + $0x18c] sm:$0xf0] }
 0x2f9   :  { %v7962_v60 = vadd.f32 %v3269_v32, %v3257_v6  ;;  %v6838_v32 = vld [vmem:[#allocation10 + $0x3e0] sm:$0xf]  ;;  %v7362_v6 = vld [vmem:[#allocation10 + $0x3ec] sm:$0xf0] }
 0x2fa   :  { %4392 = vmatpush.bf16.msra.mxu1 %v6583_v58 }
 0x2fb   :  { %v3429_v26 = vrot.slane %v7962_v60, 4  ;;  %v3457_v21 = vmul.f32 %v7962_v60, %v7962_v60 }
 0x2fd   :  { %v3430_v53 = vadd.f32 %v3429_v26, %v7962_v60  ;;  %v3461_v47 = vrot.slane %v3457_v21, 4  ;;  %v6694_v26 = vld [vmem:[#allocation10 + $0x2c0] sm:$0xf] }
 0x2fe   :  { %v3258_v37 = vpop.f32.mrf.mxu2  ;;  %v3271_v17 = vpop.f32.mrf.mxu3 }
 0x2ff   :  { %v3282_v18 = vpop.f32.mrf.mxu0  ;;  %v3295_v43 = vpop.f32.mrf.mxu1  ;;  %v3431_v50 = vrot.slane %v3430_v53, 2  ;;  %v3462_v23 = vadd.f32 %v3461_v47, %v3457_v21  ;;  %v6711_v37 = vor.u32 %v7330_v56, %v6710_v29  ;;  %v6839_v17 = vor.u32 %v7362_v6, %v6838_v32 }
 0x300   :  { %v3296_v3 = vadd.f32 %v3295_v43, %v3282_v18 }
 0x301   :  { %v3432_v61 = vadd.f32 %v3431_v50, %v3430_v53  ;;  %v3463_v0 = vrot.slane %v3462_v23, 2  ;;  %4405 = vmatpush.bf16.msra.mxu2 %v6711_v37  ;;  %4418 = vmatpush.bf16.msra.mxu3 %v6839_v17  ;;  %v7326_v53 = vld [vmem:[#allocation10 + $0x2cc] sm:$0xf0]  ;;  %v6422_v50 = vld [vmem:[#allocation10 + $0xa0] sm:$0xf] }
 0x302   :  { %v6695_v47 = vor.u32 %v7326_v53, %v6694_v26  ;;  %v6390_v37 = vld [vmem:[#allocation10 + $0x60] sm:$0xf]  ;;  %v7250_v17 = vld [vmem:[#allocation10 + $0x6c] sm:$0xf0] }
 0x303   :  { %v3433_v1 = vrot.slane %v3432_v61, 1  ;;  %v3464_v8 = vadd.f32 %v3463_v0, %v3462_v23  ;;  %v6806_v0 = vld [vmem:[#allocation10 + $0x3a0] sm:$0xf] }
 0x304   :  { %v6374_v53 = vld [vmem:[#allocation10 + $0x40] sm:$0xf] }
 0x305   :  { %v3434_v15 = vadd.f32 %v3433_v1, %v3432_v61  ;;  %v3465_v33 = vrot.slane %v3464_v8, 1  ;;  %v7290_v61 = vld [vmem:[#allocation10 + $0x1ac] sm:$0xf0]  ;;  %4406 = vmatpush.bf16.msra.mxu2 %v6695_v47 }
 0x306   :  { %v3308_v13 = vpop.f32.mrf.mxu2  ;;  %v3321_v14 = vpop.f32.mrf.mxu3 }
 0x307   :  { %v3309_v35 = vadd.f32 %v3308_v13, %v3296_v3  ;;  %v3284_v19 = vpop.f32.mrf.mxu0  ;;  %v3297_v16 = vpop.f32.mrf.mxu1  ;;  %v6438_v13 = vld [vmem:[#allocation10 + $0xc0] sm:$0xf] }
 0x308   :  { %v6566_v19 = vld [vmem:[#allocation10 + $0x1c0] sm:$0xf]  ;;  %v7294_v16 = vld [vmem:[#allocation10 + $0x1cc] sm:$0xf0] }
 0x309   :  { %v7964_v39 = vadd.f32 %v3321_v14, %v3309_v35  ;;  %v7262_v14 = vld [vmem:[#allocation10 + $0xcc] sm:$0xf0] }
 0x30a   :  { %v6439_v35 = vor.u32 %v7262_v14, %v6438_v13  ;;  %v7282_v13 = vld [vmem:[#allocation10 + $0x16c] sm:$0xf0] }
 0x30b   :  { %v3458_v25 = vmul.f32 %v7964_v39, %v7964_v39  ;;  %v3435_v44 = vrot.slane %v7964_v39, 4 }
 0x30c   :  { %4380 = vmatpush.bf16.msra.mxu0 %v6439_v35  ;;  %v6646_v35 = vld [vmem:[#allocation10 + $0x260] sm:$0xf] }
 0x30d   :  { %v3467_v57 = vrot.slane %v3458_v25, 4  ;;  %v3436_v52 = vadd.f32 %v3435_v44, %v7964_v39  ;;  %v6822_v44 = vld [vmem:[#allocation10 + $0x3c0] sm:$0xf] }
 0x30e   :  { %v3310_v34 = vpop.f32.mrf.mxu2  ;;  %v3323_v41 = vpop.f32.mrf.mxu3 }
 0x30f   :  { %v3468_v38 = vadd.f32 %v3467_v57, %v3458_v25  ;;  %v3437_v48 = vrot.slane %v3436_v52, 2  ;;  %v6567_v25 = vor.u32 %v7294_v16, %v6566_v19  ;;  %v7358_v57 = vld [vmem:[#allocation10 + $0x3cc] sm:$0xf0]  ;;  %v6774_v16 = vld [vmem:[#allocation10 + $0x360] sm:$0xf] }
 0x310   :  { %v3334_v45 = vpop.f32.mrf.mxu0  ;;  %v3347_v46 = vpop.f32.mrf.mxu1  ;;  %v7314_v19 = vld [vmem:[#allocation10 + $0x26c] sm:$0xf0] }
 0x311   :  { %v3348_v42 = vadd.f32 %v3347_v46, %v3334_v45  ;;  %v3469_v62 = vrot.slane %v3468_v38, 2  ;;  %v3438_v2 = vadd.f32 %v3437_v48, %v3436_v52  ;;  %v7981_v45 = vmul.f32 %v3434_v15, %v7695_v49  ;;  %v7258_v52 = vld [vmem:[#allocation10 + $0xac] sm:$0xf0]  ;;  %4393 = vmatpush.bf16.msra.mxu1 %v6567_v25  ;;  %v6790_v15 = vld [vmem:[#allocation10 + $0x380] sm:$0xf] }
 0x312   :  { %v3466_v46 = vadd.f32 %v3465_v33, %v3464_v8 }
 0x313   :  { %v3470_v40 = vadd.f32 %v3469_v62, %v3468_v38  ;;  %v3439_v30 = vrot.slane %v3438_v2, 1 }
 0x315   :  { %v3471_v18 = vrot.slane %v3470_v40, 1  ;;  %v3440_v21 = vadd.f32 %v3439_v30, %v3438_v2  ;;  %v7350_v30 = vld [vmem:[#allocation10 + $0x38c] sm:$0xf0] }
 0x316   :  { %v6791_v6 = vor.u32 %v7350_v30, %v6790_v15 }
 0x317   :  { %v3472_v48 = vadd.f32 %v3471_v18, %v3470_v40  ;;  %v7984_v62 = vmul.f32 %v3440_v21, %v7695_v49  ;;  %v6534_v40 = vld [vmem:[#allocation10 + $0x180] sm:$0xf] }
 0x318   :  { %v3336_v20 = vpop.f32.mrf.mxu0  ;;  %v3349_v31 = vpop.f32.mrf.mxu1  ;;  %v6535_v29 = vor.u32 %v7286_v12, %v6534_v40 }
 0x319   :  { %v3360_v59 = vpop.f32.mrf.mxu2  ;;  %v3373_v55 = vpop.f32.mrf.mxu3  ;;  %v6678_v20 = vld [vmem:[#allocation10 + $0x2a0] sm:$0xf]  ;;  %v7322_v31 = vld [vmem:[#allocation10 + $0x2ac] sm:$0xf0]  ;;  %v3486_v28 = vmul.f32 %v3472_v48, %v7695_v49 }
 0x31a   :  { %v3361_v51 = vadd.f32 %v3360_v59, %v3348_v42  ;;  %v6823_v42 = vor.u32 %v7358_v57, %v6822_v44  ;;  %v6423_v59 = vor.u32 %v7258_v52, %v6422_v50  ;;  %v7246_v44 = vld [vmem:[#allocation10 + $0x4c] sm:$0xf0]  ;;  %v6630_v52 = vld [vmem:[#allocation10 + $0x240] sm:$0xf] }
 0x31b   :  { %v6375_v57 = vor.u32 %v7246_v44, %v6374_v53  ;;  %v7278_v50 = vld [vmem:[#allocation10 + $0x14c] sm:$0xf0]  ;;  %v6456_v44 = vld [vmem:[#allocation10 + $0xf0] sm:$0xf0] }
 0x31c   :  { %v7974_v63 = vadd.f32 %v3373_v55, %v3361_v51  ;;  %v6550_v55 = vld [vmem:[#allocation10 + $0x1a0] sm:$0xf]  ;;  %4419 = vmatpush.bf16.msra.mxu3 %v6823_v42  ;;  %4381 = vmatpush.bf16.msra.mxu0 %v6423_v59  ;;  %v7310_v42 = vld [vmem:[#allocation10 + $0x24c] sm:$0xf0] }
 0x31d   :  { %v6551_v51 = vor.u32 %v7290_v61, %v6550_v55  ;;  %v6758_v59 = vld [vmem:[#allocation10 + $0x340] sm:$0xf]  ;;  %v7342_v55 = vld [vmem:[#allocation10 + $0x34c] sm:$0xf0] }
 0x31e   :  { %v3441_v5 = vrot.slane %v7974_v63, 4  ;;  %v3459_v27 = vmul.f32 %v7974_v63, %v7974_v63 }
 0x31f   :  { %4394 = vmatpush.bf16.msra.mxu1 %v6551_v51 }
 0x320   :  { %v3442_v10 = vadd.f32 %v3441_v5, %v7974_v63  ;;  %v3473_v7 = vrot.slane %v3459_v27, 4  ;;  %v6679_v5 = vor.u32 %v7322_v31, %v6678_v20  ;;  %4382 = vmatpush.bf16.msra.mxu0 %v6407_v11  ;;  %v6631_v31 = vor.u32 %v7310_v42, %v6630_v52  ;;  %v7306_v11 = vld [vmem:[#allocation10 + $0x22c] sm:$0xf0]  ;;  %v6712_v52 = vld [vmem:[#allocation10 + $0x2f0] sm:$0xf0] }
 0x321   :  { %v3362_v22 = vpop.f32.mrf.mxu2  ;;  %v3375_v24 = vpop.f32.mrf.mxu3 }
 0x322   :  { %v3443_v36 = vrot.slane %v3442_v10, 2  ;;  %v3474_v4 = vadd.f32 %v3473_v7, %v3459_v27  ;;  %v7354_v27 = vld [vmem:[#allocation10 + $0x3ac] sm:$0xf0]  ;;  %v3489_v7 = vmul.f32 %v7981_v45, %v7981_v45  ;;  %v6662_v22 = vld [vmem:[#allocation10 + $0x280] sm:$0xf]  ;;  %4407 = vmatpush.bf16.msra.mxu2 %v6679_v5 }
 0x323   :  { %v6807_v8 = vor.u32 %v7354_v27, %v6806_v0  ;;  %v7318_v24 = vld [vmem:[#allocation10 + $0x28c] sm:$0xf0]  ;;  %4395 = vmatpush.bf16.msra.mxu1 %v6535_v29  ;;  %v6759_v0 = vor.u32 %v7342_v55, %v6758_v59  ;;  %v7360_v59 = vld [vmem:[#allocation10 + $0x3e4] sm:$0xf]  ;;  %v6840_v55 = vld [vmem:[#allocation10 + $0x3f0] sm:$0xf0] }
 0x324   :  { %v3444_v43 = vadd.f32 %v3443_v36, %v3442_v10  ;;  %v3475_v3 = vrot.slane %v3474_v4, 2  ;;  %v3485_v10 = vmul.f32 %v3466_v46, %v7695_v49  ;;  %v6663_v56 = vor.u32 %v7318_v24, %v6662_v22  ;;  %v6502_v46 = vld [vmem:[#allocation10 + $0x140] sm:$0xf]  ;;  %v7338_v29 = vld [vmem:[#allocation10 + $0x32c] sm:$0xf0] }
 0x325   :  { %v3490_v36 = vmul.f32 %v7984_v62, %v7984_v62  ;;  %4420 = vmatpush.bf16.msra.mxu3 %v6807_v8  ;;  %v6358_v8 = vld [vmem:[#allocation10 + $0x20] sm:$0xf] }
 0x326   :  { %v3445_v34 = vrot.slane %v3444_v43, 1  ;;  %v3476_v41 = vadd.f32 %v3475_v3, %v3474_v4  ;;  %v3493_v18 = vsub.f32 %v3485_v10, %v3489_v7  ;;  %v6518_v3 = vld [vmem:[#allocation10 + $0x160] sm:$0xf]  ;;  %4408 = vmatpush.bf16.msra.mxu2 %v6663_v56  ;;  %v6359_v40 = vor.u32 %v7242_v54, %v6358_v8  ;;  %v7274_v10 = vld [vmem:[#allocation10 + $0x12c] sm:$0xf0] }
 0x327   :  { %v6519_v14 = vor.u32 %v7282_v13, %v6518_v3  ;;  %v3494_v26 = vsub.f32 %v3486_v28, %v3490_v36  ;;  %v6614_v7 = vld [vmem:[#allocation10 + $0x220] sm:$0xf]  ;;  %v6487_v22 = vor.u32 %v7274_v10, %v6486_v9  ;;  %v7324_v8 = vld [vmem:[#allocation10 + $0x2c4] sm:$0xf]  ;;  %v6696_v9 = vld [vmem:[#allocation10 + $0x2d0] sm:$0xf0] }
 0x328   :  { %v3446_v23 = vadd.f32 %v3445_v34, %v3444_v43  ;;  %v3477_v38 = vrot.slane %v3476_v41, 1  ;;  %v6391_v43 = vor.u32 %v7250_v17, %v6390_v37  ;;  %v6647_v34 = vor.u32 %v7314_v19, %v6646_v35  ;;  %v6742_v28 = vld [vmem:[#allocation10 + $0x320] sm:$0xf]  ;;  %v7270_v17 = vld [vmem:[#allocation10 + $0x10c] sm:$0xf0] }
 0x329   :  { %4421 = vmatpush.bf16.msra.mxu3 %v6791_v6  ;;  %v3497_v47 = vmax.f32 %v3493_v18, 0.0  ;;  %4396 = vmatpush.bf16.msra.mxu1 %v6519_v14  ;;  %v3498_v61 = vmax.f32 %v3494_v26, 0.0  ;;  %v6615_v24 = vor.u32 %v7306_v11, %v6614_v7  ;;  %v6743_v30 = vor.u32 %v7338_v29, %v6742_v28  ;;  %v7238_v6 = vld [vmem:[#allocation10 + $0xc] sm:$0xf0]  ;;  %v6470_v37 = vld [vmem:[#allocation10 + $0x100] sm:$0xf] }
 0x32a   :  { %v7987_v1 = vmul.f32 %v3446_v23, %v7695_v49  ;;  %v3478_v2 = vadd.f32 %v3477_v38, %v3476_v41  ;;  %v7346_v41 = vld [vmem:[#allocation10 + $0x36c] sm:$0xf0]  ;;  %4383 = vmatpush.bf16.msra.mxu0 %v6391_v43  ;;  %4409 = vmatpush.bf16.msra.mxu2 %v6647_v34  ;;  %v6503_v38 = vor.u32 %v7278_v50, %v6502_v46  ;;  %v6598_v13 = vld [vmem:[#allocation10 + $0x200] sm:$0xf]  ;;  %v7264_v34 = vld [vmem:[#allocation10 + $0xe4] sm:$0xf] }
 0x32b   :  { %v6775_v25 = vor.u32 %v7346_v41, %v6774_v16  ;;  %v8000_v56 = vadd.f32 1e-05, %v3497_v47  ;;  %v8002_v15 = vadd.f32 1e-05, %v3498_v61  ;;  %v6471_v3 = vor.u32 %v7270_v17, %v6470_v37  ;;  %v7302_v14 = vld [vmem:[#allocation10 + $0x20c] sm:$0xf0] }
 0x32c   :  { %v3487_v4 = vmul.f32 %v3478_v2, %v7695_v49  ;;  %v3491_v32 = vmul.f32 %v7987_v1, %v7987_v1  ;;  %v6599_v16 = vor.u32 %v7302_v14, %v6598_v13  ;;  %v6726_v26 = vld [vmem:[#allocation10 + $0x300] sm:$0xf]  ;;  %v7296_v46 = vld [vmem:[#allocation10 + $0x1e4] sm:$0xf]  ;;  %v6459_v47 = vor.u32 %v7264_v34, %v6456_v44  ;;  %v6824_v10 = vld [vmem:[#allocation10 + $0x3d0] sm:$0xf0] }
 0x32d   :  { %4422 = vmatpush.bf16.msra.mxu3 %v6775_v25  ;;  %4397 = vmatpush.bf16.msra.mxu1 %v6503_v38  ;;  %v7328_v50 = vld [vmem:[#allocation10 + $0x2e4] sm:$0xf]  ;;  %7394 = vrsqrt.f32 %v8002_v15  ;;  %v6424_v28 = vld [vmem:[#allocation10 + $0xb0] sm:$0xf0]  ;;  %vm3521_vm0 = vweird.f32 %v8002_v15  ;;  %vm3511_vm10 = vweird.f32 %v8000_v56 }
 0x32e   :  { %v3495_v21 = vsub.f32 %v3487_v4, %v3491_v32  ;;  %4384 = vmatpush.bf16.msra.mxu0 %v6375_v57  ;;  %4410 = vmatpush.bf16.msra.mxu2 %v6631_v31  ;;  %v6342_v32 = vld [vmem:[#allocation10] sm:$0xf]  ;;  %v6584_v57 = vld [vmem:[#allocation10 + $0x1f0] sm:$0xf0]  ;;  %v6715_v61 = vor.u32 %v7328_v50, %v6712_v52  ;;  %v7292_v31 = vld [vmem:[#allocation10 + $0x1c4] sm:$0xf] }
 0x32f   :  { %v6587_v42 = vor.u32 %v7296_v46, %v6584_v57  ;;  %v7320_v17 = vld [vmem:[#allocation10 + $0x2a4] sm:$0xf]  ;;  %v6808_v14 = vld [vmem:[#allocation10 + $0x3b0] sm:$0xf0] }
 0x330   :  { %v3386_v33 = vpop.f32.mrf.mxu0  ;;  %v3399_v58 = vpop.f32.mrf.mxu1  ;;  %v3499_v48 = vmax.f32 %v3495_v21, 0.0  ;;  %v7334_v21 = vld [vmem:[#allocation10 + $0x30c] sm:$0xf0]  ;;  %v7284_v34 = vld [vmem:[#allocation10 + $0x184] sm:$0xf] }
 0x331   :  { %v3400_v23 = vadd.f32 %v3399_v58, %v3386_v33  ;;  %4423 = vmatpush.bf16.msra.mxu3 %v6759_v0  ;;  %v6343_v58 = vor.u32 %v7238_v6, %v6342_v32  ;;  %4398 = vmatpush.bf16.msra.mxu1 %v6487_v22  ;;  %v6727_v53 = vor.u32 %v7334_v21, %v6726_v26  ;;  %v6664_v46 = vld [vmem:[#allocation10 + $0x290] sm:$0xf0] }
 0x332   :  { %4385 = vmatpush.bf16.msra.mxu0 %v6359_v40  ;;  %v8007_v33 = vadd.f32 1e-05, %v3499_v48  ;;  %4411 = vmatpush.bf16.msra.mxu2 %v6615_v24  ;;  %v6843_v48 = vor.u32 %v7360_v59, %v6840_v55  ;;  %v7356_v40 = vld [vmem:[#allocation10 + $0x3c4] sm:$0xf]  ;;  %v6699_v22 = vor.u32 %v7324_v8, %v6696_v9  ;;  %v6792_v57 = vld [vmem:[#allocation10 + $0x390] sm:$0xf0] }
 0x333   :  { %v7256_v24 = vld [vmem:[#allocation10 + $0xa4] sm:$0xf]  ;;  %v6827_v29 = vor.u32 %v7356_v40, %v6824_v10  ;;  %v8013_v32 = vpop.eup %7394  ;;  %v6776_v8 = vld [vmem:[#allocation10 + $0x370] sm:$0xf0] }
 0x334   :  { %7396 = vrsqrt.f32 %v8007_v33  ;;  %v7248_v55 = vld [vmem:[#allocation10 + $0x64] sm:$0xf]  ;;  %vm3522_vm13 = vweird.f32 %v8013_v32  ;;  %vm3531_vm3 = vweird.f32 %v8007_v33 }
 0x335   :  { %4424 = vmatpush.bf16.msra.mxu3 %v6743_v30  ;;  %4399 = vmatpush.bf16.msra.mxu1 %v6471_v3  ;;  %7398 = vrsqrt.f32 %v8000_v56  ;;  %v6427_v30 = vor.u32 %v7256_v24, %v6424_v28  ;;  %v6376_v24 = vld [vmem:[#allocation10 + $0x50] sm:$0xf0]  ;;  %v7276_v28 = vld [vmem:[#allocation10 + $0x144] sm:$0xf]  ;;  %vm8045_vm2 = vmor %vm3521_vm0, %vm3522_vm13 }
 0x336   :  { %4386 = vmatpush.bf16.msra.mxu0 %v6343_v58  ;;  %4412 = vmatpush.bf16.msra.mxu2 %v6599_v16 }
 0x337   :  { %v3412_v51 = vpop.f32.mrf.mxu2  ;;  %v3425_v20 = vpop.f32.mrf.mxu3 }
 0x338   :  { %v3413_v2 = vadd.f32 %v3412_v51, %v3400_v23  ;;  %v3388_v5 = vpop.f32.mrf.mxu0  ;;  %v3401_v27 = vpop.f32.mrf.mxu1  ;;  %v7260_v51 = vld [vmem:[#allocation10 + $0xc4] sm:$0xf] }
 0x339   :  { %4425 = vmatpush.bf16.msra.mxu3 %v6727_v53  ;;  %4444 = vmatpush.bf16.msrb.mxu1 %v6587_v42  ;;  %v6568_v27 = vld [vmem:[#allocation10 + $0x1d0] sm:$0xf0]  ;;  %v3516_v53 = vmul.f32 %v8013_v32, %v8002_v15 }
 0x33a   :  { %v7998_v12 = vadd.f32 %v3425_v20, %v3413_v2  ;;  %4431 = vmatpush.bf16.msrb.mxu0 %v6459_v47  ;;  %v6440_v20 = vld [vmem:[#allocation10 + $0xd0] sm:$0xf0]  ;;  %4457 = vmatpush.bf16.msrb.mxu2 %v6715_v61  ;;  %v6571_v54 = vor.u32 %v7292_v31, %v6568_v27  ;;  %v8018_v3 = vpop.eup %7396  ;;  %v7348_v47 = vld [vmem:[#allocation10 + $0x384] sm:$0xf] }
 0x33b   :  { %v6443_v5 = vor.u32 %v7260_v51, %v6440_v20  ;;  %v3526_v50 = vmul.f32 %v8018_v3, %v8007_v33  ;;  %v6795_v59 = vor.u32 %v7348_v47, %v6792_v57  ;;  %v6392_v61 = vld [vmem:[#allocation10 + $0x70] sm:$0xf0]  ;;  %v7312_v31 = vld [vmem:[#allocation10 + $0x264] sm:$0xf]  ;;  %vm3532_vm1 = vweird.f32 %v8018_v3 }
 0x33c   :  { %v3447_v36 = vrot.slane %v7998_v12, 4  ;;  %v3460_v4 = vmul.f32 %v7998_v12, %v7998_v12  ;;  %v6520_v20 = vld [vmem:[#allocation10 + $0x170] sm:$0xf0]  ;;  %v7344_v27 = vld [vmem:[#allocation10 + $0x364] sm:$0xf]  ;;  %vm3533_vm6 = vmor %vm3531_vm3, %vm3532_vm1 }
 0x33d   :  { %4470 = vmatpush.bf16.msrb.mxu3 %v6843_v48  ;;  %4445 = vmatpush.bf16.msrb.mxu1 %v6571_v54  ;;  %v7280_v48 = vld [vmem:[#allocation10 + $0x164] sm:$0xf]  ;;  %v3527_v9 = vmul.f32 %v8018_v3, %v3526_v50 }
 0x33e   :  { %v3448_v18 = vadd.f32 %v3447_v36, %v7998_v12  ;;  %v3479_v43 = vrot.slane %v3460_v4, 4  ;;  %4432 = vmatpush.bf16.msrb.mxu0 %v6443_v5  ;;  %v7288_v36 = vld [vmem:[#allocation10 + $0x1a4] sm:$0xf]  ;;  %4458 = vmatpush.bf16.msrb.mxu2 %v6699_v22  ;;  %v6648_v5 = vld [vmem:[#allocation10 + $0x270] sm:$0xf0]  ;;  %v6523_v10 = vor.u32 %v7280_v48, %v6520_v20 }
 0x33f   :  { %v3414_v35 = vpop.f32.mrf.mxu2  ;;  %v3427_v19 = vpop.f32.mrf.mxu3  ;;  %v7244_v22 = vld [vmem:[#allocation10 + $0x44] sm:$0xf] }
 0x340   :  { %v3449_v41 = vrot.slane %v3448_v18, 2  ;;  %v3480_v25 = vadd.f32 %v3479_v43, %v3460_v4  ;;  %v6552_v4 = vld [vmem:[#allocation10 + $0x1b0] sm:$0xf0]  ;;  %v7352_v43 = vld [vmem:[#allocation10 + $0x3a4] sm:$0xf] }
 0x341   :  { %v6555_v37 = vor.u32 %v7288_v36, %v6552_v4  ;;  %4471 = vmatpush.bf16.msrb.mxu3 %v6827_v29  ;;  %v7252_v35 = vld [vmem:[#allocation10 + $0x84] sm:$0xf]  ;;  %v6408_v19 = vld [vmem:[#allocation10 + $0x90] sm:$0xf0]  ;;  %v6811_v21 = vor.u32 %v7352_v43, %v6808_v14  ;;  %v3528_v43 = vmul.f32 0.5, %v3527_v9 }
 0x342   :  { %v3450_v23 = vadd.f32 %v3449_v41, %v3448_v18  ;;  %v3481_v38 = vrot.slane %v3480_v25, 2  ;;  %v6680_v18 = vld [vmem:[#allocation10 + $0x2b0] sm:$0xf0]  ;;  %4433 = vmatpush.bf16.msrb.mxu0 %v6427_v30  ;;  %v6411_v44 = vor.u32 %v7252_v35, %v6408_v19  ;;  %v7308_v30 = vld [vmem:[#allocation10 + $0x244] sm:$0xf] }
 0x343   :  { %v6683_v13 = vor.u32 %v7320_v17, %v6680_v18  ;;  %v6536_v41 = vld [vmem:[#allocation10 + $0x190] sm:$0xf0]  ;;  %4446 = vmatpush.bf16.msrb.mxu1 %v6555_v37  ;;  %v7340_v37 = vld [vmem:[#allocation10 + $0x344] sm:$0xf]  ;;  %v3529_v50 = vsub.f32 1.5, %v3528_v43 }
 0x344   :  { %v3451_v0 = vrot.slane %v3450_v23, 1  ;;  %v3482_v2 = vadd.f32 %v3481_v38, %v3480_v25  ;;  %v7316_v25 = vld [vmem:[#allocation10 + $0x284] sm:$0xf]  ;;  %v8027_v38 = vpop.eup %7398  ;;  %v6504_v29 = vld [vmem:[#allocation10 + $0x150] sm:$0xf0] }
 0x345   :  { %4459 = vmatpush.bf16.msrb.mxu2 %v6683_v13  ;;  %4472 = vmatpush.bf16.msrb.mxu3 %v6811_v21  ;;  %v6667_v42 = vor.u32 %v7316_v25, %v6664_v46  ;;  %v3506_v54 = vmul.f32 %v8027_v38, %v8000_v56  ;;  %v6632_v36 = vld [vmem:[#allocation10 + $0x250] sm:$0xf0]  ;;  %v6507_v13 = vor.u32 %v7276_v28, %v6504_v29  ;;  %v7240_v19 = vld [vmem:[#allocation10 + $0x24] sm:$0xf]  ;;  %vm3512_vm5 = vweird.f32 %v8027_v38 }
 0x346   :  { %v3452_v7 = vadd.f32 %v3451_v0, %v3450_v23  ;;  %v3483_v11 = vrot.slane %v3482_v2, 1  ;;  %v6539_v23 = vor.u32 %v7284_v34, %v6536_v41  ;;  %v3517_v0 = vmul.f32 %v8013_v32, %v3516_v53  ;;  %4434 = vmatpush.bf16.msrb.mxu0 %v6411_v44  ;;  %v6760_v17 = vld [vmem:[#allocation10 + $0x350] sm:$0xf0]  ;;  %v7304_v34 = vld [vmem:[#allocation10 + $0x224] sm:$0xf]  ;;  %vm3513_vm11 = vmor %vm3511_vm10, %vm3512_vm5 }
 0x347   :  { %v3507_v18 = vmul.f32 %v8027_v38, %v3506_v54  ;;  %v6635_v14 = vor.u32 %v7308_v30, %v6632_v36  ;;  %v6763_v35 = vor.u32 %v7340_v37, %v6760_v17  ;;  %v6488_v21 = vld [vmem:[#allocation10 + $0x130] sm:$0xf0]  ;;  %v7336_v44 = vld [vmem:[#allocation10 + $0x324] sm:$0xf] }
 0x348   :  { %v8016_v6 = vmul.f32 %v3452_v7, %v7695_v49  ;;  %v3484_v58 = vadd.f32 %v3483_v11, %v3482_v2  ;;  %v6395_v2 = vor.u32 %v7248_v55, %v6392_v61  ;;  %4447 = vmatpush.bf16.msrb.mxu1 %v6539_v23  ;;  %v6651_v7 = vor.u32 %v7312_v31, %v6648_v5  ;;  %v6616_v41 = vld [vmem:[#allocation10 + $0x230] sm:$0xf0]  ;;  %v7236_v55 = vld [vmem:[#allocation10 + $0x4] sm:$0xf] }
 0x349   :  { %4460 = vmatpush.bf16.msrb.mxu2 %v6667_v42  ;;  %4473 = vmatpush.bf16.msrb.mxu3 %v6795_v59  ;;  %v6779_v11 = vor.u32 %v7344_v27, %v6776_v8  ;;  %v3518_v4 = vmul.f32 0.5, %v3517_v0  ;;  %v6744_v46 = vld [vmem:[#allocation10 + $0x330] sm:$0xf0]  ;;  %v3508_v57 = vmul.f32 0.5, %v3507_v18  ;;  %v6619_v42 = vor.u32 %v7304_v34, %v6616_v41  ;;  %v7268_v48 = vld [vmem:[#allocation10 + $0x104] sm:$0xf] }
 0x34a   :  { %v3488_v16 = vmul.f32 %v3484_v58, %v7695_v49  ;;  %v3492_v26 = vmul.f32 %v8016_v6, %v8016_v6  ;;  %4435 = vmatpush.bf16.msrb.mxu0 %v6395_v2  ;;  %v6379_v58 = vor.u32 %v7244_v22, %v6376_v24  ;;  %v6747_v59 = vor.u32 %v7336_v44, %v6744_v46  ;;  %v6344_v61 = vld [vmem:[#allocation10 + $0x10] sm:$0xf0]  ;;  %v7300_v20 = vld [vmem:[#allocation10 + $0x204] sm:$0xf]  ;;  %v7263_v24 = vld [vmem:[#allocation10 + $0xd4] sm:$0xf0] }
 0x34b   :  { %v3519_v25 = vsub.f32 1.5, %v3518_v4  ;;  %v6347_v2 = vor.u32 %v7236_v55, %v6344_v61  ;;  %v6600_v5 = vld [vmem:[#allocation10 + $0x210] sm:$0xf0]  ;;  %v7332_v27 = vld [vmem:[#allocation10 + $0x304] sm:$0xf]  ;;  %v3509_v54 = vsub.f32 1.5, %v3508_v57 }
 0x34c   :  { %v3496_v52 = vsub.f32 %v3488_v16, %v3492_v26  ;;  %4448 = vmatpush.bf16.msrb.mxu1 %v6523_v10  ;;  %v6360_v16 = vld [vmem:[#allocation10 + $0x30] sm:$0xf0]  ;;  %v7272_v26 = vld [vmem:[#allocation10 + $0x124] sm:$0xf]  ;;  %v3530_v10 = vmul.f32 %v8018_v3, %v3529_v50 }
 0x34d   :  { %4461 = vmatpush.bf16.msrb.mxu2 %v6651_v7  ;;  %4474 = vmatpush.bf16.msrb.mxu3 %v6779_v11  ;;  %v6363_v53 = vor.u32 %v7240_v19, %v6360_v16  ;;  %v3520_v31 = vmul.f32 %v8013_v32, %v3519_v25  ;;  %v6728_v8 = vld [vmem:[#allocation10 + $0x310] sm:$0xf0]  ;;  %v6603_v11 = vor.u32 %v7300_v20, %v6600_v5  ;;  %v2446_v37 = vld [vmem:[#allocation11 + $0x2] ss:$8 sm:$0xf] }
 0x34e   :  { %v3500_v51 = vmax.f32 %v3496_v52, 0.0  ;;  %4436 = vmatpush.bf16.msrb.mxu0 %v6379_v58  ;;  %v6491_v52 = vor.u32 %v7272_v26, %v6488_v21  ;;  %v6731_v22 = vor.u32 %v7332_v27, %v6728_v8  ;;  %v3510_v29 = vmul.f32 %v8027_v38, %v3509_v54  ;;  %v2448_v25 = vld [vmem:[#allocation11 + $0x6] ss:$8 sm:$0xf]  ;;  %v6590_v20 = vld [vmem:[#allocation10 + $0x1e8] sm:$0xf] }
 0x34f   :  { %v3524_v15 = vsel %vm8045_vm2, %v8013_v32, %v3520_v31  ;;  %v3534_v30 = vsel %vm3533_vm6, %v8018_v3, %v3530_v10  ;;  %v7299_v31 = vld [vmem:[#allocation10 + $0x1f4] sm:$0xf0] }
 0x350   :  { %v8033_v40 = vadd.f32 1e-05, %v3500_v51  ;;  %4449 = vmatpush.bf16.msrb.mxu1 %v6507_v13  ;;  %v6472_v51 = vld [vmem:[#allocation10 + $0x110] sm:$0xf0]  ;;  %v3549_v33 = vrot.slane %v3524_v15, 7  ;;  %v3550_v4 = vrot.slane %v3534_v30, 6  ;;  %v3514_v17 = vsel %vm3513_vm11, %v8027_v38, %v3510_v29 }
 0x351   :  { %4462 = vmatpush.bf16.msrb.mxu2 %v6635_v14  ;;  %4475 = vmatpush.bf16.msrb.mxu3 %v6763_v35  ;;  %v6475_v9 = vor.u32 %v7268_v48, %v6472_v51  ;;  %v7267_v51 = vld [vmem:[#allocation10 + $0xf4] sm:$0xf0]  ;;  %v6591_v54 = vor.u32 %v7299_v31, %v6590_v20  ;;  %v6574_v29 = vld [vmem:[#allocation10 + $0x1c8] sm:$0xf] }
 0x352   :  { %7400 = vrsqrt.f32 %v8033_v40  ;;  %4437 = vmatpush.bf16.msrb.mxu0 %v6363_v53  ;;  %vm3541_vm8 = vweird.f32 %v8033_v40  ;;  %v3552_v18 = vsel %vm1233_vm7, %v3514_v17, %v3549_v33  ;;  %v7295_v30 = vld [vmem:[#allocation10 + $0x1d4] sm:$0xf0]  ;;  %v6430_v17 = vld [vmem:[#allocation10 + $0xa8] sm:$0xf] }
 0x353   :  { %v7327_v33 = vld [vmem:[#allocation10 + $0x2d4] sm:$0xf0]  ;;  %v6382_v31 = vld [vmem:[#allocation10 + $0x48] sm:$0xf] }
 0x354   :  { %4450 = vmatpush.bf16.msrb.mxu1 %v6491_v52 }
 0x355   :  { %4463 = vmatpush.bf16.msrb.mxu2 %v6619_v42  ;;  %4476 = vmatpush.bf16.msrb.mxu3 %v6747_v59  ;;  %v6462_v42 = vld [vmem:[#allocation10 + $0xe8] sm:$0xf] }
 0x356   :  { %4438 = vmatpush.bf16.msrb.mxu0 %v6347_v2  ;;  %v6846_v2 = vld [vmem:[#allocation10 + $0x3e8] sm:$0xf]  ;;  %v6463_v8 = vor.u32 %v7267_v51, %v6462_v42  ;;  %v7283_v42 = vld [vmem:[#allocation10 + $0x174] sm:$0xf0] }
 0x358   :  { %v7401_v47 = vpop.eup %7400  ;;  %4451 = vmatpush.bf16.msrb.mxu1 %v6475_v9 }
 0x359   :  { %v3536_v23 = vmul.f32 %v7401_v47, %v8033_v40  ;;  %vm3542_vm4 = vweird.f32 %v7401_v47  ;;  %4464 = vmatpush.bf16.msrb.mxu2 %v6603_v11  ;;  %4477 = vmatpush.bf16.msrb.mxu3 %v6731_v22  ;;  %v6446_v22 = vld [vmem:[#allocation10 + $0xc8] sm:$0xf] }
 0x35a   :  { %vm3543_vm9 = vmor %vm3541_vm8, %vm3542_vm4 }
 0x35b   :  { %v3537_v0 = vmul.f32 %v7401_v47, %v3536_v23 }
 0x35d   :  { %v3538_v7 = vmul.f32 0.5, %v3537_v0  ;;  %v6718_v0 = vld [vmem:[#allocation10 + $0x2e8] sm:$0xf] }
 0x35f   :  { %v3539_v28 = vsub.f32 1.5, %v3538_v7 }
 0x361   :  { %v3540_v36 = vmul.f32 %v7401_v47, %v3539_v28 }
 0x363   :  { %v3544_v32 = vsel %vm3543_vm9, %v7401_v47, %v3540_v36  ;;  %v6702_v36 = vld [vmem:[#allocation10 + $0x2c8] sm:$0xf] }
 0x364   :  { %v3551_v58 = vrot.slane %v3544_v32, 5  ;;  %v6830_v32 = vld [vmem:[#allocation10 + $0x3c8] sm:$0xf] }
 0x366   :  { %v3553_v3 = vsel %vm1235_vm14, %v3550_v4, %v3551_v58  ;;  %v7359_v4 = vld [vmem:[#allocation10 + $0x3d4] sm:$0xf0]  ;;  %v6447_v58 = vor.u32 %v7263_v24, %v6446_v22  ;;  %v6366_v24 = vld [vmem:[#allocation10 + $0x28] sm:$0xf] }
 0x367   :  { %v3554_v43 = vsel %vm1237_vm15, %v3552_v18, %v3553_v3  ;;  %v7259_v18 = vld [vmem:[#allocation10 + $0xb4] sm:$0xf0]  ;;  %v6703_v3 = vor.u32 %v7327_v33, %v6702_v36  ;;  %v6622_v33 = vld [vmem:[#allocation10 + $0x228] sm:$0xf] }
 0x368   :  { %v3556_v40 = vmul.f32 %v3554_v43, %v2446_v37  ;;  %v6575_v37 = vor.u32 %v7295_v30, %v6574_v29  ;;  %v6831_v43 = vor.u32 %v7359_v4, %v6830_v32  ;;  %v6494_v30 = vld [vmem:[#allocation10 + $0x128] sm:$0xf]  ;;  %v7275_v36 = vld [vmem:[#allocation10 + $0x134] sm:$0xf0] }
 0x369   :  { %v7307_v32 = vld [vmem:[#allocation10 + $0x234] sm:$0xf0]  ;;  %v6750_v4 = vld [vmem:[#allocation10 + $0x328] sm:$0xf] }
 0x36a   :  { %v3558_v13 = vperm.slane %v3556_v40, 0  ;;  %v3559_v14 = vperm.slane %v3556_v40, 1  ;;  %v3560_v35 = vperm.slane %v3556_v40, 2  ;;  %v3561_v19 = vperm.slane %v3556_v40, 3  ;;  %v6558_v40 = vld [vmem:[#allocation10 + $0x1a8] sm:$0xf] }
 0x36c   :  { %v3567_v56 = vmul.f32 %v3559_v14, %v7984_v62  ;;  %v3568_v16 = vmul.f32 %v3560_v35, %v7987_v1  ;;  %v3569_v26 = vmul.f32 %v3561_v19, %v8016_v6  ;;  %v3566_v21 = vmul.f32 %v3558_v13, %v7981_v45 }
 0x36d   :  { %v3585_v57 = vmul.f32 %v3561_v19, %v7998_v12  ;;  %v3582_v62 = vmul.f32 %v3558_v13, %v7962_v60  ;;  %v3583_v1 = vmul.f32 %v3559_v14, %v7964_v39  ;;  %v3584_v6 = vmul.f32 %v3560_v35, %v7974_v63  ;;  %v7331_v12 = vld [vmem:[#allocation10 + $0x2f4] sm:$0xf0]  ;;  %v6686_v14 = vld [vmem:[#allocation10 + $0x2a8] sm:$0xf] }
 0x36e   :  { %v3574_v38 = vrot.slane %v3567_v56, 7  ;;  %v3575_v34 = vrot.slane %v3568_v16, 6  ;;  %v3576_v41 = vrot.slane %v3569_v26, 5  ;;  %v7363_v63 = vld [vmem:[#allocation10 + $0x3f4] sm:$0xf0]  ;;  %v6719_v15 = vor.u32 %v7331_v12, %v6718_v0 }
 0x36f   :  { %v6847_v28 = vor.u32 %v7363_v63, %v6846_v2  ;;  %v7291_v13 = vld [vmem:[#allocation10 + $0x1b4] sm:$0xf0]  ;;  %v6814_v19 = vld [vmem:[#allocation10 + $0x3a8] sm:$0xf]  ;;  %v6431_v16 = vor.u32 %v7259_v18, %v6430_v17  ;;  %v6495_v18 = vor.u32 %v7275_v36, %v6494_v30  ;;  %v7285_v36 = vld [vmem:[#allocation10 + $0x18c] sm:$0xf] }
 0x370   :  { %v3577_v53 = vsel %vm1233_vm7, %v3566_v21, %v3574_v38  ;;  %v3578_v44 = vsel %vm1235_vm14, %v3575_v34, %v3576_v41  ;;  %v7323_v35 = vld [vmem:[#allocation10 + $0x2b4] sm:$0xf0]  ;;  %v6559_v26 = vor.u32 %v7291_v13, %v6558_v40  ;;  %v6414_v21 = vld [vmem:[#allocation10 + $0x88] sm:$0xf]  ;;  %v6623_v13 = vor.u32 %v7307_v32, %v6622_v33  ;;  %v6544_v33 = vld [vmem:[#allocation10 + $0x198] sm:$0xf0] }
 0x371   :  { %v3579_v46 = vsel %vm1237_vm15, %v3577_v53, %v3578_v44  ;;  %v7355_v56 = vld [vmem:[#allocation10 + $0x3b4] sm:$0xf0]  ;;  %v6687_v34 = vor.u32 %v7323_v35, %v6686_v14  ;;  %v6670_v44 = vld [vmem:[#allocation10 + $0x288] sm:$0xf]  ;;  %v7317_v32 = vld [vmem:[#allocation10 + $0x28c] sm:$0xf] }
 0x372   :  { %v3581_v47 = vsub.f32 %v2448_v25, %v3579_v46  ;;  %v7255_v38 = vld [vmem:[#allocation10 + $0x94] sm:$0xf0]  ;;  %v6815_v41 = vor.u32 %v7355_v56, %v6814_v19  ;;  %v6542_v25 = vld [vmem:[#allocation10 + $0x188] sm:$0xf] }
 0x373   :  { %v7287_v53 = vld [vmem:[#allocation10 + $0x194] sm:$0xf0]  ;;  %v6766_v63 = vld [vmem:[#allocation10 + $0x348] sm:$0xf] }
 0x374   :  { %v3590_v45 = vperm.slane %v3581_v47, 3  ;;  %v3587_v50 = vperm.slane %v3581_v47, 0  ;;  %v3588_v52 = vperm.slane %v3581_v47, 1  ;;  %v3589_v23 = vperm.slane %v3581_v47, 2  ;;  %v7319_v46 = vld [vmem:[#allocation10 + $0x294] sm:$0xf0] }
 0x375   :  { %v6798_v47 = vld [vmem:[#allocation10 + $0x388] sm:$0xf]  ;;  %v7247_v0 = vld [vmem:[#allocation10 + $0x54] sm:$0xf0] }
 0x376   :  { %v3598_v59 = vadd.f32 %v3590_v45, %v3585_v57  ;;  %v3595_v55 = vadd.f32 %v3587_v50, %v3582_v62  ;;  %v3596_v61 = vadd.f32 %v3588_v52, %v3583_v1  ;;  %v3597_v48 = vadd.f32 %v3589_v23, %v3584_v6  ;;  %v7351_v57 = vld [vmem:[#allocation10 + $0x394] sm:$0xf0]  ;;  %v6398_v6 = vld [vmem:[#allocation10 + $0x68] sm:$0xf] }
 0x377   :  { %v6415_v62 = vor.u32 %v7255_v38, %v6414_v21  ;;  %v6543_v1 = vor.u32 %v7287_v53, %v6542_v25  ;;  %v7251_v45 = vld [vmem:[#allocation10 + $0x74] sm:$0xf0]  ;;  %v6671_v50 = vor.u32 %v7319_v46, %v6670_v44  ;;  %v6799_v52 = vor.u32 %v7351_v57, %v6798_v47  ;;  %v6526_v23 = vld [vmem:[#allocation10 + $0x168] sm:$0xf]  ;;  %v6464_v21 = vld [vmem:[#allocation10 + $0xf8] sm:$0xf0] }
 0x378   :  { %v3602_v60 = vmax.f32 %v3598_v59, 0.0  ;;  %v3599_v5 = vmax.f32 %v3595_v55, 0.0  ;;  %v3600_v39 = vmax.f32 %v3596_v61, 0.0  ;;  %v3601_v27 = vmax.f32 %v3597_v48, 0.0  ;;  %v6654_v59 = vld [vmem:[#allocation10 + $0x268] sm:$0xf] }
 0x379   :  { %v7315_v55 = vld [vmem:[#allocation10 + $0x274] sm:$0xf0]  ;;  %v6782_v61 = vld [vmem:[#allocation10 + $0x368] sm:$0xf]  ;;  %v6399_v51 = vor.u32 %v7251_v45, %v6398_v6  ;;  %v6527_v20 = vor.u32 %v7283_v42, %v6526_v23  ;;  %v7297_v38 = vld [vmem:[#allocation10 + $0x1ec] sm:$0xf] }
 0x37a   :  { %v8075_v9 = vpack.c.bf16 %v3602_v60, %v3602_v60  ;;  %v8077_v10 = vpack.c.bf16 %v3599_v5, %v3599_v5  ;;  %v8079_v7 = vpack.c.bf16 %v3600_v39, %v3600_v39  ;;  %v8081_v11 = vpack.c.bf16 %v3601_v27, %v3601_v27  ;;  %v7347_v48 = vld [vmem:[#allocation10 + $0x374] sm:$0xf0]  ;;  %v6510_v60 = vld [vmem:[#allocation10 + $0x148] sm:$0xf]  ;;  %v6720_v44 = vld [vmem:[#allocation10 + $0x2f8] sm:$0xf0] }
 0x37b   :  { %v6655_v12 = vor.u32 %v7315_v55, %v6654_v59  ;;  %v6783_v2 = vor.u32 %v7347_v48, %v6782_v61  ;;  %v7279_v5 = vld [vmem:[#allocation10 + $0x154] sm:$0xf0]  ;;  %v6638_v39 = vld [vmem:[#allocation10 + $0x248] sm:$0xf]  ;;  %v7361_v46 = vld [vmem:[#allocation10 + $0x3ec] sm:$0xf] }
 0x37c   :  { %4387 = vmatmul.bf16.vlgmr.msra.gmra.mxu0 %v8077_v10  ;;  %4400 = vmatmul.bf16.vlgmr.msra.gmra.mxu1 %v8079_v7  ;;  %v7311_v27 = vld [vmem:[#allocation10 + $0x254] sm:$0xf0]  ;;  %v6511_v22 = vor.u32 %v7279_v5, %v6510_v60  ;;  %v6606_v35 = vld [vmem:[#allocation10 + $0x208] sm:$0xf]  ;;  %v6848_v47 = vld [vmem:[#allocation10 + $0x3f8] sm:$0xf0] }
 0x37d   :  { %4413 = vmatmul.bf16.vlgmr.msra.gmra.mxu2 %v8081_v11  ;;  %4426 = vmatmul.bf16.vlgmr.msra.gmra.mxu3 %v8075_v9  ;;  %v7271_v40 = vld [vmem:[#allocation10 + $0x114] sm:$0xf0]  ;;  %v6734_v56 = vld [vmem:[#allocation10 + $0x308] sm:$0xf]  ;;  %v7261_v45 = vld [vmem:[#allocation10 + $0xcc] sm:$0xf]  ;;  %v6851_v23 = vor.u32 %v7361_v46, %v6848_v47 }
 0x37e   :  { %4483 = vmatpush.bf16.msra.mxu0 %v6463_v8  ;;  %4496 = vmatpush.bf16.msra.mxu1 %v6591_v54  ;;  %v7343_v8 = vld [vmem:[#allocation10 + $0x354] sm:$0xf0]  ;;  %v6383_v54 = vor.u32 %v7247_v0, %v6382_v31  ;;  %v7293_v42 = vld [vmem:[#allocation10 + $0x1cc] sm:$0xf]  ;;  %v6576_v59 = vld [vmem:[#allocation10 + $0x1d8] sm:$0xf0] }
 0x37f   :  { %4509 = vmatpush.bf16.msra.mxu2 %v6719_v15  ;;  %4522 = vmatpush.bf16.msra.mxu3 %v6847_v28  ;;  %v7243_v15 = vld [vmem:[#allocation10 + $0x34] sm:$0xf0]  ;;  %v6639_v28 = vor.u32 %v7311_v27, %v6638_v39  ;;  %v6767_v29 = vor.u32 %v7343_v8, %v6766_v63  ;;  %v7325_v55 = vld [vmem:[#allocation10 + $0x2cc] sm:$0xf]  ;;  %v6704_v61 = vld [vmem:[#allocation10 + $0x2d8] sm:$0xf0]  ;;  %v6579_v31 = vor.u32 %v7293_v42, %v6576_v59 }
 0x380   :  { %v6367_v17 = vor.u32 %v7243_v15, %v6366_v24  ;;  %v7303_v19 = vld [vmem:[#allocation10 + $0x214] sm:$0xf0]  ;;  %v7357_v48 = vld [vmem:[#allocation10 + $0x3cc] sm:$0xf]  ;;  %v6560_v39 = vld [vmem:[#allocation10 + $0x1b8] sm:$0xf0] }
 0x381   :  { %v6607_v57 = vor.u32 %v7303_v19, %v6606_v35  ;;  %v7257_v0 = vld [vmem:[#allocation10 + $0xac] sm:$0xf]  ;;  %v6688_v63 = vld [vmem:[#allocation10 + $0x2b8] sm:$0xf0] }
 0x382   :  { %4484 = vmatpush.bf16.msra.mxu0 %v6447_v58  ;;  %4497 = vmatpush.bf16.msra.mxu1 %v6575_v37  ;;  %v7339_v58 = vld [vmem:[#allocation10 + $0x334] sm:$0xf0]  ;;  %v6350_v37 = vld [vmem:[#allocation10 + $0x8] sm:$0xf]  ;;  %v7289_v5 = vld [vmem:[#allocation10 + $0x1ac] sm:$0xf] }
 0x383   :  { %4510 = vmatpush.bf16.msra.mxu2 %v6703_v3  ;;  %4523 = vmatpush.bf16.msra.mxu3 %v6831_v43  ;;  %v7239_v3 = vld [vmem:[#allocation10 + $0x14] sm:$0xf0]  ;;  %v6478_v43 = vld [vmem:[#allocation10 + $0x108] sm:$0xf]  ;;  %v6751_v14 = vor.u32 %v7339_v58, %v6750_v4  ;;  %v7321_v27 = vld [vmem:[#allocation10 + $0x2ac] sm:$0xf]  ;;  %v6563_v24 = vor.u32 %v7289_v5, %v6560_v39 }
 0x384   :  { %v6351_v25 = vor.u32 %v7239_v3, %v6350_v37  ;;  %v6479_v53 = vor.u32 %v7271_v40, %v6478_v43  ;;  %v7353_v8 = vld [vmem:[#allocation10 + $0x3ac] sm:$0xf]  ;;  %v6672_v4 = vld [vmem:[#allocation10 + $0x298] sm:$0xf0] }
 0x385   :  { %v7253_v15 = vld [vmem:[#allocation10 + $0x8c] sm:$0xf]  ;;  %v6800_v37 = vld [vmem:[#allocation10 + $0x398] sm:$0xf0]  ;;  %v6675_v40 = vor.u32 %v7317_v32, %v6672_v4 }
 0x386   :  { %4485 = vmatpush.bf16.msra.mxu0 %v6431_v16  ;;  %4498 = vmatpush.bf16.msra.mxu1 %v6559_v26  ;;  %v7335_v16 = vld [vmem:[#allocation10 + $0x314] sm:$0xf0]  ;;  %v7265_v26 = vld [vmem:[#allocation10 + $0xec] sm:$0xf]  ;;  %v6400_v43 = vld [vmem:[#allocation10 + $0x78] sm:$0xf0] }
 0x387   :  { %4511 = vmatpush.bf16.msra.mxu2 %v6687_v34  ;;  %4524 = vmatpush.bf16.msra.mxu3 %v6815_v41  ;;  %v6592_v34 = vld [vmem:[#allocation10 + $0x1f8] sm:$0xf0]  ;;  %v7329_v41 = vld [vmem:[#allocation10 + $0x2ec] sm:$0xf] }
 0x388   :  { %v6595_v6 = vor.u32 %v7297_v38, %v6592_v34  ;;  %v7349_v58 = vld [vmem:[#allocation10 + $0x38c] sm:$0xf]  ;;  %v6528_v35 = vld [vmem:[#allocation10 + $0x178] sm:$0xf0] }
 0x389   :  { %v7249_v3 = vld [vmem:[#allocation10 + $0x6c] sm:$0xf]  ;;  %v6512_v46 = vld [vmem:[#allocation10 + $0x158] sm:$0xf0] }
 0x38a   :  { %4486 = vmatpush.bf16.msra.mxu0 %v6415_v62  ;;  %4499 = vmatpush.bf16.msra.mxu1 %v6543_v1  ;;  %v6735_v62 = vor.u32 %v7335_v16, %v6734_v56  ;;  %v6467_v1 = vor.u32 %v7265_v26, %v6464_v21  ;;  %v7313_v19 = vld [vmem:[#allocation10 + $0x26c] sm:$0xf]  ;;  %v6656_v56 = vld [vmem:[#allocation10 + $0x278] sm:$0xf0]  ;;  %v6403_v21 = vor.u32 %v7249_v3, %v6400_v43 }
 0x38b   :  { %4512 = vmatpush.bf16.msra.mxu2 %v6671_v50  ;;  %4525 = vmatpush.bf16.msra.mxu3 %v6799_v52  ;;  %v6448_v50 = vld [vmem:[#allocation10 + $0xd8] sm:$0xf0]  ;;  %v6723_v52 = vor.u32 %v7329_v41, %v6720_v44  ;;  %v7345_v16 = vld [vmem:[#allocation10 + $0x36c] sm:$0xf] }
 0x38c   :  { %4439 = vmatmul.bf16.vlgmr.msrb.gmra.mxu0 %v8077_v10  ;;  %4452 = vmatmul.bf16.vlgmr.msrb.gmra.mxu1 %v8079_v7  ;;  %v6784_v26 = vld [vmem:[#allocation10 + $0x378] sm:$0xf0]  ;;  %v7245_v34 = vld [vmem:[#allocation10 + $0x4c] sm:$0xf] }
 0x38d   :  { %4465 = vmatmul.bf16.vlgmr.msrb.gmra.mxu2 %v8081_v11  ;;  %4478 = vmatmul.bf16.vlgmr.msrb.gmra.mxu3 %v8075_v9  ;;  %v6384_v41 = vld [vmem:[#allocation10 + $0x58] sm:$0xf0]  ;;  %v7277_v44 = vld [vmem:[#allocation10 + $0x14c] sm:$0xf] }
 0x38e   :  { %4487 = vmatpush.bf16.msra.mxu0 %v6399_v51  ;;  %4500 = vmatpush.bf16.msra.mxu1 %v6527_v20  ;;  %v6832_v51 = vld [vmem:[#allocation10 + $0x3d8] sm:$0xf0]  ;;  %v6451_v20 = vor.u32 %v7261_v45, %v6448_v50  ;;  %v7309_v47 = vld [vmem:[#allocation10 + $0x24c] sm:$0xf]  ;;  %v6515_v45 = vor.u32 %v7277_v44, %v6512_v46 }
 0x38f   :  { %4513 = vmatpush.bf16.msra.mxu2 %v6655_v12  ;;  %4526 = vmatpush.bf16.msra.mxu3 %v6783_v2  ;;  %v6432_v12 = vld [vmem:[#allocation10 + $0xb8] sm:$0xf0]  ;;  %v6707_v2 = vor.u32 %v7325_v55, %v6704_v61  ;;  %v6835_v60 = vor.u32 %v7357_v48, %v6832_v51  ;;  %v7241_v50 = vld [vmem:[#allocation10 + $0x2c] sm:$0xf] }
 0x390   :  { %v7273_v59 = vld [vmem:[#allocation10 + $0x12c] sm:$0xf]  ;;  %v6496_v55 = vld [vmem:[#allocation10 + $0x138] sm:$0xf0] }
 0x391   :  { %v7305_v61 = vld [vmem:[#allocation10 + $0x22c] sm:$0xf]  ;;  %v6624_v48 = vld [vmem:[#allocation10 + $0x238] sm:$0xf0] }
 0x392   :  { %4488 = vmatpush.bf16.msra.mxu0 %v6383_v54  ;;  %4501 = vmatpush.bf16.msra.mxu1 %v6511_v22  ;;  %v6816_v54 = vld [vmem:[#allocation10 + $0x3b8] sm:$0xf0]  ;;  %v6435_v22 = vor.u32 %v7257_v0, %v6432_v12  ;;  %v7337_v51 = vld [vmem:[#allocation10 + $0x32c] sm:$0xf]  ;;  %v6499_v0 = vor.u32 %v7273_v59, %v6496_v55 }
 0x393   :  { %4514 = vmatpush.bf16.msra.mxu2 %v6639_v28  ;;  %4527 = vmatpush.bf16.msra.mxu3 %v6767_v29  ;;  %v6416_v28 = vld [vmem:[#allocation10 + $0x98] sm:$0xf0]  ;;  %v6691_v29 = vor.u32 %v7321_v27, %v6688_v63  ;;  %v6819_v30 = vor.u32 %v7353_v8, %v6816_v54  ;;  %v7237_v12 = vld [vmem:[#allocation10 + $0xc] sm:$0xf] }
 0x394   :  { %v7269_v39 = vld [vmem:[#allocation10 + $0x10c] sm:$0xf]  ;;  %v6480_v27 = vld [vmem:[#allocation10 + $0x118] sm:$0xf0] }
 0x395   :  { %v7301_v63 = vld [vmem:[#allocation10 + $0x20c] sm:$0xf]  ;;  %v6608_v8 = vld [vmem:[#allocation10 + $0x218] sm:$0xf0] }
 0x396   :  { %4489 = vmatpush.bf16.msra.mxu0 %v6367_v17  ;;  %4502 = vmatpush.bf16.msra.mxu1 %v6495_v18  ;;  %v6419_v17 = vor.u32 %v7253_v15, %v6416_v28  ;;  %v6547_v18 = vor.u32 %v7285_v36, %v6544_v33  ;;  %v7333_v54 = vld [vmem:[#allocation10 + $0x30c] sm:$0xf]  ;;  %v6483_v15 = vor.u32 %v7269_v39, %v6480_v27 }
 0x397   :  { %4515 = vmatpush.bf16.msra.mxu2 %v6623_v13  ;;  %4528 = vmatpush.bf16.msra.mxu3 %v6751_v14  ;;  %v6803_v13 = vor.u32 %v7349_v58, %v6800_v37  ;;  %v7281_v14 = vld [vmem:[#allocation10 + $0x16c] sm:$0xf]  ;;  %v6611_v28 = vor.u32 %v7301_v63, %v6608_v8 }
 0x398   :  { %v6531_v38 = vor.u32 %v7281_v14, %v6528_v35 }
 0x39a   :  { %4490 = vmatpush.bf16.msra.mxu0 %v6351_v25  ;;  %4503 = vmatpush.bf16.msra.mxu1 %v6479_v53  ;;  %v6659_v25 = vor.u32 %v7313_v19, %v6656_v56  ;;  %v6787_v53 = vor.u32 %v7345_v16, %v6784_v26 }
 0x39b   :  { %4516 = vmatpush.bf16.msra.mxu2 %v6607_v57  ;;  %4529 = vmatpush.bf16.msra.mxu3 %v6735_v62  ;;  %v6640_v57 = vld [vmem:[#allocation10 + $0x258] sm:$0xf0]  ;;  %v7341_v62 = vld [vmem:[#allocation10 + $0x34c] sm:$0xf] }
 0x39d   :  { %4491 = vmatmul.bf16.vlgmr.msra.gmra.mxu0 %v8077_v10  ;;  %4504 = vmatmul.bf16.vlgmr.msra.gmra.mxu1 %v8079_v7 }
 0x39e   :  { %4535 = vmatpush.bf16.msrb.mxu0 %v6467_v1  ;;  %4548 = vmatpush.bf16.msrb.mxu1 %v6595_v6  ;;  %v6768_v1 = vld [vmem:[#allocation10 + $0x358] sm:$0xf0]  ;;  %v6387_v6 = vor.u32 %v7245_v34, %v6384_v41 }
 0x39f   :  { %4561 = vmatpush.bf16.msrb.mxu2 %v6723_v52  ;;  %4574 = vmatpush.bf16.msrb.mxu3 %v6851_v23  ;;  %v6368_v52 = vld [vmem:[#allocation10 + $0x38] sm:$0xf0]  ;;  %v6643_v23 = vor.u32 %v7309_v47, %v6640_v57  ;;  %v6771_v42 = vor.u32 %v7341_v62, %v6768_v1 }
 0x3a0   :  { %4517 = vmatmul.bf16.vlgmr.msra.gmra.mxu2 %v8081_v11  ;;  %4530 = vmatmul.bf16.vlgmr.msra.gmra.mxu3 %v8075_v9 }
 0x3a2   :  { %4536 = vmatpush.bf16.msrb.mxu0 %v6451_v20  ;;  %4549 = vmatpush.bf16.msrb.mxu1 %v6579_v31  ;;  %v6752_v20 = vld [vmem:[#allocation10 + $0x338] sm:$0xf0]  ;;  %v6371_v31 = vor.u32 %v7241_v50, %v6368_v52 }
 0x3a3   :  { %4562 = vmatpush.bf16.msrb.mxu2 %v6707_v2  ;;  %4575 = vmatpush.bf16.msrb.mxu3 %v6835_v60  ;;  %v6352_v2 = vld [vmem:[#allocation10 + $0x18] sm:$0xf0]  ;;  %v6627_v60 = vor.u32 %v7305_v61, %v6624_v48  ;;  %v6755_v5 = vor.u32 %v7337_v51, %v6752_v20 }
 0x3a6   :  { %4537 = vmatpush.bf16.msrb.mxu0 %v6435_v22  ;;  %4550 = vmatpush.bf16.msrb.mxu1 %v6563_v24  ;;  %v6736_v22 = vld [vmem:[#allocation10 + $0x318] sm:$0xf0]  ;;  %v6355_v24 = vor.u32 %v7237_v12, %v6352_v2 }
 0x3a7   :  { %4563 = vmatpush.bf16.msrb.mxu2 %v6691_v29  ;;  %4576 = vmatpush.bf16.msrb.mxu3 %v6819_v30  ;;  %v6739_v29 = vor.u32 %v7333_v54, %v6736_v22 }
 0x3aa   :  { %4538 = vmatpush.bf16.msrb.mxu0 %v6419_v17  ;;  %4551 = vmatpush.bf16.msrb.mxu1 %v6547_v18 }
 0x3ab   :  { %4564 = vmatpush.bf16.msrb.mxu2 %v6675_v40  ;;  %4577 = vmatpush.bf16.msrb.mxu3 %v6803_v13 }
 0x3ae   :  { %4539 = vmatpush.bf16.msrb.mxu0 %v6403_v21  ;;  %4552 = vmatpush.bf16.msrb.mxu1 %v6531_v38 }
 0x3af   :  { %4565 = vmatpush.bf16.msrb.mxu2 %v6659_v25  ;;  %4578 = vmatpush.bf16.msrb.mxu3 %v6787_v53 }
 0x3b2   :  { %4540 = vmatpush.bf16.msrb.mxu0 %v6387_v6  ;;  %4553 = vmatpush.bf16.msrb.mxu1 %v6515_v45 }
 0x3b3   :  { %4566 = vmatpush.bf16.msrb.mxu2 %v6643_v23  ;;  %4579 = vmatpush.bf16.msrb.mxu3 %v6771_v42 }
 0x3b6   :  { %4541 = vmatpush.bf16.msrb.mxu0 %v6371_v31  ;;  %4554 = vmatpush.bf16.msrb.mxu1 %v6499_v0 }
 0x3b7   :  { %4567 = vmatpush.bf16.msrb.mxu2 %v6627_v60  ;;  %4580 = vmatpush.bf16.msrb.mxu3 %v6755_v5 }
 0x3ba   :  { %4542 = vmatpush.bf16.msrb.mxu0 %v6355_v24  ;;  %4555 = vmatpush.bf16.msrb.mxu1 %v6483_v15 }
 0x3bb   :  { %4568 = vmatpush.bf16.msrb.mxu2 %v6611_v28  ;;  %4581 = vmatpush.bf16.msrb.mxu3 %v6739_v29 }
 0x3bd   :  { %4543 = vmatmul.bf16.vlgmr.msrb.gmra.mxu0 %v8077_v10  ;;  %4556 = vmatmul.bf16.vlgmr.msrb.gmra.mxu1 %v8079_v7 }
 0x3be   :  { %4569 = vmatmul.bf16.vlgmr.msrb.gmra.mxu2 %v8081_v11  ;;  %4582 = vmatmul.bf16.vlgmr.msrb.gmra.mxu3 %v8075_v9 }
 0x3f9   :  { %v4388_v30 = vpop.f32.mrf.mxu0  ;;  %v4401_v36 = vpop.f32.mrf.mxu1 }
 0x3fa   :  { %v4402_v33 = vadd.f32 %v4401_v36, %v4388_v30 }
 0x400   :  { %v4414_v32 = vpop.f32.mrf.mxu2  ;;  %v4427_v4 = vpop.f32.mrf.mxu3 }
 0x401   :  { %v4415_v58 = vadd.f32 %v4414_v32, %v4402_v33  ;;  %v4390_v37 = vpop.f32.mrf.mxu0  ;;  %v4403_v17 = vpop.f32.mrf.mxu1 }
 0x403   :  { %v8099_v18 = vadd.f32 %v4427_v4, %v4415_v58 }
 0x405   :  { %v4587_v47 = vrot.slane %v8099_v18, 4  ;;  %v4615_v57 = vmul.f32 %v8099_v18, %v8099_v18 }
 0x407   :  { %v4588_v23 = vadd.f32 %v4587_v47, %v8099_v18  ;;  %v4619_v42 = vrot.slane %v4615_v57, 4 }
 0x408   :  { %v4416_v3 = vpop.f32.mrf.mxu2  ;;  %v4429_v43 = vpop.f32.mrf.mxu3 }
 0x409   :  { %v4440_v40 = vpop.f32.mrf.mxu0  ;;  %v4453_v10 = vpop.f32.mrf.mxu1  ;;  %v4589_v12 = vrot.slane %v4588_v23, 2  ;;  %v4620_v2 = vadd.f32 %v4619_v42, %v4615_v57 }
 0x40a   :  { %v4454_v35 = vadd.f32 %v4453_v10, %v4440_v40 }
 0x40b   :  { %v4590_v54 = vadd.f32 %v4589_v12, %v4588_v23  ;;  %v4621_v22 = vrot.slane %v4620_v2, 2 }
 0x40d   :  { %v4591_v30 = vrot.slane %v4590_v54, 1  ;;  %v4622_v36 = vadd.f32 %v4621_v22, %v4620_v2 }
 0x40f   :  { %v4592_v37 = vadd.f32 %v4591_v30, %v4590_v54  ;;  %v4623_v17 = vrot.slane %v4622_v36, 1 }
 0x410   :  { %v4466_v13 = vpop.f32.mrf.mxu2  ;;  %v4479_v7 = vpop.f32.mrf.mxu3 }
 0x411   :  { %v4442_v14 = vpop.f32.mrf.mxu0  ;;  %v4455_v11 = vpop.f32.mrf.mxu1  ;;  %v4467_v9 = vadd.f32 %v4466_v13, %v4454_v35 }
 0x412   :  { %v8127_v14 = vmul.f32 %v4592_v37, %v7695_v49  ;;  %v4624_v11 = vadd.f32 %v4623_v17, %v4622_v36 }
 0x413   :  { %v8101_v16 = vadd.f32 %v4479_v7, %v4467_v9 }
 0x415   :  { %v4593_v38 = vrot.slane %v8101_v16, 4  ;;  %v4616_v34 = vmul.f32 %v8101_v16, %v8101_v16 }
 0x417   :  { %v4594_v25 = vadd.f32 %v4593_v38, %v8101_v16  ;;  %v4625_v53 = vrot.slane %v4616_v34, 4 }
 0x418   :  { %v4468_v19 = vpop.f32.mrf.mxu2  ;;  %v4481_v56 = vpop.f32.mrf.mxu3 }
 0x419   :  { %v4595_v50 = vrot.slane %v4594_v25, 2  ;;  %v4626_v52 = vadd.f32 %v4625_v53, %v4616_v34 }
 0x41a   :  { %v4492_v26 = vpop.f32.mrf.mxu0  ;;  %v4505_v21 = vpop.f32.mrf.mxu1 }
 0x41b   :  { %v4506_v41 = vadd.f32 %v4505_v21, %v4492_v26  ;;  %v4596_v51 = vadd.f32 %v4595_v50, %v4594_v25  ;;  %v4627_v20 = vrot.slane %v4626_v52, 2  ;;  %v4643_v26 = vmul.f32 %v4624_v11, %v7695_v49 }
 0x41c   :  { %v4647_v21 = vmul.f32 %v8127_v14, %v8127_v14 }
 0x41d   :  { %v4597_v63 = vrot.slane %v4596_v51, 1  ;;  %v4628_v8 = vadd.f32 %v4627_v20, %v4626_v52 }
 0x41e   :  { %v4651_v57 = vsub.f32 %v4643_v26, %v4647_v21 }
 0x41f   :  { %v4598_v28 = vadd.f32 %v4597_v63, %v4596_v51  ;;  %v4629_v29 = vrot.slane %v4628_v8, 1 }
 0x420   :  { %v4655_v42 = vmax.f32 %v4651_v57, 0.0  ;;  %v3604_v57 = vld [vmem:[#allocation11 + $0x3] ss:$8 sm:$0xf] }
 0x421   :  { %v8118_v4 = vmul.f32 %v4598_v28, %v7695_v49  ;;  %v4630_v58 = vadd.f32 %v4629_v29, %v4628_v8 }
 0x422   :  { %v4494_v1 = vpop.f32.mrf.mxu0  ;;  %v4507_v6 = vpop.f32.mrf.mxu1 }
 0x423   :  { %v4518_v44 = vpop.f32.mrf.mxu2  ;;  %v4531_v46 = vpop.f32.mrf.mxu3  ;;  %v4644_v13 = vmul.f32 %v4630_v58, %v7695_v49  ;;  %v4648_v7 = vmul.f32 %v8118_v4, %v8118_v4 }
 0x424   :  { %v4519_v62 = vadd.f32 %v4518_v44, %v4506_v41 }
 0x425   :  { %v4652_v19 = vsub.f32 %v4644_v13, %v4648_v7 }
 0x426   :  { %v8110_v45 = vadd.f32 %v4531_v46, %v4519_v62 }
 0x427   :  { %v4656_v46 = vmax.f32 %v4652_v19, 0.0 }
 0x428   :  { %v4599_v59 = vrot.slane %v8110_v45, 4  ;;  %v4617_v55 = vmul.f32 %v8110_v45, %v8110_v45 }
 0x429   :  { %v4660_v50 = vadd.f32 1e-05, %v4656_v46 }
 0x42a   :  { %v4600_v61 = vadd.f32 %v4599_v59, %v8110_v45  ;;  %v4631_v48 = vrot.slane %v4617_v55, 4 }
 0x42b   :  { %v4520_v31 = vpop.f32.mrf.mxu2  ;;  %v4533_v0 = vpop.f32.mrf.mxu3  ;;  %7402 = vrsqrt.f32 %v4660_v50  ;;  %vm4679_vm13 = vweird.f32 %v4660_v50 }
 0x42c   :  { %v4601_v60 = vrot.slane %v4600_v61, 2  ;;  %v4632_v5 = vadd.f32 %v4631_v48, %v4617_v55  ;;  %v4659_v0 = vadd.f32 1e-05, %v4655_v42 }
 0x42e   :  { %v4602_v39 = vadd.f32 %v4601_v60, %v4600_v61  ;;  %v4633_v27 = vrot.slane %v4632_v5, 2  ;;  %vm4669_vm9 = vweird.f32 %v4659_v0 }
 0x430   :  { %v4603_v24 = vrot.slane %v4602_v39, 1  ;;  %v4634_v15 = vadd.f32 %v4633_v27, %v4632_v5 }
 0x432   :  { %v4604_v33 = vadd.f32 %v4603_v24, %v4602_v39  ;;  %v4635_v32 = vrot.slane %v4634_v15, 1  ;;  %v7403_v39 = vpop.eup %7402 }
 0x433   :  { %v4674_v24 = vmul.f32 %v7403_v39, %v4660_v50  ;;  %vm4680_vm12 = vweird.f32 %v7403_v39 }
 0x434   :  { %v4636_v3 = vadd.f32 %v4635_v32, %v4634_v15  ;;  %v8121_v10 = vmul.f32 %v4604_v33, %v7695_v49  ;;  %vm4681_vm1 = vmor %vm4679_vm13, %vm4680_vm12 }
 0x435   :  { %v4675_v36 = vmul.f32 %v7403_v39, %v4674_v24 }
 0x436   :  { %v4645_v35 = vmul.f32 %v4636_v3, %v7695_v49  ;;  %v4649_v9 = vmul.f32 %v8121_v10, %v8121_v10 }
 0x437   :  { %v4676_v37 = vmul.f32 0.5, %v4675_v36 }
 0x438   :  { %v4653_v44 = vsub.f32 %v4645_v35, %v4649_v9 }
 0x43a   :  { %v4544_v43 = vpop.f32.mrf.mxu0  ;;  %v4557_v40 = vpop.f32.mrf.mxu1  ;;  %v4657_v6 = vmax.f32 %v4653_v44, 0.0 }
 0x43b   :  { %v4558_v56 = vadd.f32 %v4557_v40, %v4544_v43  ;;  %v4677_v43 = vsub.f32 1.5, %v4676_v37 }
 0x43c   :  { %v4661_v51 = vadd.f32 1e-05, %v4657_v6 }
 0x43e   :  { %7404 = vrsqrt.f32 %v4661_v51  ;;  %vm4689_vm2 = vweird.f32 %v4661_v51 }
 0x43f   :  { %7406 = vrsqrt.f32 %v4659_v0 }
 0x441   :  { %v4570_v38 = vpop.f32.mrf.mxu2  ;;  %v4583_v34 = vpop.f32.mrf.mxu3 }
 0x442   :  { %v4571_v41 = vadd.f32 %v4570_v38, %v4558_v56  ;;  %v4546_v25 = vpop.f32.mrf.mxu0  ;;  %v4559_v53 = vpop.f32.mrf.mxu1 }
 0x444   :  { %v8135_v47 = vadd.f32 %v4583_v34, %v4571_v41  ;;  %v7405_v8 = vpop.eup %7404 }
 0x445   :  { %v7407_v28 = vpop.eup %7406  ;;  %v4684_v29 = vmul.f32 %v7405_v8, %v4661_v51  ;;  %vm4690_vm0 = vweird.f32 %v7405_v8 }
 0x446   :  { %v4605_v62 = vrot.slane %v8135_v47, 4  ;;  %v4618_v1 = vmul.f32 %v8135_v47, %v8135_v47  ;;  %v4664_v33 = vmul.f32 %v7407_v28, %v4659_v0  ;;  %vm4670_vm4 = vweird.f32 %v7407_v28  ;;  %vm4691_vm5 = vmor %vm4689_vm2, %vm4690_vm0 }
 0x447   :  { %v4685_v58 = vmul.f32 %v7405_v8, %v4684_v29  ;;  %vm4671_vm10 = vmor %vm4669_vm9, %vm4670_vm4 }
 0x448   :  { %v4606_v52 = vadd.f32 %v4605_v62, %v8135_v47  ;;  %v4637_v23 = vrot.slane %v4618_v1, 4  ;;  %v4665_v17 = vmul.f32 %v7407_v28, %v4664_v33 }
 0x449   :  { %v4572_v59 = vpop.f32.mrf.mxu2  ;;  %v4585_v55 = vpop.f32.mrf.mxu3  ;;  %v4686_v3 = vmul.f32 0.5, %v4685_v58 }
 0x44a   :  { %v4607_v61 = vrot.slane %v4606_v52, 2  ;;  %v4638_v48 = vadd.f32 %v4637_v23, %v4618_v1  ;;  %v4666_v13 = vmul.f32 0.5, %v4665_v17 }
 0x44b   :  { %v4687_v7 = vsub.f32 1.5, %v4686_v3 }
 0x44c   :  { %v4608_v20 = vadd.f32 %v4607_v61, %v4606_v52  ;;  %v4639_v31 = vrot.slane %v4638_v48, 2  ;;  %v4667_v9 = vsub.f32 1.5, %v4666_v13 }
 0x44d   :  { %v4688_v19 = vmul.f32 %v7405_v8, %v4687_v7 }
 0x44e   :  { %v4609_v12 = vrot.slane %v4608_v20, 1  ;;  %v4640_v2 = vadd.f32 %v4639_v31, %v4638_v48  ;;  %v4668_v38 = vmul.f32 %v7407_v28, %v4667_v9 }
 0x44f   :  { %v4692_v34 = vsel %vm4691_vm5, %v7405_v8, %v4688_v19  ;;  %v4762_v8 = vld [vmem:[#allocation11 + $0x20] ss:$8 sm:$0xf] }
 0x450   :  { %v4610_v60 = vadd.f32 %v4609_v12, %v4608_v20  ;;  %v4641_v5 = vrot.slane %v4640_v2, 1  ;;  %v4708_v44 = vrot.slane %v4692_v34, 6  ;;  %v4672_v62 = vsel %vm4671_vm10, %v7407_v28, %v4668_v38 }
 0x451   :  { %v4765_v28 = vperm.slane %v4762_v8, 0  ;;  %v4766_v29 = vperm.slane %v4762_v8, 1 }
 0x452   :  { %v4642_v27 = vadd.f32 %v4641_v5, %v4640_v2  ;;  %v4614_v63 = vmul.f32 %v4610_v60, %v7695_v49  ;;  %v3606_v2 = vld [vmem:[#allocation11 + $0x7] ss:$8 sm:$0xf] }
 0x454   :  { %v4646_v54 = vmul.f32 %v4642_v27, %v7695_v49  ;;  %v4650_v22 = vmul.f32 %v4614_v63, %v4614_v63  ;;  %v4678_v49 = vmul.f32 %v7403_v39, %v4677_v43 }
 0x456   :  { %v4654_v15 = vsub.f32 %v4646_v54, %v4650_v22  ;;  %v4682_v26 = vsel %vm4681_vm1, %v7403_v39, %v4678_v49  ;;  %v4763_v49 = vld [vmem:[#allocation11 + $0x21] ss:$0 sm:$0xff] }
 0x457   :  { %v4707_v25 = vrot.slane %v4682_v26, 7 }
 0x458   :  { %v4658_v30 = vmax.f32 %v4654_v15, 0.0 }
 0x459   :  { %v4710_v1 = vsel %vm1233_vm7, %v4672_v62, %v4707_v25 }
 0x45a   :  { %v4662_v32 = vadd.f32 1e-05, %v4658_v30 }
 0x45c   :  { %7408 = vrsqrt.f32 %v4662_v32  ;;  %vm4699_vm6 = vweird.f32 %v4662_v32 }
 0x462   :  { %v7409_v40 = vpop.eup %7408 }
 0x463   :  { %v4694_v11 = vmul.f32 %v7409_v40, %v4662_v32  ;;  %vm4700_vm3 = vweird.f32 %v7409_v40 }
 0x464   :  { %vm4701_vm8 = vmor %vm4699_vm6, %vm4700_vm3 }
 0x465   :  { %v4695_v35 = vmul.f32 %v7409_v40, %v4694_v11 }
 0x467   :  { %v4696_v56 = vmul.f32 0.5, %v4695_v35 }
 0x469   :  { %v4697_v21 = vsub.f32 1.5, %v4696_v56 }
 0x46b   :  { %v4698_v41 = vmul.f32 %v7409_v40, %v4697_v21 }
 0x46d   :  { %v4702_v53 = vsel %vm4701_vm8, %v7409_v40, %v4698_v41 }
 0x46e   :  { %v4709_v46 = vrot.slane %v4702_v53, 5 }
 0x470   :  { %v4711_v6 = vsel %vm1235_vm14, %v4708_v44, %v4709_v46 }
 0x471   :  { %v4712_v50 = vsel %vm1237_vm15, %v4710_v1, %v4711_v6 }
 0x472   :  { %v4714_v52 = vmul.f32 %v4712_v50, %v3604_v57 }
 0x474   :  { %v4716_v23 = vperm.slane %v4714_v52, 0  ;;  %v4717_v42 = vperm.slane %v4714_v52, 1  ;;  %v4718_v59 = vperm.slane %v4714_v52, 2  ;;  %v4719_v55 = vperm.slane %v4714_v52, 3 }
 0x476   :  { %v4725_v61 = vmul.f32 %v4717_v42, %v8118_v4  ;;  %v4726_v48 = vmul.f32 %v4718_v59, %v8121_v10  ;;  %v4727_v51 = vmul.f32 %v4719_v55, %v4614_v63  ;;  %v4724_v20 = vmul.f32 %v4716_v23, %v8127_v14 }
 0x477   :  { %v4740_v54 = vmul.f32 %v4716_v23, %v8099_v18  ;;  %v4741_v4 = vmul.f32 %v4717_v42, %v8101_v16  ;;  %v4742_v10 = vmul.f32 %v4718_v59, %v8110_v45  ;;  %v4743_v14 = vmul.f32 %v4719_v55, %v8135_v47 }
 0x478   :  { %v4732_v31 = vrot.slane %v4725_v61, 7  ;;  %v4733_v0 = vrot.slane %v4726_v48, 6  ;;  %v4734_v12 = vrot.slane %v4727_v51, 5  ;;  %v4767_v18 = vperm.slane %v4762_v8, 2 }
 0x479   :  { %v4768_v16 = vperm.slane %v4762_v8, 3 }
 0x47a   :  { %v4735_v60 = vsel %vm1233_vm7, %v4724_v20, %v4732_v31  ;;  %v4736_v5 = vsel %vm1235_vm14, %v4733_v0, %v4734_v12 }
 0x47b   :  { %v4737_v39 = vsel %vm1237_vm15, %v4735_v60, %v4736_v5 }
 0x47c   :  { %v4739_v27 = vsub.f32 %v3606_v2, %v4737_v39 }
 0x47e   :  { %v4745_v63 = vperm.slane %v4739_v27, 0  ;;  %v4746_v22 = vperm.slane %v4739_v27, 1  ;;  %v4747_v24 = vperm.slane %v4739_v27, 2  ;;  %v4748_v15 = vperm.slane %v4739_v27, 3 }
 0x480   :  { %v4753_v30 = vadd.f32 %v4745_v63, %v4740_v54  ;;  %v4754_v36 = vadd.f32 %v4746_v22, %v4741_v4  ;;  %v4755_v33 = vadd.f32 %v4747_v24, %v4742_v10  ;;  %v4756_v32 = vadd.f32 %v4748_v15, %v4743_v14 }
 0x482   :  { %v4757_v58 = vmax.f32 %v4753_v30, 0.0  ;;  %v4758_v37 = vmax.f32 %v4754_v36, 0.0  ;;  %v4759_v17 = vmax.f32 %v4755_v33, 0.0  ;;  %v4760_v3 = vmax.f32 %v4756_v32, 0.0 }
 0x484   :  { %v4773_v43 = vmul.f32 %v4765_v28, %v4757_v58  ;;  %v4774_v45 = vmul.f32 %v4766_v29, %v4758_v37  ;;  %v4775_v40 = vmul.f32 %v4767_v18, %v4759_v17  ;;  %v4776_v13 = vmul.f32 %v4768_v16, %v4760_v3 }
 0x486   :  { %v4777_v47 = vadd.f32 %v4774_v45, %v4773_v43 }
 0x488   :  { %v4778_v7 = vadd.f32 %v4777_v47, %v4775_v40 }
 0x48a   :  { %v4779_v11 = vadd.f32 %v4778_v7, %v4776_v13 }
 0x48c   :  { %4780 = vadd.xlane.f32.xlu0 %v4779_v11 }
 0x4ff   :  { %v4781_v35 = vpop.xlane.xlu0 %4780 }
 0x500   :  { %v4782_v9 = vadd.f32 %v4781_v35, %v4763_v49 }
 0x502   :  { %4783 = vst [vmem:[#allocation13] sm:$0xff] %v4782_v9 }
 0x503   :  { %4794 = dma.vmem_to_hbm [thread:$0]  %s4790_s26, 128, %s4792_s29, [#allocation4]  }
 0x504   :  { %7586 = dma.done.wait [#allocation4], 128  }
 0x505   :  { %7587 = vsyncadd [#allocation4], 4294967168 }
 0x506   :  { %4799 = vsyncpa [#allocation3], 1 }
 0x507   :  { %4800 = vsyncpa [#allocation6], 1 }
 0x508   :  { %4801 = vsyncpa [#allocation9], 1 }
 0x509   :  { %4802 = vsyncpa [#allocation12], 1 }
 0x50a   :  { %4803 = vsyncpa [#allocation4], 1 }

</bundles_post_ra>
